<compile_context>
chip_gen: v7x
topology: tpu7x:2x2x1
jax: 0.10.0
libtpu: 0.0.40
codegen_flags: <defaults>
</compile_context>

<pallas_src>
import functools

import jax
import jax.numpy as jnp
from jax.experimental import pallas as pl
from jax.experimental.pallas import tpu as pltpu


# ----------------------------------------------------------------------------
# Kernel helpers
# ----------------------------------------------------------------------------

def _layernorm(v, eps):
    mu = jnp.mean(v, axis=-1, keepdims=True)
    var = jnp.mean(jnp.square(v - mu), axis=-1, keepdims=True)
    return (v - mu) * jax.lax.rsqrt(var + eps)


def _erf(z):
    # Abramowitz & Stegun 7.1.26 (max abs err ~1.5e-7).  Uses only exp / div /
    # where, all of which lower cleanly in Mosaic.
    a1, a2, a3, a4, a5 = 0.254829592, -0.284496736, 1.421413741, -1.453152027, 1.061405429
    p = 0.3275911
    sgn = jnp.where(z < 0.0, -1.0, 1.0)
    za = jnp.abs(z)
    t = 1.0 / (1.0 + p * za)
    poly = ((((a5 * t + a4) * t + a3) * t + a2) * t + a1) * t
    return sgn * (1.0 - poly * jnp.exp(-za * za))


def _gelu(x):
    # Exact GELU: x * Phi(x) = 0.5 * x * (1 + erf(x / sqrt(2)))
    return 0.5 * x * (1.0 + _erf(x * 0.7071067811865476))


def _mxu(a, w):
    """MXU matmul: bf16 operands, f32 accumulation."""
    return jnp.dot(a.astype(jnp.bfloat16), w.astype(jnp.bfloat16),
                   preferred_element_type=jnp.float32)


# ----------------------------------------------------------------------------
# Fused forward kernel: encode -> n_layers x AdaLNLayer -> FinalLayer
# ----------------------------------------------------------------------------

def gpt_adaln_kernel(
        # batch-blocked inputs (constant along the layer axis)
        state_ref, actions_ref, pos_ref, obj_ref,
        # encoder weights (grid-invariant)
        ws_ref, bs_ref, wa_ref, ba_ref,
        # per-layer weights (streamed along the layer grid axis)
        wada_ref, bada_ref,
        wq_ref, bq_ref, wk_ref, bk_ref, wv_ref, bv_ref, wo_ref, bo_ref,
        w1_ref, b1_ref, w2_ref, b2_ref,
        # final-layer weights (grid-invariant)
        wadaf_ref, badaf_ref, wlin_ref, blin_ref,
        # output
        out_ref,
        # VMEM-resident activations (persist across the layer axis)
        x_scr, silu_scr,
        *, num_heads, tb, n_agents, eps):
    layer = pl.program_id(1)
    n_layers = pl.num_programs(1)
    D = x_scr.shape[-1]
    R = tb * n_agents
    H = num_heads
    hd = D // H
    inv_sqrt_hd = 1.0 / float(hd) ** 0.5

    # ---- input encodings (first layer step only): fill VMEM scratch -------------
    @pl.when(layer == 0)
    def _encode():
        state = state_ref[...].reshape(R, state_ref.shape[-1])
        actions = actions_ref[...].reshape(R, actions_ref.shape[-1])
        cond = (pos_ref[...] + obj_ref[...]).reshape(R, D)
        cond = cond + _mxu(state, ws_ref[...]) + bs_ref[...]
        silu_scr[...] = cond * jax.nn.sigmoid(cond)     # SiLU(cond), reused by all layers
        act = _mxu(actions, wa_ref[...]) + ba_ref[...]
        x_scr[...] = _gelu(act)

    x = x_scr[...]                                       # (R, D) f32
    silu_b = silu_scr[...].astype(jnp.bfloat16)          # MXU operand

    # ---- adaLN modulation: 6 chunks via leading-axis stacked weights ------------
    wada = wada_ref[0]                                   # (6, D, D) bf16
    bada = bada_ref[0]                                   # (6, 1, D) f32

    def _mod(c):
        return jnp.dot(silu_b, wada[c], preferred_element_type=jnp.float32) + bada[c]

    shift_msa, scale_msa, gate_msa = _mod(0), _mod(1), _mod(2)
    shift_mlp, scale_mlp, gate_mlp = _mod(3), _mod(4), _mod(5)

    # ---- masked multi-head self-attention on modulate(LN1(x)) -------------------
    moduln = _layernorm(x, eps) * (1.0 + scale_msa) + shift_msa
    mb = moduln.astype(jnp.bfloat16)

    row = jax.lax.broadcasted_iota(jnp.int32, (n_agents, n_agents), 0)
    col = jax.lax.broadcasted_iota(jnp.int32, (n_agents, n_agents), 1)
    causal = (row >= col)[None, :, :]                    # (1, N, N)

    wq_l, wk_l, wv_l, wo_l = wq_ref[0], wk_ref[0], wv_ref[0], wo_ref[0]
    bq_l, bk_l, bv_l = bq_ref[0], bk_ref[0], bv_ref[0]

    attn = jnp.zeros((R, D), jnp.float32)
    for h in range(H):   # static unroll; per-head weights are free leading-axis views
        qh = (jnp.dot(mb, wq_l[h], preferred_element_type=jnp.float32) + bq_l[h]
              ).reshape(tb, n_agents, hd)
        kh = (jnp.dot(mb, wk_l[h], preferred_element_type=jnp.float32) + bk_l[h]
              ).reshape(tb, n_agents, hd)
        vh = (jnp.dot(mb, wv_l[h], preferred_element_type=jnp.float32) + bv_l[h]
              ).reshape(tb, n_agents, hd)
        s = jnp.einsum('bqd,bkd->bqk',
                       qh.astype(jnp.bfloat16), kh.astype(jnp.bfloat16),
                       preferred_element_type=jnp.float32) * inv_sqrt_hd
        s = jnp.where(causal, s, -1e30)                  # finite mask value (no -inf NaNs)
        s = s - jnp.max(s, axis=-1, keepdims=True)
        p = jnp.exp(s)
        p = p * pl.reciprocal(jnp.sum(p, axis=-1, keepdims=True), approx=True)
        oh = jnp.einsum('bqk,bkd->bqd',
                        p.astype(jnp.bfloat16), vh.astype(jnp.bfloat16),
                        preferred_element_type=jnp.float32).reshape(R, hd)
        # per-head slice of W_O accumulates the combined projection (no concat)
        attn = attn + jnp.dot(oh.astype(jnp.bfloat16), wo_l[h],
                              preferred_element_type=jnp.float32)
    attn = attn + bo_ref[0]
    x = x + gate_msa * attn

    # ---- adaLN-modulated MLP -----------------------------------------------------
    moduln2 = _layernorm(x, eps) * (1.0 + scale_mlp) + shift_mlp
    h1 = _gelu(_mxu(moduln2, w1_ref[0]) + b1_ref[0])
    x = x + gate_mlp * (_mxu(h1, w2_ref[0]) + b2_ref[0])
    x_scr[...] = x

    # ---- final layer (after the last decoder layer) ------------------------------
    @pl.when(layer == n_layers - 1)
    def _final():
        wf = wadaf_ref[...]                              # (2, D, D) bf16
        bf = badaf_ref[...]                              # (2, 1, D) f32
        shift = jnp.dot(silu_b, wf[0], preferred_element_type=jnp.float32) + bf[0]
        scale = jnp.dot(silu_b, wf[1], preferred_element_type=jnp.float32) + bf[1]
        xm = _layernorm(x, eps) * (1.0 + scale) + shift
        out = _mxu(xm, wlin_ref[...]) + blin_ref[...]
        out_ref[...] = out.reshape(tb, n_agents, out_ref.shape[-1])


# ----------------------------------------------------------------------------
# pallas_call wrapper (layout plumbing + BlockSpecs)
# ----------------------------------------------------------------------------

def gpt_adaln_forward(params, state, actions, obj_name_encs, pos, num_heads,
                      batch_block=8):
    """Fused GPT_AdaLN forward. Returns (B, n_agents, out_dim) float32."""
    B, N, _ = state.shape
    D = params["enc"]["ws"].shape[1]
    L = len(params["layers"])
    A = params["final"]["w_lin"].shape[1]
    H = num_heads
    hd = D // H
    assert D % H == 0 and L >= 1

    tb = min(batch_block, B)
    assert B % tb == 0, "batch must divide the batch block size"
    nb = B // tb

    # ---- embedding gathers (plain JAX glue) --------------------------------------
    pos_emb = params["pos_table"][pos[..., 0]]                    # (B, N, D)
    obj_emb = params["obj_table"][obj_name_encs][:, None, :]      # (B, 1, D)

    # ---- restructure weights into kernel-friendly stacked layouts ----------------
    bf16 = jnp.bfloat16
    layers = params["layers"]

    def stack(fn):
        return jnp.stack([fn(lp) for lp in layers], axis=0)

    w_ada = stack(lambda lp: lp["w_ada"].reshape(D, 6, D).transpose(1, 0, 2)).astype(bf16)
    b_ada = stack(lambda lp: lp["b_ada"].reshape(6, D)[:, None, :])
    wq = stack(lambda lp: lp["wq"].reshape(D, H, hd).transpose(1, 0, 2)).astype(bf16)
    wk = stack(lambda lp: lp["wk"].reshape(D, H, hd).transpose(1, 0, 2)).astype(bf16)
    wv = stack(lambda lp: lp["wv"].reshape(D, H, hd).transpose(1, 0, 2)).astype(bf16)
    bq = stack(lambda lp: lp["bq"].reshape(H, hd)[:, None, :])
    bk = stack(lambda lp: lp["bk"].reshape(H, hd)[:, None, :])
    bv = stack(lambda lp: lp["bv"].reshape(H, hd)[:, None, :])
    wo = stack(lambda lp: lp["wo"].reshape(H, hd, D)).astype(bf16)
    bo = stack(lambda lp: lp["bo"])
    w1 = stack(lambda lp: lp["w1"]).astype(bf16)
    b1 = stack(lambda lp: lp["b1"])
    w2 = stack(lambda lp: lp["w2"]).astype(bf16)
    b2 = stack(lambda lp: lp["b2"])

    enc = params["enc"]
    fin = params["final"]
    ws = enc["ws"].astype(bf16)
    wa = enc["wa"].astype(bf16)
    w_ada_f = fin["w_ada"].reshape(D, 2, D).transpose(1, 0, 2).astype(bf16)
    b_ada_f = fin["b_ada"].reshape(2, D)[:, None, :]
    w_lin = fin["w_lin"].astype(bf16)

    args = (state, actions, pos_emb, obj_emb,
            ws, enc["bs"], wa, enc["ba"],
            w_ada, b_ada, wq, bq, wk, bk, wv, bv, wo, bo, w1, b1, w2, b2,
            w_ada_f, b_ada_f, w_lin, fin["b_lin"])

    # ---- BlockSpecs ---------------------------------------------------------------
    def bspec(shape):       # batch-blocked arrays, constant along the layer axis
        nd = len(shape)
        return pl.BlockSpec((tb,) + tuple(shape[1:]),
                            lambda b, l, _n=nd: (b,) + (0,) * (_n - 1))

    def cspec(shape):       # grid-invariant (encoder / final-layer) weights
        nd = len(shape)
        return pl.BlockSpec(tuple(shape), lambda b, l, _n=nd: (0,) * _n)

    def lspec(shape):       # per-layer stacked weights, streamed along the layer axis
        nd = len(shape)
        return pl.BlockSpec((1,) + tuple(shape[1:]),
                            lambda b, l, _n=nd: (l,) + (0,) * (_n - 1))

    in_specs = [bspec(state.shape), bspec(actions.shape),
                bspec(pos_emb.shape), bspec(obj_emb.shape),
                cspec(ws.shape), cspec(enc["bs"].shape),
                cspec(wa.shape), cspec(enc["ba"].shape),
                lspec(w_ada.shape), lspec(b_ada.shape),
                lspec(wq.shape), lspec(bq.shape), lspec(wk.shape), lspec(bk.shape),
                lspec(wv.shape), lspec(bv.shape), lspec(wo.shape), lspec(bo.shape),
                lspec(w1.shape), lspec(b1.shape), lspec(w2.shape), lspec(b2.shape),
                cspec(w_ada_f.shape), cspec(b_ada_f.shape),
                cspec(w_lin.shape), cspec(fin["b_lin"].shape)]

    kernel = functools.partial(gpt_adaln_kernel, num_heads=H, tb=tb, n_agents=N,
                               eps=1e-6)
    return pl.pallas_call(
        kernel,
        grid=(nb, L),
        in_specs=in_specs,
        out_specs=bspec((B, N, A)),
        out_shape=jax.ShapeDtypeStruct((B, N, A), jnp.float32),
        scratch_shapes=[pltpu.VMEM((tb * N, D), jnp.float32),   # x (act_enc)
                        pltpu.VMEM((tb * N, D), jnp.float32)],  # SiLU(cond)
        compiler_params=pltpu.CompilerParams(
            dimension_semantics=("parallel", "arbitrary"),
            vmem_limit_bytes=32 * 1024 * 1024),
    )(*args)


# ----------------------------------------------------------------------------
# Parameter init (deterministic, synthetic; PyTorch-like (in, out) layout)
# ----------------------------------------------------------------------------

def init_params(key, state_dim, obj_name_enc_dim, model_dim, action_dim,
                max_agents, dim_ff, n_layers, critic=False):
    D = model_dim
    keys = iter(jax.random.split(key, 512))

    def lin(din, dout, w_scale=0.1, b_scale=0.05):
        w = jax.random.normal(next(keys), (din, dout), jnp.float32) * w_scale
        b = jax.random.normal(next(keys), (1, dout), jnp.float32) * b_scale
        return w, b

    params = {}
    params["pos_table"] = jax.random.normal(next(keys), (max_agents, D), jnp.float32) * 0.1
    params["obj_table"] = jax.random.normal(next(keys), (obj_name_enc_dim, D), jnp.float32) * 0.1

    ws, bs = lin(state_dim, D)
    wa, ba = lin(action_dim, D)
    params["enc"] = {"ws": ws, "bs": bs, "wa": wa, "ba": ba}

    layers = []
    for _ in range(n_layers):
        lp = {}
        lp["w_ada"], lp["b_ada"] = lin(D, 6 * D)
        lp["wq"], lp["bq"] = lin(D, D)
        lp["wk"], lp["bk"] = lin(D, D)
        lp["wv"], lp["bv"] = lin(D, D)
        lp["wo"], lp["bo"] = lin(D, D)
        lp["w1"], lp["b1"] = lin(D, dim_ff)
        lp["w2"], lp["b2"] = lin(dim_ff, D)
        layers.append(lp)
    params["layers"] = layers

    out_dim = 1 if critic else action_dim
    w_ada_f, b_ada_f = lin(D, 2 * D)
    w_lin, b_lin = lin(D, out_dim)
    params["final"] = {"w_ada": w_ada_f, "b_ada": b_ada_f, "w_lin": w_lin, "b_lin": b_lin}
    return params


# ----------------------------------------------------------------------------
# Pure-JAX reference (PyTorch formulation; mirrors the kernel's precision policy:
# bf16 MXU operands, f32 accumulation, f32 elementwise; exact erf-based GELU)
# ----------------------------------------------------------------------------

def _ref_forward(params, state, actions, obj_name_encs, pos, num_heads):
    bf16 = jnp.bfloat16

    def mm(a, w):
        return jnp.einsum('...ij,jk->...ik', a.astype(bf16), w.astype(bf16),
                          preferred_element_type=jnp.float32)

    def ln(v, eps=1e-6):
        mu = v.mean(-1, keepdims=True)
        var = ((v - mu) ** 2).mean(-1, keepdims=True)
        return (v - mu) * jax.lax.rsqrt(var + eps)

    D = params["pos_table"].shape[1]
    enc = params["enc"]
    cond = (params["pos_table"][pos[..., 0]]
            + params["obj_table"][obj_name_encs][:, None, :]
            + mm(state, enc["ws"]) + enc["bs"])
    x = jax.nn.gelu(mm(actions, enc["wa"]) + enc["ba"], approximate=False)

    B, N, _ = x.shape
    H = num_heads
    hd = D // H
    tril = jnp.tril(jnp.ones((N, N)))

    def mha(m, lp):
        q = (mm(m, lp["wq"]) + lp["bq"]).reshape(B, N, H, hd).transpose(0, 2, 1, 3)
        k = (mm(m, lp["wk"]) + lp["bk"]).reshape(B, N, H, hd).transpose(0, 2, 1, 3)
        v = (mm(m, lp["wv"]) + lp["bv"]).reshape(B, N, H, hd).transpose(0, 2, 1, 3)
        s = jnp.einsum('bhqd,bhkd->bhqk', q.astype(bf16), k.astype(bf16),
                       preferred_element_type=jnp.float32) / (hd ** 0.5)
        s = jnp.where(tril == 0, -jnp.inf, s)
        pr = jax.nn.softmax(s, axis=-1)
        o = jnp.einsum('bhqk,bhkd->bhqd', pr.astype(bf16), v.astype(bf16),
                       preferred_element_type=jnp.float32)
        o = o.transpose(0, 2, 1, 3).reshape(B, N, D)
        return mm(o, lp["wo"]) + lp["bo"]

    for lp in params["layers"]:
        silu = cond * jax.nn.sigmoid(cond)
        mod = mm(silu, lp["w_ada"]) + lp["b_ada"]
        sm, scm, gm, smlp, scmlp, gmlp = jnp.split(mod, 6, axis=2)
        x = x + gm * mha(ln(x) * (1 + scm) + sm, lp)
        h = jax.nn.gelu(mm(ln(x) * (1 + scmlp) + smlp, lp["w1"]) + lp["b1"],
                        approximate=False)
        x = x + gmlp * (mm(h, lp["w2"]) + lp["b2"])

    fin = params["final"]
    silu = cond * jax.nn.sigmoid(cond)
    mod = mm(silu, fin["w_ada"]) + fin["b_ada"]
    shift, scale = jnp.split(mod, 2, axis=2)
    return mm(ln(x) * (1 + scale) + shift, fin["w_lin"]) + fin["b_lin"]


# ----------------------------------------------------------------------------

if __name__ == "__main__":
    # small config consistent with the module's forward
    bs, n_agents = 2, 8
    state_dim, action_dim = 6, 2
    model_dim, num_heads, dim_ff = 32, 4, 64
    obj_name_enc_dim, max_agents, n_layers = 5, 8, 2

    key = jax.random.PRNGKey(0)
    kp, ks, ka, ko, kpos = jax.random.split(key, 5)

    params = init_params(kp, state_dim, obj_name_enc_dim, model_dim, action_dim,
                         max_agents, dim_ff, n_layers, critic=False)

    state = jax.random.normal(ks, (bs, n_agents, state_dim), jnp.float32)
    actions = jax.random.normal(ka, (bs, n_agents, action_dim), jnp.float32)
    obj_name_encs = jax.random.randint(ko, (bs,), 0, obj_name_enc_dim)
    pos = jax.random.randint(kpos, (bs, n_agents, 1), 0, max_agents)

    out = gpt_adaln_forward(params, state, actions, obj_name_encs, pos, num_heads)
    out = jax.block_until_ready(out)

    ref = _ref_forward(params, state, actions, obj_name_encs, pos, num_heads)
    assert out.shape == (bs, n_agents, action_dim)
    assert jnp.allclose(out, ref, atol=1e-2, rtol=1e-2), "mismatch vs JAX reference"

    print("KERNEL_OK")
</pallas_src>

<mosaic_0001>
module attributes {stable_mosaic.version = 11 : i64} {
  func.func @gpt_adaln_kernel(%arg0: i32, %arg1: i32, %arg2: memref<2x8x6xf32, #tpu.memory_space<vmem>>, %arg3: memref<2x8x2xf32, #tpu.memory_space<vmem>>, %arg4: memref<2x8x32xf32, #tpu.memory_space<vmem>>, %arg5: memref<2x1x32xf32, #tpu.memory_space<vmem>>, %arg6: memref<6x32xbf16, #tpu.memory_space<vmem>>, %arg7: memref<1x32xf32, #tpu.memory_space<vmem>>, %arg8: memref<2x32xbf16, #tpu.memory_space<vmem>>, %arg9: memref<1x32xf32, #tpu.memory_space<vmem>>, %arg10: memref<1x6x32x32xbf16, #tpu.memory_space<vmem>>, %arg11: memref<1x6x1x32xf32, #tpu.memory_space<vmem>>, %arg12: memref<1x4x32x8xbf16, #tpu.memory_space<vmem>>, %arg13: memref<1x4x1x8xf32, #tpu.memory_space<vmem>>, %arg14: memref<1x4x32x8xbf16, #tpu.memory_space<vmem>>, %arg15: memref<1x4x1x8xf32, #tpu.memory_space<vmem>>, %arg16: memref<1x4x32x8xbf16, #tpu.memory_space<vmem>>, %arg17: memref<1x4x1x8xf32, #tpu.memory_space<vmem>>, %arg18: memref<1x4x8x32xbf16, #tpu.memory_space<vmem>>, %arg19: memref<1x1x32xf32, #tpu.memory_space<vmem>>, %arg20: memref<1x32x64xbf16, #tpu.memory_space<vmem>>, %arg21: memref<1x1x64xf32, #tpu.memory_space<vmem>>, %arg22: memref<1x64x32xbf16, #tpu.memory_space<vmem>>, %arg23: memref<1x1x32xf32, #tpu.memory_space<vmem>>, %arg24: memref<2x32x32xbf16, #tpu.memory_space<vmem>>, %arg25: memref<2x1x32xf32, #tpu.memory_space<vmem>>, %arg26: memref<32x2xbf16, #tpu.memory_space<vmem>>, %arg27: memref<1x2xf32, #tpu.memory_space<vmem>>, %arg28: memref<2x8x2xf32, #tpu.memory_space<vmem>>, %arg29: memref<16x32xf32, #tpu.memory_space<vmem>>, %arg30: memref<16x32xf32, #tpu.memory_space<vmem>>) attributes {dimension_semantics = [#tpu.dimension_semantics<parallel>, #tpu.dimension_semantics<arbitrary>], iteration_bounds = array<i64: 1, 2>, scalar_prefetch = 0 : i64, scratch_operands = 2 : i64, tpu.core_type = #tpu.core_type<tc>, window_params = [{transform_indices = @transform_0, window_bounds = array<i64: 2, 8, 6>}, {transform_indices = @transform_1, window_bounds = array<i64: 2, 8, 2>}, {transform_indices = @transform_2, window_bounds = array<i64: 2, 8, 32>}, {transform_indices = @transform_3, window_bounds = array<i64: 2, 1, 32>}, {pipeline_mode = #tpu.pipeline_mode<synchronous>, transform_indices = @transform_4, window_bounds = array<i64: 6, 32>}, {pipeline_mode = #tpu.pipeline_mode<synchronous>, transform_indices = @transform_5, window_bounds = array<i64: 1, 32>}, {pipeline_mode = #tpu.pipeline_mode<synchronous>, transform_indices = @transform_6, window_bounds = array<i64: 2, 32>}, {pipeline_mode = #tpu.pipeline_mode<synchronous>, transform_indices = @transform_7, window_bounds = array<i64: 1, 32>}, {transform_indices = @transform_8, window_bounds = array<i64: 1, 6, 32, 32>}, {transform_indices = @transform_9, window_bounds = array<i64: 1, 6, 1, 32>}, {transform_indices = @transform_10, window_bounds = array<i64: 1, 4, 32, 8>}, {transform_indices = @transform_11, window_bounds = array<i64: 1, 4, 1, 8>}, {transform_indices = @transform_12, window_bounds = array<i64: 1, 4, 32, 8>}, {transform_indices = @transform_13, window_bounds = array<i64: 1, 4, 1, 8>}, {transform_indices = @transform_14, window_bounds = array<i64: 1, 4, 32, 8>}, {transform_indices = @transform_15, window_bounds = array<i64: 1, 4, 1, 8>}, {transform_indices = @transform_16, window_bounds = array<i64: 1, 4, 8, 32>}, {transform_indices = @transform_17, window_bounds = array<i64: 1, 1, 32>}, {transform_indices = @transform_18, window_bounds = array<i64: 1, 32, 64>}, {transform_indices = @transform_19, window_bounds = array<i64: 1, 1, 64>}, {transform_indices = @transform_20, window_bounds = array<i64: 1, 64, 32>}, {transform_indices = @transform_21, window_bounds = array<i64: 1, 1, 32>}, {pipeline_mode = #tpu.pipeline_mode<synchronous>, transform_indices = @transform_22, window_bounds = array<i64: 2, 32, 32>}, {pipeline_mode = #tpu.pipeline_mode<synchronous>, transform_indices = @transform_23, window_bounds = array<i64: 2, 1, 32>}, {pipeline_mode = #tpu.pipeline_mode<synchronous>, transform_indices = @transform_24, window_bounds = array<i64: 32, 2>}, {pipeline_mode = #tpu.pipeline_mode<synchronous>, transform_indices = @transform_25, window_bounds = array<i64: 1, 2>}, {transform_indices = @transform_26, window_bounds = array<i64: 2, 8, 2>}]} {
    %c0_i32 = arith.constant 0 : i32
    %0 = arith.cmpi eq, %arg1, %c0_i32 : i32
    %1 = arith.extui %0 : i1 to i32
    %c0_i32_0 = arith.constant 0 : i32
    %2 = arith.cmpi ne, %1, %c0_i32_0 : i32
    scf.if %2 {
      %c0_134 = arith.constant 0 : index
      %c0_135 = arith.constant 0 : index
      %c0_136 = arith.constant 0 : index
      %393 = vector.load %arg2[%c0_134, %c0_135, %c0_136] : memref<2x8x6xf32, #tpu.memory_space<vmem>>, vector<2x8x6xf32>
      %394 = vector.shape_cast %393 : vector<2x8x6xf32> to vector<16x6xf32>
      %c0_137 = arith.constant 0 : index
      %c0_138 = arith.constant 0 : index
      %c0_139 = arith.constant 0 : index
      %395 = vector.load %arg3[%c0_137, %c0_138, %c0_139] : memref<2x8x2xf32, #tpu.memory_space<vmem>>, vector<2x8x2xf32>
      %396 = vector.shape_cast %395 : vector<2x8x2xf32> to vector<16x2xf32>
      %c0_140 = arith.constant 0 : index
      %c0_141 = arith.constant 0 : index
      %c0_142 = arith.constant 0 : index
      %397 = vector.load %arg4[%c0_140, %c0_141, %c0_142] : memref<2x8x32xf32, #tpu.memory_space<vmem>>, vector<2x8x32xf32>
      %c0_143 = arith.constant 0 : index
      %c0_144 = arith.constant 0 : index
      %c0_145 = arith.constant 0 : index
      %398 = vector.load %arg5[%c0_143, %c0_144, %c0_145] : memref<2x1x32xf32, #tpu.memory_space<vmem>>, vector<2x1x32xf32>
      %399 = vector.broadcast %398 : vector<2x1x32xf32> to vector<2x8x32xf32>
      %400 = arith.addf %397, %399 : vector<2x8x32xf32>
      %401 = vector.shape_cast %400 : vector<2x8x32xf32> to vector<16x32xf32>
      %c0_146 = arith.constant 0 : index
      %c0_147 = arith.constant 0 : index
      %402 = vector.load %arg6[%c0_146, %c0_147] : memref<6x32xbf16, #tpu.memory_space<vmem>>, vector<6x32xbf16>
      %403 = arith.truncf %394 : vector<16x6xf32> to vector<16x6xbf16>
      %cst_148 = arith.constant dense<0.000000e+00> : vector<16x32xf32>
      %404 = tpu.matmul %403, %402, %cst_148 {dimension_numbers = #tpu.dot_dimension_numbers<[1], [0], [0], [1], [0, 0, 1, 1], [], []>} : vector<16x6xbf16>, vector<6x32xbf16>, vector<16x32xf32> -> vector<16x32xf32>
      %405 = arith.addf %401, %404 : vector<16x32xf32>
      %c0_149 = arith.constant 0 : index
      %c0_150 = arith.constant 0 : index
      %406 = vector.load %arg7[%c0_149, %c0_150] : memref<1x32xf32, #tpu.memory_space<vmem>>, vector<1x32xf32>
      %407 = vector.broadcast %406 : vector<1x32xf32> to vector<16x32xf32>
      %408 = arith.addf %405, %407 : vector<16x32xf32>
      %409 = arith.negf %408 : vector<16x32xf32>
      %410 = math.exp %409 : vector<16x32xf32>
      %cst_151 = arith.constant 1.000000e+00 : f32
      %411 = vector.broadcast %cst_151 : f32 to vector<16x32xf32>
      %412 = arith.addf %411, %410 : vector<16x32xf32>
      %413 = arith.divf %411, %412 : vector<16x32xf32>
      %414 = arith.mulf %408, %413 : vector<16x32xf32>
      %c0_152 = arith.constant 0 : index
      %c0_153 = arith.constant 0 : index
      %415 = vector.load %arg30[%c0_152, %c0_153] : memref<16x32xf32, #tpu.memory_space<vmem>>, vector<16x32xf32>
      tpu.vector_store %arg30[%c0_152, %c0_153], %414 {strides = array<i32>} : memref<16x32xf32, #tpu.memory_space<vmem>>, vector<16x32xf32>,
      %c0_154 = arith.constant 0 : index
      %c0_155 = arith.constant 0 : index
      %416 = vector.load %arg8[%c0_154, %c0_155] : memref<2x32xbf16, #tpu.memory_space<vmem>>, vector<2x32xbf16>
      %417 = arith.truncf %396 : vector<16x2xf32> to vector<16x2xbf16>
      %cst_156 = arith.constant dense<0.000000e+00> : vector<16x32xf32>
      %418 = tpu.matmul %417, %416, %cst_156 {dimension_numbers = #tpu.dot_dimension_numbers<[1], [0], [0], [1], [0, 0, 1, 1], [], []>} : vector<16x2xbf16>, vector<2x32xbf16>, vector<16x32xf32> -> vector<16x32xf32>
      %c0_157 = arith.constant 0 : index
      %c0_158 = arith.constant 0 : index
      %419 = vector.load %arg9[%c0_157, %c0_158] : memref<1x32xf32, #tpu.memory_space<vmem>>, vector<1x32xf32>
      %420 = vector.broadcast %419 : vector<1x32xf32> to vector<16x32xf32>
      %421 = arith.addf %418, %420 : vector<16x32xf32>
      %cst_159 = arith.constant 5.000000e-01 : f32
      %422 = vector.broadcast %cst_159 : f32 to vector<16x32xf32>
      %423 = arith.mulf %422, %421 : vector<16x32xf32>
      %cst_160 = arith.constant 0.707106769 : f32
      %424 = vector.broadcast %cst_160 : f32 to vector<16x32xf32>
      %425 = arith.mulf %421, %424 : vector<16x32xf32>
      %cst_161 = arith.constant 0.000000e+00 : f32
      %426 = vector.broadcast %cst_161 : f32 to vector<16x32xf32>
      %427 = arith.cmpf olt, %425, %426 : vector<16x32xf32>
      %cst_162 = arith.constant -1.000000e+00 : f32
      %cst_163 = arith.constant 1.000000e+00 : f32
      %428 = vector.broadcast %cst_162 : f32 to vector<16x32xf32>
      %429 = vector.broadcast %cst_163 : f32 to vector<16x32xf32>
      %430 = arith.select %427, %428, %429 : vector<16x32xi1>, vector<16x32xf32>
      %431 = math.absf %425 : vector<16x32xf32>
      %cst_164 = arith.constant 0.327591091 : f32
      %432 = vector.broadcast %cst_164 : f32 to vector<16x32xf32>
      %433 = arith.mulf %432, %431 : vector<16x32xf32>
      %cst_165 = arith.constant 1.000000e+00 : f32
      %434 = vector.broadcast %cst_165 : f32 to vector<16x32xf32>
      %435 = arith.addf %434, %433 : vector<16x32xf32>
      %cst_166 = arith.constant 1.000000e+00 : f32
      %436 = vector.broadcast %cst_166 : f32 to vector<16x32xf32>
      %437 = arith.divf %436, %435 : vector<16x32xf32>
      %cst_167 = arith.constant 1.06140542 : f32
      %438 = vector.broadcast %cst_167 : f32 to vector<16x32xf32>
      %439 = arith.mulf %438, %437 : vector<16x32xf32>
      %cst_168 = arith.constant -1.45315206 : f32
      %440 = vector.broadcast %cst_168 : f32 to vector<16x32xf32>
      %441 = arith.addf %439, %440 : vector<16x32xf32>
      %442 = arith.mulf %441, %437 : vector<16x32xf32>
      %cst_169 = arith.constant 1.42141378 : f32
      %443 = vector.broadcast %cst_169 : f32 to vector<16x32xf32>
      %444 = arith.addf %442, %443 : vector<16x32xf32>
      %445 = arith.mulf %444, %437 : vector<16x32xf32>
      %cst_170 = arith.constant -0.284496725 : f32
      %446 = vector.broadcast %cst_170 : f32 to vector<16x32xf32>
      %447 = arith.addf %445, %446 : vector<16x32xf32>
      %448 = arith.mulf %447, %437 : vector<16x32xf32>
      %cst_171 = arith.constant 0.254829586 : f32
      %449 = vector.broadcast %cst_171 : f32 to vector<16x32xf32>
      %450 = arith.addf %448, %449 : vector<16x32xf32>
      %451 = arith.mulf %450, %437 : vector<16x32xf32>
      %cst_172 = arith.constant 0.000000e+00 : f32
      %452 = vector.broadcast %cst_172 : f32 to vector<16x32xf32>
      %453 = arith.subf %452, %431 : vector<16x32xf32>
      %454 = arith.mulf %453, %431 : vector<16x32xf32>
      %455 = math.exp %454 : vector<16x32xf32>
      %456 = arith.mulf %451, %455 : vector<16x32xf32>
      %cst_173 = arith.constant 1.000000e+00 : f32
      %457 = vector.broadcast %cst_173 : f32 to vector<16x32xf32>
      %458 = arith.subf %457, %456 : vector<16x32xf32>
      %459 = arith.mulf %430, %458 : vector<16x32xf32>
      %cst_174 = arith.constant 1.000000e+00 : f32
      %460 = vector.broadcast %cst_174 : f32 to vector<16x32xf32>
      %461 = arith.addf %460, %459 : vector<16x32xf32>
      %462 = arith.mulf %423, %461 : vector<16x32xf32>
      %c0_175 = arith.constant 0 : index
      %c0_176 = arith.constant 0 : index
      %463 = vector.load %arg29[%c0_175, %c0_176] : memref<16x32xf32, #tpu.memory_space<vmem>>, vector<16x32xf32>
      tpu.vector_store %arg29[%c0_175, %c0_176], %462 {strides = array<i32>} : memref<16x32xf32, #tpu.memory_space<vmem>>, vector<16x32xf32>,
    } else {
    }
    %c0 = arith.constant 0 : index
    %c0_1 = arith.constant 0 : index
    %3 = vector.load %arg29[%c0, %c0_1] : memref<16x32xf32, #tpu.memory_space<vmem>>, vector<16x32xf32>
    %c0_2 = arith.constant 0 : index
    %c0_3 = arith.constant 0 : index
    %4 = vector.load %arg30[%c0_2, %c0_3] : memref<16x32xf32, #tpu.memory_space<vmem>>, vector<16x32xf32>
    %5 = arith.truncf %4 : vector<16x32xf32> to vector<16x32xbf16>
    %c0_4 = arith.constant 0 : index
    %c0_5 = arith.constant 0 : index
    %c0_6 = arith.constant 0 : index
    %c0_7 = arith.constant 0 : index
    %6 = vector.load %arg10[%c0_4, %c0_5, %c0_6, %c0_7] : memref<1x6x32x32xbf16, #tpu.memory_space<vmem>>, vector<1x6x32x32xbf16>
    %7 = vector.shape_cast %6 : vector<1x6x32x32xbf16> to vector<6x32x32xbf16>
    %c0_8 = arith.constant 0 : index
    %c0_9 = arith.constant 0 : index
    %c0_10 = arith.constant 0 : index
    %c0_11 = arith.constant 0 : index
    %8 = vector.load %arg11[%c0_8, %c0_9, %c0_10, %c0_11] : memref<1x6x1x32xf32, #tpu.memory_space<vmem>>, vector<1x6x1x32xf32>
    %9 = vector.shape_cast %8 : vector<1x6x1x32xf32> to vector<6x1x32xf32>
    %10 = vector.extract_strided_slice %7 {offsets = [0, 0, 0], sizes = [1, 32, 32], strides = [1, 1, 1]} : vector<6x32x32xbf16> to vector<1x32x32xbf16>
    %11 = vector.shape_cast %10 : vector<1x32x32xbf16> to vector<32x32xbf16>
    %cst = arith.constant dense<0.000000e+00> : vector<16x32xf32>
    %12 = tpu.matmul %5, %11, %cst {dimension_numbers = #tpu.dot_dimension_numbers<[1], [0], [0], [1], [0, 0, 1, 1], [], []>} : vector<16x32xbf16>, vector<32x32xbf16>, vector<16x32xf32> -> vector<16x32xf32>
    %13 = vector.extract_strided_slice %9 {offsets = [0, 0, 0], sizes = [1, 1, 32], strides = [1, 1, 1]} : vector<6x1x32xf32> to vector<1x1x32xf32>
    %14 = vector.shape_cast %13 : vector<1x1x32xf32> to vector<1x32xf32>
    %15 = vector.broadcast %14 : vector<1x32xf32> to vector<16x32xf32>
    %16 = arith.addf %12, %15 : vector<16x32xf32>
    %17 = vector.extract_strided_slice %7 {offsets = [1, 0, 0], sizes = [1, 32, 32], strides = [1, 1, 1]} : vector<6x32x32xbf16> to vector<1x32x32xbf16>
    %18 = vector.shape_cast %17 : vector<1x32x32xbf16> to vector<32x32xbf16>
    %cst_12 = arith.constant dense<0.000000e+00> : vector<16x32xf32>
    %19 = tpu.matmul %5, %18, %cst_12 {dimension_numbers = #tpu.dot_dimension_numbers<[1], [0], [0], [1], [0, 0, 1, 1], [], []>} : vector<16x32xbf16>, vector<32x32xbf16>, vector<16x32xf32> -> vector<16x32xf32>
    %20 = vector.extract_strided_slice %9 {offsets = [1, 0, 0], sizes = [1, 1, 32], strides = [1, 1, 1]} : vector<6x1x32xf32> to vector<1x1x32xf32>
    %21 = vector.shape_cast %20 : vector<1x1x32xf32> to vector<1x32xf32>
    %22 = vector.broadcast %21 : vector<1x32xf32> to vector<16x32xf32>
    %23 = arith.addf %19, %22 : vector<16x32xf32>
    %24 = vector.extract_strided_slice %7 {offsets = [2, 0, 0], sizes = [1, 32, 32], strides = [1, 1, 1]} : vector<6x32x32xbf16> to vector<1x32x32xbf16>
    %25 = vector.shape_cast %24 : vector<1x32x32xbf16> to vector<32x32xbf16>
    %cst_13 = arith.constant dense<0.000000e+00> : vector<16x32xf32>
    %26 = tpu.matmul %5, %25, %cst_13 {dimension_numbers = #tpu.dot_dimension_numbers<[1], [0], [0], [1], [0, 0, 1, 1], [], []>} : vector<16x32xbf16>, vector<32x32xbf16>, vector<16x32xf32> -> vector<16x32xf32>
    %27 = vector.extract_strided_slice %9 {offsets = [2, 0, 0], sizes = [1, 1, 32], strides = [1, 1, 1]} : vector<6x1x32xf32> to vector<1x1x32xf32>
    %28 = vector.shape_cast %27 : vector<1x1x32xf32> to vector<1x32xf32>
    %29 = vector.broadcast %28 : vector<1x32xf32> to vector<16x32xf32>
    %30 = arith.addf %26, %29 : vector<16x32xf32>
    %31 = vector.extract_strided_slice %7 {offsets = [3, 0, 0], sizes = [1, 32, 32], strides = [1, 1, 1]} : vector<6x32x32xbf16> to vector<1x32x32xbf16>
    %32 = vector.shape_cast %31 : vector<1x32x32xbf16> to vector<32x32xbf16>
    %cst_14 = arith.constant dense<0.000000e+00> : vector<16x32xf32>
    %33 = tpu.matmul %5, %32, %cst_14 {dimension_numbers = #tpu.dot_dimension_numbers<[1], [0], [0], [1], [0, 0, 1, 1], [], []>} : vector<16x32xbf16>, vector<32x32xbf16>, vector<16x32xf32> -> vector<16x32xf32>
    %34 = vector.extract_strided_slice %9 {offsets = [3, 0, 0], sizes = [1, 1, 32], strides = [1, 1, 1]} : vector<6x1x32xf32> to vector<1x1x32xf32>
    %35 = vector.shape_cast %34 : vector<1x1x32xf32> to vector<1x32xf32>
    %36 = vector.broadcast %35 : vector<1x32xf32> to vector<16x32xf32>
    %37 = arith.addf %33, %36 : vector<16x32xf32>
    %38 = vector.extract_strided_slice %7 {offsets = [4, 0, 0], sizes = [1, 32, 32], strides = [1, 1, 1]} : vector<6x32x32xbf16> to vector<1x32x32xbf16>
    %39 = vector.shape_cast %38 : vector<1x32x32xbf16> to vector<32x32xbf16>
    %cst_15 = arith.constant dense<0.000000e+00> : vector<16x32xf32>
    %40 = tpu.matmul %5, %39, %cst_15 {dimension_numbers = #tpu.dot_dimension_numbers<[1], [0], [0], [1], [0, 0, 1, 1], [], []>} : vector<16x32xbf16>, vector<32x32xbf16>, vector<16x32xf32> -> vector<16x32xf32>
    %41 = vector.extract_strided_slice %9 {offsets = [4, 0, 0], sizes = [1, 1, 32], strides = [1, 1, 1]} : vector<6x1x32xf32> to vector<1x1x32xf32>
    %42 = vector.shape_cast %41 : vector<1x1x32xf32> to vector<1x32xf32>
    %43 = vector.broadcast %42 : vector<1x32xf32> to vector<16x32xf32>
    %44 = arith.addf %40, %43 : vector<16x32xf32>
    %45 = vector.extract_strided_slice %7 {offsets = [5, 0, 0], sizes = [1, 32, 32], strides = [1, 1, 1]} : vector<6x32x32xbf16> to vector<1x32x32xbf16>
    %46 = vector.shape_cast %45 : vector<1x32x32xbf16> to vector<32x32xbf16>
    %cst_16 = arith.constant dense<0.000000e+00> : vector<16x32xf32>
    %47 = tpu.matmul %5, %46, %cst_16 {dimension_numbers = #tpu.dot_dimension_numbers<[1], [0], [0], [1], [0, 0, 1, 1], [], []>} : vector<16x32xbf16>, vector<32x32xbf16>, vector<16x32xf32> -> vector<16x32xf32>
    %48 = vector.extract_strided_slice %9 {offsets = [5, 0, 0], sizes = [1, 1, 32], strides = [1, 1, 1]} : vector<6x1x32xf32> to vector<1x1x32xf32>
    %49 = vector.shape_cast %48 : vector<1x1x32xf32> to vector<1x32xf32>
    %50 = vector.broadcast %49 : vector<1x32xf32> to vector<16x32xf32>
    %51 = arith.addf %47, %50 : vector<16x32xf32>
    %cst_17 = arith.constant dense<0.000000e+00> : vector<16xf32>
    %52 = vector.multi_reduction <add>, %3, %cst_17 [1] : vector<16x32xf32> to vector<16xf32>
    %53 = vector.shape_cast %52 : vector<16xf32> to vector<16x1xf32>
    %cst_18 = arith.constant 3.200000e+01 : f32
    %54 = vector.broadcast %cst_18 : f32 to vector<16x1xf32>
    %55 = arith.divf %53, %54 : vector<16x1xf32>
    %56 = vector.broadcast %55 : vector<16x1xf32> to vector<16x32xf32>
    %57 = arith.subf %3, %56 : vector<16x32xf32>
    %58 = arith.mulf %57, %57 : vector<16x32xf32>
    %cst_19 = arith.constant dense<0.000000e+00> : vector<16xf32>
    %59 = vector.multi_reduction <add>, %58, %cst_19 [1] : vector<16x32xf32> to vector<16xf32>
    %60 = vector.shape_cast %59 : vector<16xf32> to vector<16x1xf32>
    %cst_20 = arith.constant 3.200000e+01 : f32
    %61 = vector.broadcast %cst_20 : f32 to vector<16x1xf32>
    %62 = arith.divf %60, %61 : vector<16x1xf32>
    %63 = vector.broadcast %55 : vector<16x1xf32> to vector<16x32xf32>
    %64 = arith.subf %3, %63 : vector<16x32xf32>
    %cst_21 = arith.constant 9.99999997E-7 : f32
    %65 = vector.broadcast %cst_21 : f32 to vector<16x1xf32>
    %66 = arith.addf %62, %65 : vector<16x1xf32>
    %67 = math.rsqrt %66 : vector<16x1xf32>
    %68 = vector.broadcast %67 : vector<16x1xf32> to vector<16x32xf32>
    %69 = arith.mulf %64, %68 : vector<16x32xf32>
    %cst_22 = arith.constant 1.000000e+00 : f32
    %70 = vector.broadcast %cst_22 : f32 to vector<16x32xf32>
    %71 = arith.addf %70, %23 : vector<16x32xf32>
    %72 = arith.mulf %69, %71 : vector<16x32xf32>
    %73 = arith.addf %72, %16 : vector<16x32xf32>
    %74 = arith.truncf %73 : vector<16x32xf32> to vector<16x32xbf16>
    %75 = tpu.iota {dimensions = array<i32: 0>} : vector<8x8xi32>
    %76 = tpu.iota {dimensions = array<i32: 1>} : vector<8x8xi32>
    %77 = arith.cmpi sge, %75, %76 : vector<8x8xi32>
    %78 = vector.shape_cast %77 : vector<8x8xi1> to vector<1x8x8xi1>
    %c0_23 = arith.constant 0 : index
    %c0_24 = arith.constant 0 : index
    %c0_25 = arith.constant 0 : index
    %c0_26 = arith.constant 0 : index
    %79 = vector.load %arg12[%c0_23, %c0_24, %c0_25, %c0_26] : memref<1x4x32x8xbf16, #tpu.memory_space<vmem>>, vector<1x4x32x8xbf16>
    %80 = vector.shape_cast %79 : vector<1x4x32x8xbf16> to vector<4x32x8xbf16>
    %c0_27 = arith.constant 0 : index
    %c0_28 = arith.constant 0 : index
    %c0_29 = arith.constant 0 : index
    %c0_30 = arith.constant 0 : index
    %81 = vector.load %arg14[%c0_27, %c0_28, %c0_29, %c0_30] : memref<1x4x32x8xbf16, #tpu.memory_space<vmem>>, vector<1x4x32x8xbf16>
    %82 = vector.shape_cast %81 : vector<1x4x32x8xbf16> to vector<4x32x8xbf16>
    %c0_31 = arith.constant 0 : index
    %c0_32 = arith.constant 0 : index
    %c0_33 = arith.constant 0 : index
    %c0_34 = arith.constant 0 : index
    %83 = vector.load %arg16[%c0_31, %c0_32, %c0_33, %c0_34] : memref<1x4x32x8xbf16, #tpu.memory_space<vmem>>, vector<1x4x32x8xbf16>
    %84 = vector.shape_cast %83 : vector<1x4x32x8xbf16> to vector<4x32x8xbf16>
    %c0_35 = arith.constant 0 : index
    %c0_36 = arith.constant 0 : index
    %c0_37 = arith.constant 0 : index
    %c0_38 = arith.constant 0 : index
    %85 = vector.load %arg18[%c0_35, %c0_36, %c0_37, %c0_38] : memref<1x4x8x32xbf16, #tpu.memory_space<vmem>>, vector<1x4x8x32xbf16>
    %86 = vector.shape_cast %85 : vector<1x4x8x32xbf16> to vector<4x8x32xbf16>
    %c0_39 = arith.constant 0 : index
    %c0_40 = arith.constant 0 : index
    %c0_41 = arith.constant 0 : index
    %c0_42 = arith.constant 0 : index
    %87 = vector.load %arg13[%c0_39, %c0_40, %c0_41, %c0_42] : memref<1x4x1x8xf32, #tpu.memory_space<vmem>>, vector<1x4x1x8xf32>
    %88 = vector.shape_cast %87 : vector<1x4x1x8xf32> to vector<4x1x8xf32>
    %c0_43 = arith.constant 0 : index
    %c0_44 = arith.constant 0 : index
    %c0_45 = arith.constant 0 : index
    %c0_46 = arith.constant 0 : index
    %89 = vector.load %arg15[%c0_43, %c0_44, %c0_45, %c0_46] : memref<1x4x1x8xf32, #tpu.memory_space<vmem>>, vector<1x4x1x8xf32>
    %90 = vector.shape_cast %89 : vector<1x4x1x8xf32> to vector<4x1x8xf32>
    %c0_47 = arith.constant 0 : index
    %c0_48 = arith.constant 0 : index
    %c0_49 = arith.constant 0 : index
    %c0_50 = arith.constant 0 : index
    %91 = vector.load %arg17[%c0_47, %c0_48, %c0_49, %c0_50] : memref<1x4x1x8xf32, #tpu.memory_space<vmem>>, vector<1x4x1x8xf32>
    %92 = vector.shape_cast %91 : vector<1x4x1x8xf32> to vector<4x1x8xf32>
    %cst_51 = arith.constant 0.000000e+00 : f32
    %93 = vector.broadcast %cst_51 : f32 to vector<16x32xf32>
    %94 = vector.extract_strided_slice %80 {offsets = [0, 0, 0], sizes = [1, 32, 8], strides = [1, 1, 1]} : vector<4x32x8xbf16> to vector<1x32x8xbf16>
    %95 = vector.shape_cast %94 : vector<1x32x8xbf16> to vector<32x8xbf16>
    %cst_52 = arith.constant dense<0.000000e+00> : vector<16x8xf32>
    %96 = tpu.matmul %74, %95, %cst_52 {dimension_numbers = #tpu.dot_dimension_numbers<[1], [0], [0], [1], [0, 0, 1, 1], [], []>} : vector<16x32xbf16>, vector<32x8xbf16>, vector<16x8xf32> -> vector<16x8xf32>
    %97 = vector.extract_strided_slice %88 {offsets = [0, 0, 0], sizes = [1, 1, 8], strides = [1, 1, 1]} : vector<4x1x8xf32> to vector<1x1x8xf32>
    %98 = vector.shape_cast %97 : vector<1x1x8xf32> to vector<1x8xf32>
    %99 = vector.broadcast %98 : vector<1x8xf32> to vector<16x8xf32>
    %100 = arith.addf %96, %99 : vector<16x8xf32>
    %101 = vector.shape_cast %100 : vector<16x8xf32> to vector<2x8x8xf32>
    %102 = vector.extract_strided_slice %82 {offsets = [0, 0, 0], sizes = [1, 32, 8], strides = [1, 1, 1]} : vector<4x32x8xbf16> to vector<1x32x8xbf16>
    %103 = vector.shape_cast %102 : vector<1x32x8xbf16> to vector<32x8xbf16>
    %cst_53 = arith.constant dense<0.000000e+00> : vector<16x8xf32>
    %104 = tpu.matmul %74, %103, %cst_53 {dimension_numbers = #tpu.dot_dimension_numbers<[1], [0], [0], [1], [0, 0, 1, 1], [], []>} : vector<16x32xbf16>, vector<32x8xbf16>, vector<16x8xf32> -> vector<16x8xf32>
    %105 = vector.extract_strided_slice %90 {offsets = [0, 0, 0], sizes = [1, 1, 8], strides = [1, 1, 1]} : vector<4x1x8xf32> to vector<1x1x8xf32>
    %106 = vector.shape_cast %105 : vector<1x1x8xf32> to vector<1x8xf32>
    %107 = vector.broadcast %106 : vector<1x8xf32> to vector<16x8xf32>
    %108 = arith.addf %104, %107 : vector<16x8xf32>
    %109 = vector.shape_cast %108 : vector<16x8xf32> to vector<2x8x8xf32>
    %110 = vector.extract_strided_slice %84 {offsets = [0, 0, 0], sizes = [1, 32, 8], strides = [1, 1, 1]} : vector<4x32x8xbf16> to vector<1x32x8xbf16>
    %111 = vector.shape_cast %110 : vector<1x32x8xbf16> to vector<32x8xbf16>
    %cst_54 = arith.constant dense<0.000000e+00> : vector<16x8xf32>
    %112 = tpu.matmul %74, %111, %cst_54 {dimension_numbers = #tpu.dot_dimension_numbers<[1], [0], [0], [1], [0, 0, 1, 1], [], []>} : vector<16x32xbf16>, vector<32x8xbf16>, vector<16x8xf32> -> vector<16x8xf32>
    %113 = vector.extract_strided_slice %92 {offsets = [0, 0, 0], sizes = [1, 1, 8], strides = [1, 1, 1]} : vector<4x1x8xf32> to vector<1x1x8xf32>
    %114 = vector.shape_cast %113 : vector<1x1x8xf32> to vector<1x8xf32>
    %115 = vector.broadcast %114 : vector<1x8xf32> to vector<16x8xf32>
    %116 = arith.addf %112, %115 : vector<16x8xf32>
    %117 = vector.shape_cast %116 : vector<16x8xf32> to vector<2x8x8xf32>
    %118 = arith.truncf %101 : vector<2x8x8xf32> to vector<2x8x8xbf16>
    %119 = arith.truncf %109 : vector<2x8x8xf32> to vector<2x8x8xbf16>
    "tpu.trace_start"() <{level = 10 : i32, message = "bqd,bkd->bqk"}> : () -> ()
    %cst_55 = arith.constant dense<0.000000e+00> : vector<2x8x8xf32>
    %120 = tpu.matmul %118, %119, %cst_55 {dimension_numbers = #tpu.dot_dimension_numbers<[2], [2], [1], [1], [0, 0, 0, 1, 1, 1], [0], [0]>} : vector<2x8x8xbf16>, vector<2x8x8xbf16>, vector<2x8x8xf32> -> vector<2x8x8xf32>
    "tpu.trace_stop"() : () -> ()
    %cst_56 = arith.constant 0.353553385 : f32
    %121 = vector.broadcast %cst_56 : f32 to vector<2x8x8xf32>
    %122 = arith.mulf %120, %121 : vector<2x8x8xf32>
    %cst_57 = arith.constant -1.000000e+30 : f32
    %123 = vector.shape_cast %78 : vector<1x8x8xi1> to vector<1x8x8xi1>
    %124 = vector.broadcast %123 : vector<1x8x8xi1> to vector<2x8x8xi1>
    %125 = vector.broadcast %cst_57 : f32 to vector<2x8x8xf32>
    %126 = arith.select %124, %122, %125 : vector<2x8x8xi1>, vector<2x8x8xf32>
    %cst_58 = arith.constant dense<0xFF800000> : vector<2x8xf32>
    %127 = vector.multi_reduction <maximumf>, %126, %cst_58 [2] : vector<2x8x8xf32> to vector<2x8xf32>
    %128 = vector.shape_cast %127 : vector<2x8xf32> to vector<2x8x1xf32>
    %129 = vector.broadcast %128 : vector<2x8x1xf32> to vector<2x8x8xf32>
    %130 = arith.subf %126, %129 : vector<2x8x8xf32>
    %131 = math.exp %130 : vector<2x8x8xf32>
    %cst_59 = arith.constant dense<0.000000e+00> : vector<2x8xf32>
    %132 = vector.multi_reduction <add>, %131, %cst_59 [2] : vector<2x8x8xf32> to vector<2x8xf32>
    %133 = vector.shape_cast %132 : vector<2x8xf32> to vector<2x8x1xf32>
    %134 = tpu.reciprocal %133 {approx = true} : vector<2x8x1xf32> -> vector<2x8x1xf32>
    %135 = vector.broadcast %134 : vector<2x8x1xf32> to vector<2x8x8xf32>
    %136 = arith.mulf %131, %135 : vector<2x8x8xf32>
    %137 = arith.truncf %136 : vector<2x8x8xf32> to vector<2x8x8xbf16>
    %138 = arith.truncf %117 : vector<2x8x8xf32> to vector<2x8x8xbf16>
    "tpu.trace_start"() <{level = 10 : i32, message = "bqk,bkd->bqd"}> : () -> ()
    %cst_60 = arith.constant dense<0.000000e+00> : vector<2x8x8xf32>
    %139 = tpu.matmul %137, %138, %cst_60 {dimension_numbers = #tpu.dot_dimension_numbers<[2], [1], [1], [2], [0, 0, 0, 1, 1, 2], [0], [0]>} : vector<2x8x8xbf16>, vector<2x8x8xbf16>, vector<2x8x8xf32> -> vector<2x8x8xf32>
    "tpu.trace_stop"() : () -> ()
    %140 = vector.shape_cast %139 : vector<2x8x8xf32> to vector<16x8xf32>
    %141 = arith.truncf %140 : vector<16x8xf32> to vector<16x8xbf16>
    %142 = vector.extract_strided_slice %86 {offsets = [0, 0, 0], sizes = [1, 8, 32], strides = [1, 1, 1]} : vector<4x8x32xbf16> to vector<1x8x32xbf16>
    %143 = vector.shape_cast %142 : vector<1x8x32xbf16> to vector<8x32xbf16>
    %cst_61 = arith.constant dense<0.000000e+00> : vector<16x32xf32>
    %144 = tpu.matmul %141, %143, %cst_61 {dimension_numbers = #tpu.dot_dimension_numbers<[1], [0], [0], [1], [0, 0, 1, 1], [], []>} : vector<16x8xbf16>, vector<8x32xbf16>, vector<16x32xf32> -> vector<16x32xf32>
    %145 = arith.addf %93, %144 : vector<16x32xf32>
    %146 = vector.extract_strided_slice %80 {offsets = [1, 0, 0], sizes = [1, 32, 8], strides = [1, 1, 1]} : vector<4x32x8xbf16> to vector<1x32x8xbf16>
    %147 = vector.shape_cast %146 : vector<1x32x8xbf16> to vector<32x8xbf16>
    %cst_62 = arith.constant dense<0.000000e+00> : vector<16x8xf32>
    %148 = tpu.matmul %74, %147, %cst_62 {dimension_numbers = #tpu.dot_dimension_numbers<[1], [0], [0], [1], [0, 0, 1, 1], [], []>} : vector<16x32xbf16>, vector<32x8xbf16>, vector<16x8xf32> -> vector<16x8xf32>
    %149 = vector.extract_strided_slice %88 {offsets = [1, 0, 0], sizes = [1, 1, 8], strides = [1, 1, 1]} : vector<4x1x8xf32> to vector<1x1x8xf32>
    %150 = vector.shape_cast %149 : vector<1x1x8xf32> to vector<1x8xf32>
    %151 = vector.broadcast %150 : vector<1x8xf32> to vector<16x8xf32>
    %152 = arith.addf %148, %151 : vector<16x8xf32>
    %153 = vector.shape_cast %152 : vector<16x8xf32> to vector<2x8x8xf32>
    %154 = vector.extract_strided_slice %82 {offsets = [1, 0, 0], sizes = [1, 32, 8], strides = [1, 1, 1]} : vector<4x32x8xbf16> to vector<1x32x8xbf16>
    %155 = vector.shape_cast %154 : vector<1x32x8xbf16> to vector<32x8xbf16>
    %cst_63 = arith.constant dense<0.000000e+00> : vector<16x8xf32>
    %156 = tpu.matmul %74, %155, %cst_63 {dimension_numbers = #tpu.dot_dimension_numbers<[1], [0], [0], [1], [0, 0, 1, 1], [], []>} : vector<16x32xbf16>, vector<32x8xbf16>, vector<16x8xf32> -> vector<16x8xf32>
    %157 = vector.extract_strided_slice %90 {offsets = [1, 0, 0], sizes = [1, 1, 8], strides = [1, 1, 1]} : vector<4x1x8xf32> to vector<1x1x8xf32>
    %158 = vector.shape_cast %157 : vector<1x1x8xf32> to vector<1x8xf32>
    %159 = vector.broadcast %158 : vector<1x8xf32> to vector<16x8xf32>
    %160 = arith.addf %156, %159 : vector<16x8xf32>
    %161 = vector.shape_cast %160 : vector<16x8xf32> to vector<2x8x8xf32>
    %162 = vector.extract_strided_slice %84 {offsets = [1, 0, 0], sizes = [1, 32, 8], strides = [1, 1, 1]} : vector<4x32x8xbf16> to vector<1x32x8xbf16>
    %163 = vector.shape_cast %162 : vector<1x32x8xbf16> to vector<32x8xbf16>
    %cst_64 = arith.constant dense<0.000000e+00> : vector<16x8xf32>
    %164 = tpu.matmul %74, %163, %cst_64 {dimension_numbers = #tpu.dot_dimension_numbers<[1], [0], [0], [1], [0, 0, 1, 1], [], []>} : vector<16x32xbf16>, vector<32x8xbf16>, vector<16x8xf32> -> vector<16x8xf32>
    %165 = vector.extract_strided_slice %92 {offsets = [1, 0, 0], sizes = [1, 1, 8], strides = [1, 1, 1]} : vector<4x1x8xf32> to vector<1x1x8xf32>
    %166 = vector.shape_cast %165 : vector<1x1x8xf32> to vector<1x8xf32>
    %167 = vector.broadcast %166 : vector<1x8xf32> to vector<16x8xf32>
    %168 = arith.addf %164, %167 : vector<16x8xf32>
    %169 = vector.shape_cast %168 : vector<16x8xf32> to vector<2x8x8xf32>
    %170 = arith.truncf %153 : vector<2x8x8xf32> to vector<2x8x8xbf16>
    %171 = arith.truncf %161 : vector<2x8x8xf32> to vector<2x8x8xbf16>
    "tpu.trace_start"() <{level = 10 : i32, message = "bqd,bkd->bqk"}> : () -> ()
    %cst_65 = arith.constant dense<0.000000e+00> : vector<2x8x8xf32>
    %172 = tpu.matmul %170, %171, %cst_65 {dimension_numbers = #tpu.dot_dimension_numbers<[2], [2], [1], [1], [0, 0, 0, 1, 1, 1], [0], [0]>} : vector<2x8x8xbf16>, vector<2x8x8xbf16>, vector<2x8x8xf32> -> vector<2x8x8xf32>
    "tpu.trace_stop"() : () -> ()
    %cst_66 = arith.constant 0.353553385 : f32
    %173 = vector.broadcast %cst_66 : f32 to vector<2x8x8xf32>
    %174 = arith.mulf %172, %173 : vector<2x8x8xf32>
    %cst_67 = arith.constant -1.000000e+30 : f32
    %175 = vector.shape_cast %78 : vector<1x8x8xi1> to vector<1x8x8xi1>
    %176 = vector.broadcast %175 : vector<1x8x8xi1> to vector<2x8x8xi1>
    %177 = vector.broadcast %cst_67 : f32 to vector<2x8x8xf32>
    %178 = arith.select %176, %174, %177 : vector<2x8x8xi1>, vector<2x8x8xf32>
    %cst_68 = arith.constant dense<0xFF800000> : vector<2x8xf32>
    %179 = vector.multi_reduction <maximumf>, %178, %cst_68 [2] : vector<2x8x8xf32> to vector<2x8xf32>
    %180 = vector.shape_cast %179 : vector<2x8xf32> to vector<2x8x1xf32>
    %181 = vector.broadcast %180 : vector<2x8x1xf32> to vector<2x8x8xf32>
    %182 = arith.subf %178, %181 : vector<2x8x8xf32>
    %183 = math.exp %182 : vector<2x8x8xf32>
    %cst_69 = arith.constant dense<0.000000e+00> : vector<2x8xf32>
    %184 = vector.multi_reduction <add>, %183, %cst_69 [2] : vector<2x8x8xf32> to vector<2x8xf32>
    %185 = vector.shape_cast %184 : vector<2x8xf32> to vector<2x8x1xf32>
    %186 = tpu.reciprocal %185 {approx = true} : vector<2x8x1xf32> -> vector<2x8x1xf32>
    %187 = vector.broadcast %186 : vector<2x8x1xf32> to vector<2x8x8xf32>
    %188 = arith.mulf %183, %187 : vector<2x8x8xf32>
    %189 = arith.truncf %188 : vector<2x8x8xf32> to vector<2x8x8xbf16>
    %190 = arith.truncf %169 : vector<2x8x8xf32> to vector<2x8x8xbf16>
    "tpu.trace_start"() <{level = 10 : i32, message = "bqk,bkd->bqd"}> : () -> ()
    %cst_70 = arith.constant dense<0.000000e+00> : vector<2x8x8xf32>
    %191 = tpu.matmul %189, %190, %cst_70 {dimension_numbers = #tpu.dot_dimension_numbers<[2], [1], [1], [2], [0, 0, 0, 1, 1, 2], [0], [0]>} : vector<2x8x8xbf16>, vector<2x8x8xbf16>, vector<2x8x8xf32> -> vector<2x8x8xf32>
    "tpu.trace_stop"() : () -> ()
    %192 = vector.shape_cast %191 : vector<2x8x8xf32> to vector<16x8xf32>
    %193 = arith.truncf %192 : vector<16x8xf32> to vector<16x8xbf16>
    %194 = vector.extract_strided_slice %86 {offsets = [1, 0, 0], sizes = [1, 8, 32], strides = [1, 1, 1]} : vector<4x8x32xbf16> to vector<1x8x32xbf16>
    %195 = vector.shape_cast %194 : vector<1x8x32xbf16> to vector<8x32xbf16>
    %cst_71 = arith.constant dense<0.000000e+00> : vector<16x32xf32>
    %196 = tpu.matmul %193, %195, %cst_71 {dimension_numbers = #tpu.dot_dimension_numbers<[1], [0], [0], [1], [0, 0, 1, 1], [], []>} : vector<16x8xbf16>, vector<8x32xbf16>, vector<16x32xf32> -> vector<16x32xf32>
    %197 = arith.addf %145, %196 : vector<16x32xf32>
    %198 = vector.extract_strided_slice %80 {offsets = [2, 0, 0], sizes = [1, 32, 8], strides = [1, 1, 1]} : vector<4x32x8xbf16> to vector<1x32x8xbf16>
    %199 = vector.shape_cast %198 : vector<1x32x8xbf16> to vector<32x8xbf16>
    %cst_72 = arith.constant dense<0.000000e+00> : vector<16x8xf32>
    %200 = tpu.matmul %74, %199, %cst_72 {dimension_numbers = #tpu.dot_dimension_numbers<[1], [0], [0], [1], [0, 0, 1, 1], [], []>} : vector<16x32xbf16>, vector<32x8xbf16>, vector<16x8xf32> -> vector<16x8xf32>
    %201 = vector.extract_strided_slice %88 {offsets = [2, 0, 0], sizes = [1, 1, 8], strides = [1, 1, 1]} : vector<4x1x8xf32> to vector<1x1x8xf32>
    %202 = vector.shape_cast %201 : vector<1x1x8xf32> to vector<1x8xf32>
    %203 = vector.broadcast %202 : vector<1x8xf32> to vector<16x8xf32>
    %204 = arith.addf %200, %203 : vector<16x8xf32>
    %205 = vector.shape_cast %204 : vector<16x8xf32> to vector<2x8x8xf32>
    %206 = vector.extract_strided_slice %82 {offsets = [2, 0, 0], sizes = [1, 32, 8], strides = [1, 1, 1]} : vector<4x32x8xbf16> to vector<1x32x8xbf16>
    %207 = vector.shape_cast %206 : vector<1x32x8xbf16> to vector<32x8xbf16>
    %cst_73 = arith.constant dense<0.000000e+00> : vector<16x8xf32>
    %208 = tpu.matmul %74, %207, %cst_73 {dimension_numbers = #tpu.dot_dimension_numbers<[1], [0], [0], [1], [0, 0, 1, 1], [], []>} : vector<16x32xbf16>, vector<32x8xbf16>, vector<16x8xf32> -> vector<16x8xf32>
    %209 = vector.extract_strided_slice %90 {offsets = [2, 0, 0], sizes = [1, 1, 8], strides = [1, 1, 1]} : vector<4x1x8xf32> to vector<1x1x8xf32>
    %210 = vector.shape_cast %209 : vector<1x1x8xf32> to vector<1x8xf32>
    %211 = vector.broadcast %210 : vector<1x8xf32> to vector<16x8xf32>
    %212 = arith.addf %208, %211 : vector<16x8xf32>
    %213 = vector.shape_cast %212 : vector<16x8xf32> to vector<2x8x8xf32>
    %214 = vector.extract_strided_slice %84 {offsets = [2, 0, 0], sizes = [1, 32, 8], strides = [1, 1, 1]} : vector<4x32x8xbf16> to vector<1x32x8xbf16>
    %215 = vector.shape_cast %214 : vector<1x32x8xbf16> to vector<32x8xbf16>
    %cst_74 = arith.constant dense<0.000000e+00> : vector<16x8xf32>
    %216 = tpu.matmul %74, %215, %cst_74 {dimension_numbers = #tpu.dot_dimension_numbers<[1], [0], [0], [1], [0, 0, 1, 1], [], []>} : vector<16x32xbf16>, vector<32x8xbf16>, vector<16x8xf32> -> vector<16x8xf32>
    %217 = vector.extract_strided_slice %92 {offsets = [2, 0, 0], sizes = [1, 1, 8], strides = [1, 1, 1]} : vector<4x1x8xf32> to vector<1x1x8xf32>
    %218 = vector.shape_cast %217 : vector<1x1x8xf32> to vector<1x8xf32>
    %219 = vector.broadcast %218 : vector<1x8xf32> to vector<16x8xf32>
    %220 = arith.addf %216, %219 : vector<16x8xf32>
    %221 = vector.shape_cast %220 : vector<16x8xf32> to vector<2x8x8xf32>
    %222 = arith.truncf %205 : vector<2x8x8xf32> to vector<2x8x8xbf16>
    %223 = arith.truncf %213 : vector<2x8x8xf32> to vector<2x8x8xbf16>
    "tpu.trace_start"() <{level = 10 : i32, message = "bqd,bkd->bqk"}> : () -> ()
    %cst_75 = arith.constant dense<0.000000e+00> : vector<2x8x8xf32>
    %224 = tpu.matmul %222, %223, %cst_75 {dimension_numbers = #tpu.dot_dimension_numbers<[2], [2], [1], [1], [0, 0, 0, 1, 1, 1], [0], [0]>} : vector<2x8x8xbf16>, vector<2x8x8xbf16>, vector<2x8x8xf32> -> vector<2x8x8xf32>
    "tpu.trace_stop"() : () -> ()
    %cst_76 = arith.constant 0.353553385 : f32
    %225 = vector.broadcast %cst_76 : f32 to vector<2x8x8xf32>
    %226 = arith.mulf %224, %225 : vector<2x8x8xf32>
    %cst_77 = arith.constant -1.000000e+30 : f32
    %227 = vector.shape_cast %78 : vector<1x8x8xi1> to vector<1x8x8xi1>
    %228 = vector.broadcast %227 : vector<1x8x8xi1> to vector<2x8x8xi1>
    %229 = vector.broadcast %cst_77 : f32 to vector<2x8x8xf32>
    %230 = arith.select %228, %226, %229 : vector<2x8x8xi1>, vector<2x8x8xf32>
    %cst_78 = arith.constant dense<0xFF800000> : vector<2x8xf32>
    %231 = vector.multi_reduction <maximumf>, %230, %cst_78 [2] : vector<2x8x8xf32> to vector<2x8xf32>
    %232 = vector.shape_cast %231 : vector<2x8xf32> to vector<2x8x1xf32>
    %233 = vector.broadcast %232 : vector<2x8x1xf32> to vector<2x8x8xf32>
    %234 = arith.subf %230, %233 : vector<2x8x8xf32>
    %235 = math.exp %234 : vector<2x8x8xf32>
    %cst_79 = arith.constant dense<0.000000e+00> : vector<2x8xf32>
    %236 = vector.multi_reduction <add>, %235, %cst_79 [2] : vector<2x8x8xf32> to vector<2x8xf32>
    %237 = vector.shape_cast %236 : vector<2x8xf32> to vector<2x8x1xf32>
    %238 = tpu.reciprocal %237 {approx = true} : vector<2x8x1xf32> -> vector<2x8x1xf32>
    %239 = vector.broadcast %238 : vector<2x8x1xf32> to vector<2x8x8xf32>
    %240 = arith.mulf %235, %239 : vector<2x8x8xf32>
    %241 = arith.truncf %240 : vector<2x8x8xf32> to vector<2x8x8xbf16>
    %242 = arith.truncf %221 : vector<2x8x8xf32> to vector<2x8x8xbf16>
    "tpu.trace_start"() <{level = 10 : i32, message = "bqk,bkd->bqd"}> : () -> ()
    %cst_80 = arith.constant dense<0.000000e+00> : vector<2x8x8xf32>
    %243 = tpu.matmul %241, %242, %cst_80 {dimension_numbers = #tpu.dot_dimension_numbers<[2], [1], [1], [2], [0, 0, 0, 1, 1, 2], [0], [0]>} : vector<2x8x8xbf16>, vector<2x8x8xbf16>, vector<2x8x8xf32> -> vector<2x8x8xf32>
    "tpu.trace_stop"() : () -> ()
    %244 = vector.shape_cast %243 : vector<2x8x8xf32> to vector<16x8xf32>
    %245 = arith.truncf %244 : vector<16x8xf32> to vector<16x8xbf16>
    %246 = vector.extract_strided_slice %86 {offsets = [2, 0, 0], sizes = [1, 8, 32], strides = [1, 1, 1]} : vector<4x8x32xbf16> to vector<1x8x32xbf16>
    %247 = vector.shape_cast %246 : vector<1x8x32xbf16> to vector<8x32xbf16>
    %cst_81 = arith.constant dense<0.000000e+00> : vector<16x32xf32>
    %248 = tpu.matmul %245, %247, %cst_81 {dimension_numbers = #tpu.dot_dimension_numbers<[1], [0], [0], [1], [0, 0, 1, 1], [], []>} : vector<16x8xbf16>, vector<8x32xbf16>, vector<16x32xf32> -> vector<16x32xf32>
    %249 = arith.addf %197, %248 : vector<16x32xf32>
    %250 = vector.extract_strided_slice %80 {offsets = [3, 0, 0], sizes = [1, 32, 8], strides = [1, 1, 1]} : vector<4x32x8xbf16> to vector<1x32x8xbf16>
    %251 = vector.shape_cast %250 : vector<1x32x8xbf16> to vector<32x8xbf16>
    %cst_82 = arith.constant dense<0.000000e+00> : vector<16x8xf32>
    %252 = tpu.matmul %74, %251, %cst_82 {dimension_numbers = #tpu.dot_dimension_numbers<[1], [0], [0], [1], [0, 0, 1, 1], [], []>} : vector<16x32xbf16>, vector<32x8xbf16>, vector<16x8xf32> -> vector<16x8xf32>
    %253 = vector.extract_strided_slice %88 {offsets = [3, 0, 0], sizes = [1, 1, 8], strides = [1, 1, 1]} : vector<4x1x8xf32> to vector<1x1x8xf32>
    %254 = vector.shape_cast %253 : vector<1x1x8xf32> to vector<1x8xf32>
    %255 = vector.broadcast %254 : vector<1x8xf32> to vector<16x8xf32>
    %256 = arith.addf %252, %255 : vector<16x8xf32>
    %257 = vector.shape_cast %256 : vector<16x8xf32> to vector<2x8x8xf32>
    %258 = vector.extract_strided_slice %82 {offsets = [3, 0, 0], sizes = [1, 32, 8], strides = [1, 1, 1]} : vector<4x32x8xbf16> to vector<1x32x8xbf16>
    %259 = vector.shape_cast %258 : vector<1x32x8xbf16> to vector<32x8xbf16>
    %cst_83 = arith.constant dense<0.000000e+00> : vector<16x8xf32>
    %260 = tpu.matmul %74, %259, %cst_83 {dimension_numbers = #tpu.dot_dimension_numbers<[1], [0], [0], [1], [0, 0, 1, 1], [], []>} : vector<16x32xbf16>, vector<32x8xbf16>, vector<16x8xf32> -> vector<16x8xf32>
    %261 = vector.extract_strided_slice %90 {offsets = [3, 0, 0], sizes = [1, 1, 8], strides = [1, 1, 1]} : vector<4x1x8xf32> to vector<1x1x8xf32>
    %262 = vector.shape_cast %261 : vector<1x1x8xf32> to vector<1x8xf32>
    %263 = vector.broadcast %262 : vector<1x8xf32> to vector<16x8xf32>
    %264 = arith.addf %260, %263 : vector<16x8xf32>
    %265 = vector.shape_cast %264 : vector<16x8xf32> to vector<2x8x8xf32>
    %266 = vector.extract_strided_slice %84 {offsets = [3, 0, 0], sizes = [1, 32, 8], strides = [1, 1, 1]} : vector<4x32x8xbf16> to vector<1x32x8xbf16>
    %267 = vector.shape_cast %266 : vector<1x32x8xbf16> to vector<32x8xbf16>
    %cst_84 = arith.constant dense<0.000000e+00> : vector<16x8xf32>
    %268 = tpu.matmul %74, %267, %cst_84 {dimension_numbers = #tpu.dot_dimension_numbers<[1], [0], [0], [1], [0, 0, 1, 1], [], []>} : vector<16x32xbf16>, vector<32x8xbf16>, vector<16x8xf32> -> vector<16x8xf32>
    %269 = vector.extract_strided_slice %92 {offsets = [3, 0, 0], sizes = [1, 1, 8], strides = [1, 1, 1]} : vector<4x1x8xf32> to vector<1x1x8xf32>
    %270 = vector.shape_cast %269 : vector<1x1x8xf32> to vector<1x8xf32>
    %271 = vector.broadcast %270 : vector<1x8xf32> to vector<16x8xf32>
    %272 = arith.addf %268, %271 : vector<16x8xf32>
    %273 = vector.shape_cast %272 : vector<16x8xf32> to vector<2x8x8xf32>
    %274 = arith.truncf %257 : vector<2x8x8xf32> to vector<2x8x8xbf16>
    %275 = arith.truncf %265 : vector<2x8x8xf32> to vector<2x8x8xbf16>
    "tpu.trace_start"() <{level = 10 : i32, message = "bqd,bkd->bqk"}> : () -> ()
    %cst_85 = arith.constant dense<0.000000e+00> : vector<2x8x8xf32>
    %276 = tpu.matmul %274, %275, %cst_85 {dimension_numbers = #tpu.dot_dimension_numbers<[2], [2], [1], [1], [0, 0, 0, 1, 1, 1], [0], [0]>} : vector<2x8x8xbf16>, vector<2x8x8xbf16>, vector<2x8x8xf32> -> vector<2x8x8xf32>
    "tpu.trace_stop"() : () -> ()
    %cst_86 = arith.constant 0.353553385 : f32
    %277 = vector.broadcast %cst_86 : f32 to vector<2x8x8xf32>
    %278 = arith.mulf %276, %277 : vector<2x8x8xf32>
    %cst_87 = arith.constant -1.000000e+30 : f32
    %279 = vector.shape_cast %78 : vector<1x8x8xi1> to vector<1x8x8xi1>
    %280 = vector.broadcast %279 : vector<1x8x8xi1> to vector<2x8x8xi1>
    %281 = vector.broadcast %cst_87 : f32 to vector<2x8x8xf32>
    %282 = arith.select %280, %278, %281 : vector<2x8x8xi1>, vector<2x8x8xf32>
    %cst_88 = arith.constant dense<0xFF800000> : vector<2x8xf32>
    %283 = vector.multi_reduction <maximumf>, %282, %cst_88 [2] : vector<2x8x8xf32> to vector<2x8xf32>
    %284 = vector.shape_cast %283 : vector<2x8xf32> to vector<2x8x1xf32>
    %285 = vector.broadcast %284 : vector<2x8x1xf32> to vector<2x8x8xf32>
    %286 = arith.subf %282, %285 : vector<2x8x8xf32>
    %287 = math.exp %286 : vector<2x8x8xf32>
    %cst_89 = arith.constant dense<0.000000e+00> : vector<2x8xf32>
    %288 = vector.multi_reduction <add>, %287, %cst_89 [2] : vector<2x8x8xf32> to vector<2x8xf32>
    %289 = vector.shape_cast %288 : vector<2x8xf32> to vector<2x8x1xf32>
    %290 = tpu.reciprocal %289 {approx = true} : vector<2x8x1xf32> -> vector<2x8x1xf32>
    %291 = vector.broadcast %290 : vector<2x8x1xf32> to vector<2x8x8xf32>
    %292 = arith.mulf %287, %291 : vector<2x8x8xf32>
    %293 = arith.truncf %292 : vector<2x8x8xf32> to vector<2x8x8xbf16>
    %294 = arith.truncf %273 : vector<2x8x8xf32> to vector<2x8x8xbf16>
    "tpu.trace_start"() <{level = 10 : i32, message = "bqk,bkd->bqd"}> : () -> ()
    %cst_90 = arith.constant dense<0.000000e+00> : vector<2x8x8xf32>
    %295 = tpu.matmul %293, %294, %cst_90 {dimension_numbers = #tpu.dot_dimension_numbers<[2], [1], [1], [2], [0, 0, 0, 1, 1, 2], [0], [0]>} : vector<2x8x8xbf16>, vector<2x8x8xbf16>, vector<2x8x8xf32> -> vector<2x8x8xf32>
    "tpu.trace_stop"() : () -> ()
    %296 = vector.shape_cast %295 : vector<2x8x8xf32> to vector<16x8xf32>
    %297 = arith.truncf %296 : vector<16x8xf32> to vector<16x8xbf16>
    %298 = vector.extract_strided_slice %86 {offsets = [3, 0, 0], sizes = [1, 8, 32], strides = [1, 1, 1]} : vector<4x8x32xbf16> to vector<1x8x32xbf16>
    %299 = vector.shape_cast %298 : vector<1x8x32xbf16> to vector<8x32xbf16>
    %cst_91 = arith.constant dense<0.000000e+00> : vector<16x32xf32>
    %300 = tpu.matmul %297, %299, %cst_91 {dimension_numbers = #tpu.dot_dimension_numbers<[1], [0], [0], [1], [0, 0, 1, 1], [], []>} : vector<16x8xbf16>, vector<8x32xbf16>, vector<16x32xf32> -> vector<16x32xf32>
    %301 = arith.addf %249, %300 : vector<16x32xf32>
    %c0_92 = arith.constant 0 : index
    %c0_93 = arith.constant 0 : index
    %c0_94 = arith.constant 0 : index
    %302 = vector.load %arg19[%c0_92, %c0_93, %c0_94] : memref<1x1x32xf32, #tpu.memory_space<vmem>>, vector<1x1x32xf32>
    %303 = vector.shape_cast %302 : vector<1x1x32xf32> to vector<1x32xf32>
    %304 = vector.broadcast %303 : vector<1x32xf32> to vector<16x32xf32>
    %305 = arith.addf %301, %304 : vector<16x32xf32>
    %306 = arith.mulf %30, %305 : vector<16x32xf32>
    %307 = arith.addf %3, %306 : vector<16x32xf32>
    %cst_95 = arith.constant dense<0.000000e+00> : vector<16xf32>
    %308 = vector.multi_reduction <add>, %307, %cst_95 [1] : vector<16x32xf32> to vector<16xf32>
    %309 = vector.shape_cast %308 : vector<16xf32> to vector<16x1xf32>
    %cst_96 = arith.constant 3.200000e+01 : f32
    %310 = vector.broadcast %cst_96 : f32 to vector<16x1xf32>
    %311 = arith.divf %309, %310 : vector<16x1xf32>
    %312 = vector.broadcast %311 : vector<16x1xf32> to vector<16x32xf32>
    %313 = arith.subf %307, %312 : vector<16x32xf32>
    %314 = arith.mulf %313, %313 : vector<16x32xf32>
    %cst_97 = arith.constant dense<0.000000e+00> : vector<16xf32>
    %315 = vector.multi_reduction <add>, %314, %cst_97 [1] : vector<16x32xf32> to vector<16xf32>
    %316 = vector.shape_cast %315 : vector<16xf32> to vector<16x1xf32>
    %cst_98 = arith.constant 3.200000e+01 : f32
    %317 = vector.broadcast %cst_98 : f32 to vector<16x1xf32>
    %318 = arith.divf %316, %317 : vector<16x1xf32>
    %319 = vector.broadcast %311 : vector<16x1xf32> to vector<16x32xf32>
    %320 = arith.subf %307, %319 : vector<16x32xf32>
    %cst_99 = arith.constant 9.99999997E-7 : f32
    %321 = vector.broadcast %cst_99 : f32 to vector<16x1xf32>
    %322 = arith.addf %318, %321 : vector<16x1xf32>
    %323 = math.rsqrt %322 : vector<16x1xf32>
    %324 = vector.broadcast %323 : vector<16x1xf32> to vector<16x32xf32>
    %325 = arith.mulf %320, %324 : vector<16x32xf32>
    %cst_100 = arith.constant 1.000000e+00 : f32
    %326 = vector.broadcast %cst_100 : f32 to vector<16x32xf32>
    %327 = arith.addf %326, %44 : vector<16x32xf32>
    %328 = arith.mulf %325, %327 : vector<16x32xf32>
    %329 = arith.addf %328, %37 : vector<16x32xf32>
    %c0_101 = arith.constant 0 : index
    %c0_102 = arith.constant 0 : index
    %c0_103 = arith.constant 0 : index
    %330 = vector.load %arg20[%c0_101, %c0_102, %c0_103] : memref<1x32x64xbf16, #tpu.memory_space<vmem>>, vector<1x32x64xbf16>
    %331 = vector.shape_cast %330 : vector<1x32x64xbf16> to vector<32x64xbf16>
    %332 = arith.truncf %329 : vector<16x32xf32> to vector<16x32xbf16>
    %cst_104 = arith.constant dense<0.000000e+00> : vector<16x64xf32>
    %333 = tpu.matmul %332, %331, %cst_104 {dimension_numbers = #tpu.dot_dimension_numbers<[1], [0], [0], [1], [0, 0, 1, 1], [], []>} : vector<16x32xbf16>, vector<32x64xbf16>, vector<16x64xf32> -> vector<16x64xf32>
    %c0_105 = arith.constant 0 : index
    %c0_106 = arith.constant 0 : index
    %c0_107 = arith.constant 0 : index
    %334 = vector.load %arg21[%c0_105, %c0_106, %c0_107] : memref<1x1x64xf32, #tpu.memory_space<vmem>>, vector<1x1x64xf32>
    %335 = vector.shape_cast %334 : vector<1x1x64xf32> to vector<1x64xf32>
    %336 = vector.broadcast %335 : vector<1x64xf32> to vector<16x64xf32>
    %337 = arith.addf %333, %336 : vector<16x64xf32>
    %cst_108 = arith.constant 5.000000e-01 : f32
    %338 = vector.broadcast %cst_108 : f32 to vector<16x64xf32>
    %339 = arith.mulf %338, %337 : vector<16x64xf32>
    %cst_109 = arith.constant 0.707106769 : f32
    %340 = vector.broadcast %cst_109 : f32 to vector<16x64xf32>
    %341 = arith.mulf %337, %340 : vector<16x64xf32>
    %cst_110 = arith.constant 0.000000e+00 : f32
    %342 = vector.broadcast %cst_110 : f32 to vector<16x64xf32>
    %343 = arith.cmpf olt, %341, %342 : vector<16x64xf32>
    %cst_111 = arith.constant -1.000000e+00 : f32
    %cst_112 = arith.constant 1.000000e+00 : f32
    %344 = vector.broadcast %cst_111 : f32 to vector<16x64xf32>
    %345 = vector.broadcast %cst_112 : f32 to vector<16x64xf32>
    %346 = arith.select %343, %344, %345 : vector<16x64xi1>, vector<16x64xf32>
    %347 = math.absf %341 : vector<16x64xf32>
    %cst_113 = arith.constant 0.327591091 : f32
    %348 = vector.broadcast %cst_113 : f32 to vector<16x64xf32>
    %349 = arith.mulf %348, %347 : vector<16x64xf32>
    %cst_114 = arith.constant 1.000000e+00 : f32
    %350 = vector.broadcast %cst_114 : f32 to vector<16x64xf32>
    %351 = arith.addf %350, %349 : vector<16x64xf32>
    %cst_115 = arith.constant 1.000000e+00 : f32
    %352 = vector.broadcast %cst_115 : f32 to vector<16x64xf32>
    %353 = arith.divf %352, %351 : vector<16x64xf32>
    %cst_116 = arith.constant 1.06140542 : f32
    %354 = vector.broadcast %cst_116 : f32 to vector<16x64xf32>
    %355 = arith.mulf %354, %353 : vector<16x64xf32>
    %cst_117 = arith.constant -1.45315206 : f32
    %356 = vector.broadcast %cst_117 : f32 to vector<16x64xf32>
    %357 = arith.addf %355, %356 : vector<16x64xf32>
    %358 = arith.mulf %357, %353 : vector<16x64xf32>
    %cst_118 = arith.constant 1.42141378 : f32
    %359 = vector.broadcast %cst_118 : f32 to vector<16x64xf32>
    %360 = arith.addf %358, %359 : vector<16x64xf32>
    %361 = arith.mulf %360, %353 : vector<16x64xf32>
    %cst_119 = arith.constant -0.284496725 : f32
    %362 = vector.broadcast %cst_119 : f32 to vector<16x64xf32>
    %363 = arith.addf %361, %362 : vector<16x64xf32>
    %364 = arith.mulf %363, %353 : vector<16x64xf32>
    %cst_120 = arith.constant 0.254829586 : f32
    %365 = vector.broadcast %cst_120 : f32 to vector<16x64xf32>
    %366 = arith.addf %364, %365 : vector<16x64xf32>
    %367 = arith.mulf %366, %353 : vector<16x64xf32>
    %cst_121 = arith.constant 0.000000e+00 : f32
    %368 = vector.broadcast %cst_121 : f32 to vector<16x64xf32>
    %369 = arith.subf %368, %347 : vector<16x64xf32>
    %370 = arith.mulf %369, %347 : vector<16x64xf32>
    %371 = math.exp %370 : vector<16x64xf32>
    %372 = arith.mulf %367, %371 : vector<16x64xf32>
    %cst_122 = arith.constant 1.000000e+00 : f32
    %373 = vector.broadcast %cst_122 : f32 to vector<16x64xf32>
    %374 = arith.subf %373, %372 : vector<16x64xf32>
    %375 = arith.mulf %346, %374 : vector<16x64xf32>
    %cst_123 = arith.constant 1.000000e+00 : f32
    %376 = vector.broadcast %cst_123 : f32 to vector<16x64xf32>
    %377 = arith.addf %376, %375 : vector<16x64xf32>
    %378 = arith.mulf %339, %377 : vector<16x64xf32>
    %c0_124 = arith.constant 0 : index
    %c0_125 = arith.constant 0 : index
    %c0_126 = arith.constant 0 : index
    %379 = vector.load %arg22[%c0_124, %c0_125, %c0_126] : memref<1x64x32xbf16, #tpu.memory_space<vmem>>, vector<1x64x32xbf16>
    %380 = vector.shape_cast %379 : vector<1x64x32xbf16> to vector<64x32xbf16>
    %381 = arith.truncf %378 : vector<16x64xf32> to vector<16x64xbf16>
    %cst_127 = arith.constant dense<0.000000e+00> : vector<16x32xf32>
    %382 = tpu.matmul %381, %380, %cst_127 {dimension_numbers = #tpu.dot_dimension_numbers<[1], [0], [0], [1], [0, 0, 1, 1], [], []>} : vector<16x64xbf16>, vector<64x32xbf16>, vector<16x32xf32> -> vector<16x32xf32>
    %c0_128 = arith.constant 0 : index
    %c0_129 = arith.constant 0 : index
    %c0_130 = arith.constant 0 : index
    %383 = vector.load %arg23[%c0_128, %c0_129, %c0_130] : memref<1x1x32xf32, #tpu.memory_space<vmem>>, vector<1x1x32xf32>
    %384 = vector.shape_cast %383 : vector<1x1x32xf32> to vector<1x32xf32>
    %385 = vector.broadcast %384 : vector<1x32xf32> to vector<16x32xf32>
    %386 = arith.addf %382, %385 : vector<16x32xf32>
    %387 = arith.mulf %51, %386 : vector<16x32xf32>
    %388 = arith.addf %307, %387 : vector<16x32xf32>
    %c0_131 = arith.constant 0 : index
    %c0_132 = arith.constant 0 : index
    %389 = vector.load %arg29[%c0_131, %c0_132] : memref<16x32xf32, #tpu.memory_space<vmem>>, vector<16x32xf32>
    tpu.vector_store %arg29[%c0_131, %c0_132], %388 {strides = array<i32>} : memref<16x32xf32, #tpu.memory_space<vmem>>, vector<16x32xf32>,
    %c1_i32 = arith.constant 1 : i32
    %390 = arith.cmpi eq, %arg1, %c1_i32 : i32
    %391 = arith.extui %390 : i1 to i32
    %c0_i32_133 = arith.constant 0 : i32
    %392 = arith.cmpi ne, %391, %c0_i32_133 : i32
    scf.if %392 {
      %c0_134 = arith.constant 0 : index
      %c0_135 = arith.constant 0 : index
      %c0_136 = arith.constant 0 : index
      %393 = vector.load %arg24[%c0_134, %c0_135, %c0_136] : memref<2x32x32xbf16, #tpu.memory_space<vmem>>, vector<2x32x32xbf16>
      %c0_137 = arith.constant 0 : index
      %c0_138 = arith.constant 0 : index
      %c0_139 = arith.constant 0 : index
      %394 = vector.load %arg25[%c0_137, %c0_138, %c0_139] : memref<2x1x32xf32, #tpu.memory_space<vmem>>, vector<2x1x32xf32>
      %395 = vector.extract_strided_slice %393 {offsets = [0, 0, 0], sizes = [1, 32, 32], strides = [1, 1, 1]} : vector<2x32x32xbf16> to vector<1x32x32xbf16>
      %396 = vector.shape_cast %395 : vector<1x32x32xbf16> to vector<32x32xbf16>
      %cst_140 = arith.constant dense<0.000000e+00> : vector<16x32xf32>
      %397 = tpu.matmul %5, %396, %cst_140 {dimension_numbers = #tpu.dot_dimension_numbers<[1], [0], [0], [1], [0, 0, 1, 1], [], []>} : vector<16x32xbf16>, vector<32x32xbf16>, vector<16x32xf32> -> vector<16x32xf32>
      %398 = vector.extract_strided_slice %394 {offsets = [0, 0, 0], sizes = [1, 1, 32], strides = [1, 1, 1]} : vector<2x1x32xf32> to vector<1x1x32xf32>
      %399 = vector.shape_cast %398 : vector<1x1x32xf32> to vector<1x32xf32>
      %400 = vector.broadcast %399 : vector<1x32xf32> to vector<16x32xf32>
      %401 = arith.addf %397, %400 : vector<16x32xf32>
      %402 = vector.extract_strided_slice %393 {offsets = [1, 0, 0], sizes = [1, 32, 32], strides = [1, 1, 1]} : vector<2x32x32xbf16> to vector<1x32x32xbf16>
      %403 = vector.shape_cast %402 : vector<1x32x32xbf16> to vector<32x32xbf16>
      %cst_141 = arith.constant dense<0.000000e+00> : vector<16x32xf32>
      %404 = tpu.matmul %5, %403, %cst_141 {dimension_numbers = #tpu.dot_dimension_numbers<[1], [0], [0], [1], [0, 0, 1, 1], [], []>} : vector<16x32xbf16>, vector<32x32xbf16>, vector<16x32xf32> -> vector<16x32xf32>
      %405 = vector.extract_strided_slice %394 {offsets = [1, 0, 0], sizes = [1, 1, 32], strides = [1, 1, 1]} : vector<2x1x32xf32> to vector<1x1x32xf32>
      %406 = vector.shape_cast %405 : vector<1x1x32xf32> to vector<1x32xf32>
      %407 = vector.broadcast %406 : vector<1x32xf32> to vector<16x32xf32>
      %408 = arith.addf %404, %407 : vector<16x32xf32>
      %cst_142 = arith.constant dense<0.000000e+00> : vector<16xf32>
      %409 = vector.multi_reduction <add>, %388, %cst_142 [1] : vector<16x32xf32> to vector<16xf32>
      %410 = vector.shape_cast %409 : vector<16xf32> to vector<16x1xf32>
      %cst_143 = arith.constant 3.200000e+01 : f32
      %411 = vector.broadcast %cst_143 : f32 to vector<16x1xf32>
      %412 = arith.divf %410, %411 : vector<16x1xf32>
      %413 = vector.broadcast %412 : vector<16x1xf32> to vector<16x32xf32>
      %414 = arith.subf %388, %413 : vector<16x32xf32>
      %415 = arith.mulf %414, %414 : vector<16x32xf32>
      %cst_144 = arith.constant dense<0.000000e+00> : vector<16xf32>
      %416 = vector.multi_reduction <add>, %415, %cst_144 [1] : vector<16x32xf32> to vector<16xf32>
      %417 = vector.shape_cast %416 : vector<16xf32> to vector<16x1xf32>
      %cst_145 = arith.constant 3.200000e+01 : f32
      %418 = vector.broadcast %cst_145 : f32 to vector<16x1xf32>
      %419 = arith.divf %417, %418 : vector<16x1xf32>
      %420 = vector.broadcast %412 : vector<16x1xf32> to vector<16x32xf32>
      %421 = arith.subf %388, %420 : vector<16x32xf32>
      %cst_146 = arith.constant 9.99999997E-7 : f32
      %422 = vector.broadcast %cst_146 : f32 to vector<16x1xf32>
      %423 = arith.addf %419, %422 : vector<16x1xf32>
      %424 = math.rsqrt %423 : vector<16x1xf32>
      %425 = vector.broadcast %424 : vector<16x1xf32> to vector<16x32xf32>
      %426 = arith.mulf %421, %425 : vector<16x32xf32>
      %cst_147 = arith.constant 1.000000e+00 : f32
      %427 = vector.broadcast %cst_147 : f32 to vector<16x32xf32>
      %428 = arith.addf %427, %408 : vector<16x32xf32>
      %429 = arith.mulf %426, %428 : vector<16x32xf32>
      %430 = arith.addf %429, %401 : vector<16x32xf32>
      %c0_148 = arith.constant 0 : index
      %c0_149 = arith.constant 0 : index
      %431 = vector.load %arg26[%c0_148, %c0_149] : memref<32x2xbf16, #tpu.memory_space<vmem>>, vector<32x2xbf16>
      %432 = arith.truncf %430 : vector<16x32xf32> to vector<16x32xbf16>
      %cst_150 = arith.constant dense<0.000000e+00> : vector<16x2xf32>
      %433 = tpu.matmul %432, %431, %cst_150 {dimension_numbers = #tpu.dot_dimension_numbers<[1], [0], [0], [1], [0, 0, 1, 1], [], []>} : vector<16x32xbf16>, vector<32x2xbf16>, vector<16x2xf32> -> vector<16x2xf32>
      %c0_151 = arith.constant 0 : index
      %c0_152 = arith.constant 0 : index
      %434 = vector.load %arg27[%c0_151, %c0_152] : memref<1x2xf32, #tpu.memory_space<vmem>>, vector<1x2xf32>
      %435 = vector.broadcast %434 : vector<1x2xf32> to vector<16x2xf32>
      %436 = arith.addf %433, %435 : vector<16x2xf32>
      %437 = vector.shape_cast %436 : vector<16x2xf32> to vector<2x8x2xf32>
      %c0_153 = arith.constant 0 : index
      %c0_154 = arith.constant 0 : index
      %c0_155 = arith.constant 0 : index
      %438 = vector.load %arg28[%c0_153, %c0_154, %c0_155] : memref<2x8x2xf32, #tpu.memory_space<vmem>>, vector<2x8x2xf32>
      tpu.vector_store %arg28[%c0_153, %c0_154, %c0_155], %437 {strides = array<i32>} : memref<2x8x2xf32, #tpu.memory_space<vmem>>, vector<2x8x2xf32>,
    } else {
    }
    return
  }
  func.func @transform_0(%arg0: i32, %arg1: i32) -> (i32, i32, i32) {
    %c0_i32 = arith.constant 0 : i32
    %c0_i32_0 = arith.constant 0 : i32
    %c0_i32_1 = arith.constant 0 : i32
    return %arg0, %c0_i32, %c0_i32_0 : i32, i32, i32
  }
  func.func @transform_1(%arg0: i32, %arg1: i32) -> (i32, i32, i32) {
    %c0_i32 = arith.constant 0 : i32
    %c0_i32_0 = arith.constant 0 : i32
    %c0_i32_1 = arith.constant 0 : i32
    return %arg0, %c0_i32, %c0_i32_0 : i32, i32, i32
  }
  func.func @transform_2(%arg0: i32, %arg1: i32) -> (i32, i32, i32) {
    %c0_i32 = arith.constant 0 : i32
    %c0_i32_0 = arith.constant 0 : i32
    %c0_i32_1 = arith.constant 0 : i32
    return %arg0, %c0_i32, %c0_i32_0 : i32, i32, i32
  }
  func.func @transform_3(%arg0: i32, %arg1: i32) -> (i32, i32, i32) {
    %c0_i32 = arith.constant 0 : i32
    %c0_i32_0 = arith.constant 0 : i32
    %c0_i32_1 = arith.constant 0 : i32
    return %arg0, %c0_i32, %c0_i32_0 : i32, i32, i32
  }
  func.func @transform_4(%arg0: i32, %arg1: i32) -> (i32, i32) {
    %c0_i32 = arith.constant 0 : i32
    %c0_i32_0 = arith.constant 0 : i32
    %c0_i32_1 = arith.constant 0 : i32
    return %c0_i32, %c0_i32_0 : i32, i32
  }
  func.func @transform_5(%arg0: i32, %arg1: i32) -> (i32, i32) {
    %c0_i32 = arith.constant 0 : i32
    %c0_i32_0 = arith.constant 0 : i32
    %c0_i32_1 = arith.constant 0 : i32
    return %c0_i32, %c0_i32_0 : i32, i32
  }
  func.func @transform_6(%arg0: i32, %arg1: i32) -> (i32, i32) {
    %c0_i32 = arith.constant 0 : i32
    %c0_i32_0 = arith.constant 0 : i32
    %c0_i32_1 = arith.constant 0 : i32
    return %c0_i32, %c0_i32_0 : i32, i32
  }
  func.func @transform_7(%arg0: i32, %arg1: i32) -> (i32, i32) {
    %c0_i32 = arith.constant 0 : i32
    %c0_i32_0 = arith.constant 0 : i32
    %c0_i32_1 = arith.constant 0 : i32
    return %c0_i32, %c0_i32_0 : i32, i32
  }
  func.func @transform_8(%arg0: i32, %arg1: i32) -> (i32, i32, i32, i32) {
    %c0_i32 = arith.constant 0 : i32
    %c0_i32_0 = arith.constant 0 : i32
    %c0_i32_1 = arith.constant 0 : i32
    %c0_i32_2 = arith.constant 0 : i32
    return %arg1, %c0_i32, %c0_i32_0, %c0_i32_1 : i32, i32, i32, i32
  }
  func.func @transform_9(%arg0: i32, %arg1: i32) -> (i32, i32, i32, i32) {
    %c0_i32 = arith.constant 0 : i32
    %c0_i32_0 = arith.constant 0 : i32
    %c0_i32_1 = arith.constant 0 : i32
    %c0_i32_2 = arith.constant 0 : i32
    return %arg1, %c0_i32, %c0_i32_0, %c0_i32_1 : i32, i32, i32, i32
  }
  func.func @transform_10(%arg0: i32, %arg1: i32) -> (i32, i32, i32, i32) {
    %c0_i32 = arith.constant 0 : i32
    %c0_i32_0 = arith.constant 0 : i32
    %c0_i32_1 = arith.constant 0 : i32
    %c0_i32_2 = arith.constant 0 : i32
    return %arg1, %c0_i32, %c0_i32_0, %c0_i32_1 : i32, i32, i32, i32
  }
  func.func @transform_11(%arg0: i32, %arg1: i32) -> (i32, i32, i32, i32) {
    %c0_i32 = arith.constant 0 : i32
    %c0_i32_0 = arith.constant 0 : i32
    %c0_i32_1 = arith.constant 0 : i32
    %c0_i32_2 = arith.constant 0 : i32
    return %arg1, %c0_i32, %c0_i32_0, %c0_i32_1 : i32, i32, i32, i32
  }
  func.func @transform_12(%arg0: i32, %arg1: i32) -> (i32, i32, i32, i32) {
    %c0_i32 = arith.constant 0 : i32
    %c0_i32_0 = arith.constant 0 : i32
    %c0_i32_1 = arith.constant 0 : i32
    %c0_i32_2 = arith.constant 0 : i32
    return %arg1, %c0_i32, %c0_i32_0, %c0_i32_1 : i32, i32, i32, i32
  }
  func.func @transform_13(%arg0: i32, %arg1: i32) -> (i32, i32, i32, i32) {
    %c0_i32 = arith.constant 0 : i32
    %c0_i32_0 = arith.constant 0 : i32
    %c0_i32_1 = arith.constant 0 : i32
    %c0_i32_2 = arith.constant 0 : i32
    return %arg1, %c0_i32, %c0_i32_0, %c0_i32_1 : i32, i32, i32, i32
  }
  func.func @transform_14(%arg0: i32, %arg1: i32) -> (i32, i32, i32, i32) {
    %c0_i32 = arith.constant 0 : i32
    %c0_i32_0 = arith.constant 0 : i32
    %c0_i32_1 = arith.constant 0 : i32
    %c0_i32_2 = arith.constant 0 : i32
    return %arg1, %c0_i32, %c0_i32_0, %c0_i32_1 : i32, i32, i32, i32
  }
  func.func @transform_15(%arg0: i32, %arg1: i32) -> (i32, i32, i32, i32) {
    %c0_i32 = arith.constant 0 : i32
    %c0_i32_0 = arith.constant 0 : i32
    %c0_i32_1 = arith.constant 0 : i32
    %c0_i32_2 = arith.constant 0 : i32
    return %arg1, %c0_i32, %c0_i32_0, %c0_i32_1 : i32, i32, i32, i32
  }
  func.func @transform_16(%arg0: i32, %arg1: i32) -> (i32, i32, i32, i32) {
    %c0_i32 = arith.constant 0 : i32
    %c0_i32_0 = arith.constant 0 : i32
    %c0_i32_1 = arith.constant 0 : i32
    %c0_i32_2 = arith.constant 0 : i32
    return %arg1, %c0_i32, %c0_i32_0, %c0_i32_1 : i32, i32, i32, i32
  }
  func.func @transform_17(%arg0: i32, %arg1: i32) -> (i32, i32, i32) {
    %c0_i32 = arith.constant 0 : i32
    %c0_i32_0 = arith.constant 0 : i32
    %c0_i32_1 = arith.constant 0 : i32
    return %arg1, %c0_i32, %c0_i32_0 : i32, i32, i32
  }
  func.func @transform_18(%arg0: i32, %arg1: i32) -> (i32, i32, i32) {
    %c0_i32 = arith.constant 0 : i32
    %c0_i32_0 = arith.constant 0 : i32
    %c0_i32_1 = arith.constant 0 : i32
    return %arg1, %c0_i32, %c0_i32_0 : i32, i32, i32
  }
  func.func @transform_19(%arg0: i32, %arg1: i32) -> (i32, i32, i32) {
    %c0_i32 = arith.constant 0 : i32
    %c0_i32_0 = arith.constant 0 : i32
    %c0_i32_1 = arith.constant 0 : i32
    return %arg1, %c0_i32, %c0_i32_0 : i32, i32, i32
  }
  func.func @transform_20(%arg0: i32, %arg1: i32) -> (i32, i32, i32) {
    %c0_i32 = arith.constant 0 : i32
    %c0_i32_0 = arith.constant 0 : i32
    %c0_i32_1 = arith.constant 0 : i32
    return %arg1, %c0_i32, %c0_i32_0 : i32, i32, i32
  }
  func.func @transform_21(%arg0: i32, %arg1: i32) -> (i32, i32, i32) {
    %c0_i32 = arith.constant 0 : i32
    %c0_i32_0 = arith.constant 0 : i32
    %c0_i32_1 = arith.constant 0 : i32
    return %arg1, %c0_i32, %c0_i32_0 : i32, i32, i32
  }
  func.func @transform_22(%arg0: i32, %arg1: i32) -> (i32, i32, i32) {
    %c0_i32 = arith.constant 0 : i32
    %c0_i32_0 = arith.constant 0 : i32
    %c0_i32_1 = arith.constant 0 : i32
    %c0_i32_2 = arith.constant 0 : i32
    return %c0_i32, %c0_i32_0, %c0_i32_1 : i32, i32, i32
  }
  func.func @transform_23(%arg0: i32, %arg1: i32) -> (i32, i32, i32) {
    %c0_i32 = arith.constant 0 : i32
    %c0_i32_0 = arith.constant 0 : i32
    %c0_i32_1 = arith.constant 0 : i32
    %c0_i32_2 = arith.constant 0 : i32
    return %c0_i32, %c0_i32_0, %c0_i32_1 : i32, i32, i32
  }
  func.func @transform_24(%arg0: i32, %arg1: i32) -> (i32, i32) {
    %c0_i32 = arith.constant 0 : i32
    %c0_i32_0 = arith.constant 0 : i32
    %c0_i32_1 = arith.constant 0 : i32
    return %c0_i32, %c0_i32_0 : i32, i32
  }
  func.func @transform_25(%arg0: i32, %arg1: i32) -> (i32, i32) {
    %c0_i32 = arith.constant 0 : i32
    %c0_i32_0 = arith.constant 0 : i32
    %c0_i32_1 = arith.constant 0 : i32
    return %c0_i32, %c0_i32_0 : i32, i32
  }
  func.func @transform_26(%arg0: i32, %arg1: i32) -> (i32, i32, i32) {
    %c0_i32 = arith.constant 0 : i32
    %c0_i32_0 = arith.constant 0 : i32
    %c0_i32_1 = arith.constant 0 : i32
    return %arg0, %c0_i32, %c0_i32_0 : i32, i32, i32
  }
}

</mosaic_0001>

<bundles_post_ra>
// kernel: tpu_custom_call.1
= control target key start
LH: loop header
LB: loop body
LE: loop exit
PB: predicated region body
PF: predicated region fallthrough
CT: control target
= control target key end

     0   :  { %s5291_s27 = smov 0   ;;  %s5910_s0 = inlined_call_operand.vmem [shape: f32[2,8,6], index: 0, kind: input, shape index: {}]   ;;  %s5911_s1 = inlined_call_operand.vmem [shape: f32[2,8,2], index: 1, kind: input, shape index: {}]   ;;  %s5912_s2 = inlined_call_operand.vmem [shape: f32[2,8,32], index: 2, kind: input, shape index: {}]   ;;  %s5913_s3 = inlined_call_operand.vmem [shape: f32[2,1,32], index: 3, kind: input, shape index: {}]   ;;  %s5914_s4 = inlined_call_operand.vmem [shape: bf16[6,32], index: 4, kind: input, shape index: {}]   ;;  %s5915_s5 = inlined_call_operand.vmem [shape: f32[1,32], index: 5, kind: input, shape index: {}]   ;;  %s5916_s6 = inlined_call_operand.vmem [shape: bf16[2,32], index: 6, kind: input, shape index: {}]   ;;  %s5917_s7 = inlined_call_operand.vmem [shape: f32[1,32], index: 7, kind: input, shape index: {}]   ;;  %s5918_s8 = inlined_call_operand.vmem [shape: bf16[2,6,32,32], index: 8, kind: input, shape index: {}]   ;;  %s5919_s9 = inlined_call_operand.vmem [shape: f32[2,6,1,32], index: 9, kind: input, shape index: {}]   ;;  %s5920_s10 = inlined_call_operand.vmem [shape: bf16[2,4,32,8], index: 10, kind: input, shape index: {}]   ;;  %s5921_s11 = inlined_call_operand.vmem [shape: f32[2,4,1,8], index: 11, kind: input, shape index: {}]   ;;  %s5922_s12 = inlined_call_operand.vmem [shape: bf16[2,4,32,8], index: 12, kind: input, shape index: {}]   ;;  %s5923_s13 = inlined_call_operand.vmem [shape: f32[2,4,1,8], index: 13, kind: input, shape index: {}]   ;;  %s5924_s14 = inlined_call_operand.vmem [shape: bf16[2,4,32,8], index: 14, kind: input, shape index: {}]   ;;  %s5925_s15 = inlined_call_operand.vmem [shape: f32[2,4,1,8], index: 15, kind: input, shape index: {}]   ;;  %s5926_s16 = inlined_call_operand.vmem [shape: bf16[2,4,8,32], index: 16, kind: input, shape index: {}]   ;;  %s5927_s17 = inlined_call_operand.vmem [shape: f32[2,1,32], index: 17, kind: input, shape index: {}]   ;;  %s5928_s18 = inlined_call_operand.vmem [shape: bf16[2,32,64], index: 18, kind: input, shape index: {}]   ;;  %s5929_s19 = inlined_call_operand.vmem [shape: f32[2,1,64], index: 19, kind: input, shape index: {}]   ;;  %s5930_s20 = inlined_call_operand.vmem [shape: bf16[2,64,32], index: 20, kind: input, shape index: {}]   ;;  %s5931_s21 = inlined_call_operand.vmem [shape: f32[2,1,32], index: 21, kind: input, shape index: {}]   ;;  %s5932_s22 = inlined_call_operand.vmem [shape: bf16[2,32,32], index: 22, kind: input, shape index: {}]   ;;  %s5933_s23 = inlined_call_operand.vmem [shape: f32[2,1,32], index: 23, kind: input, shape index: {}]   ;;  %s5934_s24 = inlined_call_operand.vmem [shape: bf16[32,2], index: 24, kind: input, shape index: {}]   ;;  %s5935_s25 = inlined_call_operand.vmem [shape: f32[1,2], index: 25, kind: input, shape index: {}]   ;;  %s5936_s26 = inlined_call_operand.vmem [shape: f32[2,8,2], index: 26, kind: output, shape index: {}]  }
   0x1   :  { %5950 = sst [smem:[#allocation9_spill]] %s5910_s0 }
   0x2   :  { %5951 = sst [smem:[#allocation10_spill]] %s5911_s1 }
   0x3   :  { %5952 = sst [smem:[#allocation11_spill]] %s5912_s2 }
   0x4   :  { %5953 = sst [smem:[#allocation12_spill]] %s5913_s3  ;;  %s5293_s3 = smov 0  }
   0x5   :  { %5954 = sst [smem:[#allocation13_spill]] %s5914_s4 }
   0x6   :  { %5955 = sst [smem:[#allocation14_spill]] %s5915_s5 }
   0x7   :  { %5956 = sst [smem:[#allocation15_spill]] %s5916_s6 }
   0x8   :  { %5957 = sst [smem:[#allocation16_spill]] %s5917_s7  ;;  %s5295_s7 = smov 0  }
   0x9   :  { %5958 = sst [smem:[#allocation17_spill]] %s5918_s8 }
   0xa   :  { %5959 = sst [smem:[#allocation18_spill]] %s5919_s9 }
   0xb   :  { %5960 = sst [smem:[#allocation19_spill]] %s5920_s10 }
   0xc   :  { %5961 = sst [smem:[#allocation20_spill]] %s5921_s11 }
   0xd   :  { %5962 = sst [smem:[#allocation21_spill]] %s5922_s12 }
   0xe   :  { %5963 = sst [smem:[#allocation22_spill]] %s5923_s13 }
   0xf   :  { %5964 = sst [smem:[#allocation23_spill]] %s5924_s14 }
  0x10   :  { %5965 = sst [smem:[#allocation24_spill]] %s5925_s15 }
  0x11   :  { %5966 = sst [smem:[#allocation25_spill]] %s5926_s16 }
  0x12   :  { %5967 = sst [smem:[#allocation26_spill]] %s5932_s22 }
  0x13   :  { %5968 = sst [smem:[#allocation27_spill]] %s5933_s23 }
  0x14   :  { %5969 = sst [smem:[#allocation28_spill]] %s5934_s24 }
  0x15   :  { %5970 = sst [smem:[#allocation29_spill]] %s5935_s25 }
  0x16   :  { %5971 = sst [smem:[#allocation30_spill]] %s5936_s26 }
  0x17 LB: > { %5972 = sst [smem:[#allocation4_spill]] %s5138_s27  ;;  %s45_s28 = sadd.s32 1, %s5142_s3  ;;  %s5146_s7 = sphi %s5295_s7, %s36_s7   ;;  %s5142_s3 = sphi %s5293_s3, %s6009_s3   ;;  %s5138_s27 = sphi %s5291_s27, %s6008_s27  }
  0x18   : > { %5973 = sst [smem:[#allocation5_spill]] %s5142_s3  ;;  %p4385_p0 = scmp.ge.s32.totalorder %s5146_s7, 1 }
  0x19   : > { %5974 = sst [smem:[#allocation6_spill]] %s5146_s7  ;;  %p46_p1 = scmp.ge.s32.totalorder %s45_s28, 2 }
  0x1a   : > { %p887_p2 = scmp.lt.s32.totalorder %s5146_s7, 3 }
  0x1b   : > { %s6011_s28 = smov (%p46_p1, %s45_s28), 0 }
  0x1c   : > { %5975 = sst [smem:[#allocation7_spill]] %s6011_s28  ;;  %p888_p3 = pnand %p4385_p0, %p887_p2 }
  0x1e   : > { %891 = sbr.rel (%p888_p3) target bundleno = 5899 (0x170b), region = 124 }
  0x25   : > { %p1054_p4 = scmp.lt.s32.totalorder %s5138_s27, 1  ;;  %s5976_s2 = sld [smem:[#allocation19_spill]] }
  0x26   : > { %s5978_s1 = sld [smem:[#allocation17_spill]]  ;;  %s5979_s25 = sld [smem:[#allocation18_spill]] }
  0x27   : > { %s5313_s8 = scalar_select %p1054_p4, %s5138_s27, 1 }
  0x28   : > { %s5980_s11 = sld [smem:[#allocation20_spill]]  ;;  %s5981_s12 = sld [smem:[#allocation21_spill]] }
  0x29   : > { %s4972_s4 = smul.u32 96, %s5313_s8  ;;  %s4531_s29 = sshll.u32 %s5313_s8, 6 }
  0x2a   : > { %s4973_s0 = smul.u32 6, %s5313_s8  ;;  %s4389_s3 = sshll.u32 %s5313_s8, 2 }
  0x2b   : > { %s5321_s5 = scalar_lea.vmem %s5976_s2, %s4531_s29  ;;  %s5982_s13 = sld [smem:[#allocation22_spill]] }
  0x2c   : > { %5977 = sst [smem:[#allocation8_spill]] %s5321_s5  ;;  %s5326_s28 = scalar_lea.vmem %s5978_s1, %s4972_s4 }
  0x2d   : > { %s5332_s23 = scalar_lea.vmem %s5979_s25, %s4973_s0  ;;  %s5983_s14 = sld [smem:[#allocation23_spill]] }
  0x2e   : > { %s5337_s27 = scalar_lea.vmem %s5980_s11, %s4389_s3  ;;  %s5342_s2 = scalar_lea.vmem %s5981_s12, %s4531_s29 }
  0x2f   : > { %s5984_s15 = sld [smem:[#allocation24_spill]]  ;;  %s4534_s24 = sshll.u32 %s5313_s8, 4 }
  0x30   : > { %s5985_s16 = sld [smem:[#allocation25_spill]]  ;;  %s4536_s26 = sshll.u32 %s5313_s8, 5 }
  0x31   : > { %s5347_s4 = scalar_lea.vmem %s5982_s13, %s4389_s3  ;;  %s5382_s0 = scalar_lea.vmem %s5930_s20, %s4536_s26 }
  0x32   : > { %s5986_s12 = sld [smem:[#allocation4_spill]] }
  0x33   : > { %s5352_s25 = scalar_lea.vmem %s5983_s14, %s4531_s29  ;;  %s5372_s29 = scalar_lea.vmem %s5928_s18, %s4534_s24 }
  0x35   : > { %s5357_s22 = scalar_lea.vmem %s5984_s15, %s4389_s3 }
  0x36   : > { %s5367_s10 = scalar_lea.vmem %s5985_s16, %s4534_s24 }
  0x38   : > { %p4402_p5 = scmp.ne.s32.totalorder %s5986_s12, 0 }
  0x39   : > { %s5987_s6 = sld [smem:[#allocation13_spill]] (!%p4402_p5)  ;;  %vm1153_vm0 = vcmask (!%p4402_p5), 1042432   ;;  %s5988_s3 = sld [smem:[#allocation15_spill]] (!%p4402_p5)  ;;  %v5148_v2 = vmov (!%p4402_p5), 0.0   ;;  %vm1239_vm1 = vcmask (!%p4402_p5), 1040384   ;;  %vm5149_vm2 = vmmov (!%p4402_p5), 0  }
  0x3a   : > { %1124 = sbr.rel (%p4402_p5) target bundleno = 333 (0x14d), region = 128  ;;  %4652 = vmatprep.subr.bf16.mxu0 (!%p4402_p5), %v5148_v2  ;;  %4658 = vmatprep.subr.bf16.mxu1 (!%p4402_p5), %v5148_v2  ;;  %s5989_s26 = sld [smem:[#allocation9_spill]] (!%p4402_p5)  ;;  %vm1149_vm3 = vcmask (!%p4402_p5), 48128   ;;  %vm1235_vm4 = vcmask (!%p4402_p5), 15360   ;;  %vm1223_vm5 = vcmask (!%p4402_p5), 261120  }
  0x3b   : > { %4654 = vmatprep.mubr.msk.bf16.mxu0 (!%p4402_p5), %vm5149_vm2, %v5148_v2  ;;  %s5990_s13 = sld [smem:[#allocation10_spill]] (!%p4402_p5)  ;;  %4660 = vmatprep.mubr.msk.bf16.mxu1 (!%p4402_p5), %vm5149_vm2, %v5148_v2  ;;  %s5991_s14 = sld [smem:[#allocation11_spill]] (!%p4402_p5) }
  0x3c   : > { %s5992_s9 = sld [smem:[#allocation12_spill]] (!%p4402_p5)  ;;  %s5993_s15 = sld [smem:[#allocation16_spill]] (!%p4402_p5) }
  0x3d   : > { %s5994_s16 = sld [smem:[#allocation14_spill]] (!%p4402_p5) }
  0x3f   : > { %v1147_v0 = vld [vmem:[%s5987_s6] sm:$0x7] (!%p4402_p5) }
  0x40   : > { %v1226_v1 = vld [vmem:[%s5988_s3] sm:$0x1] (!%p4402_p5)  ;;  %v1155_v3 = vsel (!%p4402_p5), %vm1153_vm0, %v1147_v0, 0  ;;  %v1126_v5 = vld [vmem:[%s5989_s26 + $0x8] sm:$0xff] (!%p4402_p5) }
  0x41   : > { %v1125_v4 = vld [vmem:[%s5989_s26] sm:$0xff]  ;;  %4653 = vmatpush3.bf16.msra.mxu0 %v1155_v3  ;;  %v1241_v6 = vsel %vm1239_vm1, %v1226_v1, 0  ;;  %v1128_v9 = vld [vmem:[%s5990_s13 + $0x8] sm:$0xff] }
  0x42   : > { %v1148_v7 = vpack.c.bf16 %v1126_v5, %v1125_v4  ;;  %v1127_v8 = vld [vmem:[%s5990_s13] sm:$0xff]  ;;  %4659 = vmatpush3.bf16.msra.mxu1 %v1241_v6  ;;  %v1130_v13 = vld [vmem:[%s5991_s14 + $0x8] sm:$0xff] }
  0x43   : > { %v1227_v10 = vpack.c.bf16 %v1128_v9, %v1127_v8  ;;  %v1129_v11 = vld [vmem:[%s5991_s14] sm:$0xff] }
  0x44   : > { %4655 = vmatmul.mubr.msk.bf16.vlgmr.msra.gmra.mrb[0].mxu0 %vm1149_vm3, %v1148_v7  ;;  %v4403_v12 = vld [vmem:[%s5992_s9] ss:$0 sm:$0xff]  ;;  %v4404_v14 = vld [vmem:[%s5992_s9 + $0x1] ss:$0 sm:$0xff] }
  0x45   : > { %4661 = vmatmul.mubr.msk.bf16.vlgmr.msra.gmra.mrb[0].mxu1 %vm1235_vm4, %v1227_v10  ;;  %v1145_v15 = vadd.f32 %v4403_v12, %v1129_v11  ;;  %v4409_v16 = vld [vmem:[%s5993_s15] ss:$0 sm:$0xff]  ;;  %v1146_v17 = vadd.f32 %v4404_v14, %v1130_v13 }
  0x46   : > { %v4406_v19 = vld [vmem:[%s5994_s16] ss:$0 sm:$0xff] }
 0x117   : > { %v1191_v18 = vpop.f32.mrb[0].mxu0 }
 0x118   : > { %v1198_v20 = vadd.f32 %v1191_v18, %v1145_v15  ;;  %v1277_v21 = vpop.f32.mrb[0].mxu1  ;;  %v4656_v22 = vpop.f32.mrb[1].mxu0 }
 0x119   : > { %v5425_v23 = vadd.f32 %v4409_v16, %v1277_v21  ;;  %v4662_v24 = vpop.f32.mrb[1].mxu1  ;;  %v1194_v25 = vpop.f32.mrb[2].mxu0 }
 0x11a   : > { %v1207_v26 = vadd.f32 %v4406_v19, %v1198_v20  ;;  %v1199_v27 = vadd.f32 %v1194_v25, %v1146_v17  ;;  %v1280_v28 = vpop.f32.mrb[2].mxu1  ;;  %v4657_v29 = vpop.f32.mrb[3].mxu0  ;;  %v5150_v17 = vmov 1.0  }
 0x11b   : > { %v5428_v30 = vmul.f32 0.70710677, %v5425_v23  ;;  %v5430_v31 = vadd.f32 %v4409_v16, %v1280_v28  ;;  %v4663_v32 = vpop.f32.mrb[3].mxu1  ;;  %v1284_v22 = vmul.f32 0.5, %v5425_v23 }
 0x11c   : > { %v4407_v33 = vmul.f32 -1.442695, %v1207_v26  ;;  %v1208_v34 = vadd.f32 %v4406_v19, %v1199_v27 }
 0x11d   : > { %v1292_v35 = vand.u32 2147483647, %v5428_v30  ;;  %v5434_v36 = vmul.f32 0.70710677, %v5430_v31  ;;  %vm1288_vm6 = vcmp.lt.f32.partialorder %v5428_v30, 0.0  ;;  %v1285_v28 = vmul.f32 0.5, %v5430_v31 }
 0x11e   : > { %5006 = vpow2.f32 %v4407_v33  ;;  %v4408_v37 = vmul.f32 -1.442695, %v1208_v34  ;;  %v1290_v18 = vsel %vm1288_vm6, -1.0, %v5150_v17 }
 0x11f   : > { %v1294_v38 = vmul.f32 0.3275911, %v1292_v35  ;;  %v1293_v39 = vand.u32 2147483647, %v5434_v36  ;;  %v1320_v45 = vsub.f32 0.0, %v1292_v35  ;;  %vm1289_vm7 = vcmp.lt.f32.partialorder %v5434_v36, 0.0 }
 0x120   : > { %5008 = vpow2.f32 %v4408_v37  ;;  %v1291_v25 = vsel %vm1289_vm7, -1.0, %v5150_v17 }
 0x121   : > { %v1296_v40 = vadd.f32 1.0, %v1294_v38  ;;  %v1295_v41 = vmul.f32 0.3275911, %v1293_v39  ;;  %v1321_v48 = vsub.f32 0.0, %v1293_v39  ;;  %v1322_v50 = vmul.f32 %v1320_v45, %v1292_v35 }
 0x123   : > { %5010 = vrcp.f32 %v1296_v40  ;;  %v1297_v42 = vadd.f32 1.0, %v1295_v41  ;;  %v1323_v54 = vmul.f32 %v1321_v48, %v1293_v39  ;;  %v1324_v55 = vmul.f32 1.442695, %v1322_v50 }
 0x125   : > { %5012 = vrcp.f32 %v1297_v42  ;;  %v1326_v60 = vmul.f32 1.442695, %v1323_v54 }
 0x128   : > { %v5007_v43 = vpop.eup %5006 }
 0x129   : > { %v1215_v44 = vadd.f32 1.0, %v5007_v43 }
 0x12a   : > { %v5009_v46 = vpop.eup %5008 }
 0x12b   : > { %5014 = vrcp.f32 %v1215_v44  ;;  %v1216_v47 = vadd.f32 1.0, %v5009_v46 }
 0x12d   : > { %v5011_v49 = vpop.eup %5010  ;;  %5016 = vrcp.f32 %v1216_v47 }
 0x12e   : > { %v1302_v51 = vmul.f32 1.0614054, %v5011_v49  ;;  %5018 = vpow2.f32 %v1324_v55 }
 0x12f   : > { %v5013_v52 = vpop.eup %5012  ;;  %5020 = vpow2.f32 %v1326_v60 }
 0x130   : > { %v1304_v53 = vadd.f32 -1.4531521, %v1302_v51  ;;  %v1303_v56 = vmul.f32 1.0614054, %v5013_v52 }
 0x132   : > { %v1306_v57 = vmul.f32 %v5011_v49, %v1304_v53  ;;  %v1305_v58 = vadd.f32 -1.4531521, %v1303_v56 }
 0x134   : > { %v1308_v59 = vadd.f32 1.4214138, %v1306_v57  ;;  %v1307_v62 = vmul.f32 %v5013_v52, %v1305_v58 }
 0x135   : > { %v5015_v61 = vpop.eup %5014 }
 0x136   : > { %v1221_v63 = vmul.f32 %v5015_v61, %v1207_v26  ;;  %v1310_v0 = vmul.f32 %v5011_v49, %v1308_v59  ;;  %v1309_v2 = vadd.f32 1.4214138, %v1307_v62 }
 0x137   : > { %v5017_v1 = vpop.eup %5016 }
 0x138   : > { %1224 = vst.msk [vmem:[#allocation3] sm:$0xff] %vm1223_vm5, %v1221_v63  ;;  %v1312_v3 = vadd.f32 -0.28449672, %v1310_v0  ;;  %v1222_v4 = vmul.f32 %v5017_v1, %v1208_v34  ;;  %v1311_v5 = vmul.f32 %v5013_v52, %v1309_v2  ;;  %v5019_v11 = vpop.eup %5018 }
 0x139   : > { %v5021_v15 = vpop.eup %5020 }
 0x13a   : > { %v1314_v6 = vmul.f32 %v5011_v49, %v1312_v3  ;;  %1225 = vst.msk [vmem:[#allocation3 + $0x8] sm:$0xff] %vm1223_vm5, %v1222_v4  ;;  %v1313_v7 = vadd.f32 -0.28449672, %v1311_v5 }
 0x13c   : > { %v1316_v8 = vadd.f32 0.2548296, %v1314_v6  ;;  %v1315_v9 = vmul.f32 %v5013_v52, %v1313_v7 }
 0x13e   : > { %v1318_v10 = vmul.f32 %v5011_v49, %v1316_v8  ;;  %v1317_v12 = vadd.f32 0.2548296, %v1315_v9 }
 0x140   : > { %v1328_v13 = vmul.f32 %v5019_v11, %v1318_v10  ;;  %v1319_v14 = vmul.f32 %v5013_v52, %v1317_v12 }
 0x142   : > { %v1330_v16 = vsub.f32 1.0, %v1328_v13  ;;  %v1329_v19 = vmul.f32 %v5021_v15, %v1319_v14 }
 0x144   : > { %v1332_v20 = vmul.f32 %v1330_v16, %v1290_v18  ;;  %v1331_v21 = vsub.f32 1.0, %v1329_v19 }
 0x146   : > { %v1334_v24 = vadd.f32 1.0, %v1332_v20  ;;  %v1333_v26 = vmul.f32 %v1331_v21, %v1291_v25 }
 0x148   : > { %v1336_v27 = vmul.f32 %v1334_v24, %v1284_v22  ;;  %v1335_v29 = vadd.f32 1.0, %v1333_v26 }
 0x14a   : > { %1338 = vst.msk [vmem:[#allocation2] sm:$0xff] %vm1223_vm5, %v1336_v27  ;;  %v1337_v30 = vmul.f32 %v1335_v29, %v1285_v28 }
 0x14c   : > { %1339 = vst.msk [vmem:[#allocation2 + $0x8] sm:$0xff] %vm1223_vm5, %v1337_v30 }
 0x14d PF: > { %vm1393_vm8 = vcmask 261120   ;;  %v5151_v34 = vmov 0.0   ;;  %v5022_v31 = vld [vmem:[%s5326_s28 + $0x10] sm:$0xff]   ;;  %v5023_v35 = vld [vmem:[%s5326_s28] sm:$0xff]   ;;  %v5024_v37 = vld [vmem:[%s5326_s28 + $0x18] sm:$0xff]   ;;  %vm5152_vm9 = vmmov 0  }
 0x14e   : > { %4672 = vmatprep.subr.bf16.mxu1 %v5151_v34  ;;  %4664 = vmatprep.subr.bf16.mxu0 %v5151_v34  ;;  %v1342_v38 = vld [vmem:[#allocation3] sm:$0xff]  ;;  %v1343_v39 = vld [vmem:[#allocation3 + $0x8] sm:$0xff]  ;;  %v5025_v40 = vld [vmem:[%s5326_s28 + $0x8] sm:$0xff]   ;;  %s5995_s15 = sld [smem:[#allocation8_spill]]  ;;  %vm2020_vm10 = vcmask 64512   ;;  %vm2148_vm11 = vcmask 1043456  }
 0x14f   : > { %4673 = vmatpush3.bf16.msra.mxu1 %v5022_v31  ;;  %4665 = vmatpush3.bf16.msra.mxu0 %v5023_v35  ;;  %v5459_v41 = vpack.c.bf16 %v1343_v39, %v1342_v38  ;;  %v5026_v52 = vld [vmem:[%s5326_s28 + $0x30] sm:$0xff]   ;;  %v5027_v53 = vld [vmem:[%s5326_s28 + $0x20] sm:$0xff]   ;;  %v5028_v54 = vld [vmem:[%s5326_s28 + $0x38] sm:$0xff]   ;;  %vm3826_vm15 = vcmask 523264  }
 0x150   : > { %4674 = vmatprep.subr.bf16.mxu1 %v5151_v34  ;;  %4676 = vmatprep.mubr.msk.bf16.mxu1 %vm5152_vm9, %v5151_v34  ;;  %v5029_v55 = vld [vmem:[%s5326_s28 + $0x28] sm:$0xff]   ;;  %v5030_v56 = vld [vmem:[%s5326_s28 + $0x50] sm:$0xff]   ;;  %v5031_v57 = vld [vmem:[%s5326_s28 + $0x40] sm:$0xff]  }
 0x151   : > { %v1340_v32 = vld [vmem:[#allocation2] sm:$0xff]  ;;  %4666 = vmatprep.subr.bf16.mxu0 %v5151_v34  ;;  %4668 = vmatprep.mubr.msk.bf16.mxu0 %vm5152_vm9, %v5151_v34  ;;  %v5032_v58 = vld [vmem:[%s5326_s28 + $0x58] sm:$0xff]   ;;  %v5033_v59 = vld [vmem:[%s5326_s28 + $0x48] sm:$0xff]   ;;  %s5998_s28 = scalar_lea.vmem %s5927_s17, %s5313_s8 }
 0x152   : > { %v1733_v23 = vsel %vm1393_vm8, %v1340_v32, 0.0  ;;  %v5035_v61 = vld [vmem:[%s5342_s2] sm:$0xff]   ;;  %v5037_v63 = vld [vmem:[%s5342_s2 + $0x8] sm:$0xff]  }
 0x153   : > { %v1341_v33 = vld [vmem:[#allocation2 + $0x8] sm:$0xff]  ;;  %1734 = vadd.xlane.f32.xlu0 %v1733_v23  ;;  %4675 = vmatpush3.bf16.msra.mxu1 %v5024_v37  ;;  %v4415_v14 = vld [vmem:[%s5332_s23 + $0x1] ss:$0 sm:$0xff]  ;;  %v4411_v16 = vld [vmem:[%s5332_s23] ss:$0 sm:$0xff] }
 0x154   : > { %v1736_v36 = vsel %vm1393_vm8, %v1341_v33, 0.0  ;;  %4667 = vmatpush3.bf16.msra.mxu0 %v5025_v40  ;;  %4688 = vmatprep.subr.bf16.mxu1 %v5151_v34  ;;  %v5034_v60 = vld [vmem:[%s5995_s15] sm:$0xff]   ;;  %v5036_v62 = vld [vmem:[%s5995_s15 + $0x8] sm:$0xff]  }
 0x155   : > { %4680 = vmatprep.subr.bf16.mxu0 %v5151_v34  ;;  %v5039_v23 = vld [vmem:[%s5352_s25 + $0x8] sm:$0xff]  }
 0x156   : > { %4677 = vmatmul.mubr.msk.bf16.vlgmr.msra.gmra.mrb[0].mxu1 %vm1393_vm8, %v5459_v41 }
 0x157   : > { %1737 = vadd.xlane.f32.xlu0 %v1736_v36  ;;  %4669 = vmatmul.mubr.msk.bf16.vlgmr.msra.gmra.mrb[0].mxu0 %vm1393_vm8, %v5459_v41 }
 0x158   : > { %4692 = vmatprep.mubr.msk.bf16.mxu1 %vm5152_vm9, %v5151_v34  ;;  %4684 = vmatprep.mubr.msk.bf16.mxu0 %vm5152_vm9, %v5151_v34 }
 0x159   : > { %4689 = vmatpush3.bf16.msra.mxu1 %v5026_v52  ;;  %4681 = vmatpush3.bf16.msra.mxu0 %v5027_v53 }
 0x15a   : > { %4690 = vmatprep.subr.bf16.mxu1 %v5151_v34  ;;  %4682 = vmatprep.subr.bf16.mxu0 %v5151_v34 }
 0x15d   : > { %4691 = vmatpush3.bf16.msra.mxu1 %v5028_v54  ;;  %4683 = vmatpush3.bf16.msra.mxu0 %v5029_v55 }
 0x15e   : > { %4704 = vmatprep.subr.bf16.mxu1 %v5151_v34  ;;  %4696 = vmatprep.subr.bf16.mxu0 %v5151_v34 }
 0x160   : > { %4693 = vmatmul.mubr.msk.bf16.vlgmr.msra.gmra.mrb[4].mxu1 %vm1393_vm8, %v5459_v41  ;;  %4685 = vmatmul.mubr.msk.bf16.vlgmr.msra.gmra.mrb[4].mxu0 %vm1393_vm8, %v5459_v41 }
 0x161   : > { %4705 = vmatpush3.bf16.msra.mxu1 %v5030_v56  ;;  %4708 = vmatprep.mubr.msk.bf16.mxu1 %vm5152_vm9, %v5151_v34 }
 0x162   : > { %4706 = vmatprep.subr.bf16.mxu1 %v5151_v34  ;;  %4697 = vmatpush3.bf16.msra.mxu0 %v5031_v57 }
 0x163   : > { %4700 = vmatprep.mubr.msk.bf16.mxu0 %vm5152_vm9, %v5151_v34  ;;  %4698 = vmatprep.subr.bf16.mxu0 %v5151_v34 }
 0x165   : > { %4707 = vmatpush3.bf16.msra.mxu1 %v5032_v58 }
 0x166   : > { %4720 = vmatprep.subr.bf16.mxu1 %v5151_v34  ;;  %4699 = vmatpush3.bf16.msra.mxu0 %v5033_v59 }
 0x167   : > { %4712 = vmatprep.subr.bf16.mxu0 %v5151_v34 }
 0x168   : > { %4709 = vmatmul.mubr.msk.bf16.vlgmr.msra.gmra.mrb[8].mxu1 %vm1393_vm8, %v5459_v41 }
 0x169   : > { %4724 = vmatprep.mubr.msk.bf16.mxu1 %vm5152_vm9, %v5151_v34  ;;  %4701 = vmatmul.mubr.msk.bf16.vlgmr.msra.gmra.mrb[8].mxu0 %vm1393_vm8, %v5459_v41 }
 0x16a   : > { %4713 = vmatpush3.bf16.msra.mxu0 %v5034_v60  ;;  %4721 = vmatpush3.bf16.msra.mxu1 %v5035_v61 }
 0x16b   : > { %4714 = vmatprep.subr.bf16.mxu0 %v5151_v34  ;;  %4722 = vmatprep.subr.bf16.mxu1 %v5151_v34 }
 0x16c   : > { %4716 = vmatprep.mubr.msk.bf16.mxu0 %vm5152_vm9, %v5151_v34 }
 0x16e   : > { %4715 = vmatpush3.bf16.msra.mxu0 %v5036_v62  ;;  %4723 = vmatpush3.bf16.msra.mxu1 %v5037_v63  ;;  %v4435_v63 = vld [vmem:[%s5337_s27] ss:$0 sm:$0xff] }
 0x16f   : > { %4728 = vmatprep.subr.bf16.mxu0 %v5151_v34  ;;  %4736 = vmatprep.subr.bf16.mxu1 %v5151_v34 }
 0x1e0   : > { %v1735_v42 = vpop.xlane.xlu0 %1734 }
 0x1e1   : > { %v1740_v43 = vmul.f32 0.03125, %v1735_v42 }
 0x1e3   : > { %v5471_v44 = vsub.f32 %v1340_v32, %v1740_v43  ;;  %v5038_v32 = vld [vmem:[%s5352_s25] sm:$0xff]  }
 0x1e4   : > { %v1738_v45 = vpop.xlane.xlu0 %1737 }
 0x1e5   : > { %v1741_v46 = vmul.f32 0.03125, %v1738_v45  ;;  %v1744_v47 = vmul.f32 %v5471_v44, %v5471_v44 }
 0x1e7   : > { %v5475_v48 = vsub.f32 %v1341_v33, %v1741_v46  ;;  %v1746_v49 = vsel %vm1393_vm8, %v1744_v47, 0.0 }
 0x1e8   : > { %1747 = vadd.xlane.f32.xlu1 %v1746_v49 }
 0x1e9   : > { %v1745_v50 = vmul.f32 %v5475_v48, %v5475_v48 }
 0x1eb   : > { %v1749_v51 = vsel %vm1393_vm8, %v1745_v50, 0.0 }
 0x1ec   : > { %1750 = vadd.xlane.f32.xlu1 %v1749_v51  ;;  %v4439_v51 = vld [vmem:[%s5347_s4] ss:$0 sm:$0xff] }
 0x229   : > { %v1490_v0 = vpop.f32.mrb[0].mxu1 }
 0x22a   : > { %v1431_v1 = vpop.f32.mrb[0].mxu0  ;;  %v4678_v2 = vpop.f32.mrb[1].mxu1  ;;  %v1491_v15 = vadd.f32 %v4415_v14, %v1490_v0 }
 0x22b   : > { %v4670_v3 = vpop.f32.mrb[1].mxu0  ;;  %v1493_v4 = vpop.f32.mrb[2].mxu1  ;;  %v1432_v21 = vadd.f32 %v4411_v16, %v1431_v1  ;;  %v4443_v2 = vld [vmem:[%s5357_s22] ss:$0 sm:$0xff] }
 0x22c   : > { %v1434_v5 = vpop.f32.mrb[2].mxu0  ;;  %v4679_v6 = vpop.f32.mrb[3].mxu1  ;;  %v1760_v17 = vadd.f32 1.0, %v1491_v15  ;;  %v1494_v20 = vadd.f32 %v4415_v14, %v1493_v4 }
 0x22d   : > { %v4671_v7 = vpop.f32.mrb[3].mxu0  ;;  %v1435_v29 = vadd.f32 %v4411_v16, %v1434_v5 }
 0x22e   : > { %v1761_v26 = vadd.f32 1.0, %v1494_v20 }
 0x233   : > { %v5543_v31 = vpop.f32.mrb[4].mxu1  ;;  %v5547_v38 = vpop.f32.mrb[4].mxu0 }
 0x234   : > { %v4694_v35 = vpop.f32.mrb[5].mxu1  ;;  %v4686_v39 = vpop.f32.mrb[5].mxu0 }
 0x235   : > { %v5545_v36 = vpop.f32.mrb[6].mxu1  ;;  %v5549_v40 = vpop.f32.mrb[6].mxu0 }
 0x236   : > { %v4695_v37 = vpop.f32.mrb[7].mxu1  ;;  %v4687_v42 = vpop.f32.mrb[7].mxu0 }
 0x23b   : > { %v5551_v43 = vpop.f32.mrb[8].mxu1 }
 0x23c   : > { %v5555_v47 = vpop.f32.mrb[8].mxu0 }
 0x275   : > { %v1748_v8 = vpop.xlane.xlu1 %1747 }
 0x276   : > { %v1752_v9 = vmul.f32 0.03125, %v1748_v8 }
 0x278   : > { %v1754_v10 = vadd.f32 1e-06, %v1752_v9 }
 0x279   : > { %v1751_v11 = vpop.xlane.xlu1 %1750 }
 0x27a   : > { %5064 = vrsqrt.f32 %v1754_v10  ;;  %v1753_v12 = vmul.f32 0.03125, %v1751_v11 }
 0x27c   : > { %v1755_v13 = vadd.f32 1e-06, %v1753_v12 }
 0x27e   : > { %5066 = vrsqrt.f32 %v1755_v13 }
 0x284   : > { %v5065_v18 = vpop.eup %5064 }
 0x285   : > { %v1758_v19 = vmul.f32 %v5065_v18, %v5471_v44  ;;  %v4710_v44 = vpop.f32.mrb[9].mxu1  ;;  %v1767_v18 = vlaneseq }
 0x286   : > { %v5553_v45 = vpop.f32.mrb[10].mxu1 }
 0x287   : > { %v1762_v22 = vmul.f32 %v1760_v17, %v1758_v19  ;;  %v4711_v46 = vpop.f32.mrb[11].mxu1  ;;  %v1768_v19 = vshrl.u32 %v1767_v18, 7  ;;  %v1770_v20 = vand.u32 127, %v1767_v18 }
 0x288   : > { %v5067_v24 = vpop.eup %5066 }
 0x289   : > { %v1759_v25 = vmul.f32 %v5067_v24, %v5475_v48  ;;  %v1764_v27 = vadd.f32 %v1762_v22, %v1432_v21  ;;  %v4702_v48 = vpop.f32.mrb[9].mxu0  ;;  %vm5576_vm12 = vcmp.ge.s32.totalorder %v1768_v19, %v1770_v20 }
 0x28a   : > { %v5557_v49 = vpop.f32.mrb[10].mxu0 }
 0x28b   : > { %v1763_v28 = vmul.f32 %v1761_v26, %v1759_v25  ;;  %v4703_v50 = vpop.f32.mrb[11].mxu0 }
 0x28d   : > { %v1765_v30 = vadd.f32 %v1763_v28, %v1435_v29 }
 0x28f   : > { %v5526_v33 = vpack.c.bf16 %v1765_v30, %v1764_v27 }
 0x291   : > { %4717 = vmatmul.mubr.msk.bf16.vlgmr.msra.gmra.mrb[12].mxu0 %vm1393_vm8, %v5526_v33  ;;  %4725 = vmatmul.mubr.msk.bf16.vlgmr.msra.gmra.mrb[12].mxu1 %vm1393_vm8, %v5526_v33 }
 0x292   : > { %4729 = vmatpush3.bf16.msra.mxu0 %v5038_v32  ;;  %4732 = vmatprep.mubr.msk.bf16.mxu0 %vm5152_vm9, %v5151_v34 }
 0x293   : > { %4730 = vmatprep.subr.bf16.mxu0 %v5151_v34  ;;  %4738 = vmatprep.mubr.msk.bf16.mxu1 %vm5152_vm9, %v5151_v34 }
 0x296   : > { %4731 = vmatpush3.bf16.msra.mxu0 %v5039_v23 }
 0x297   : > { %4742 = vmatprep.subr.bf16.mxu0 %v5151_v34 }
 0x299   : > { %4733 = vmatmul.mubr.msk.bf16.vlgmr.msra.gmra.mrb[16].mxu0 %vm1393_vm8, %v5526_v33 }
 0x29a   : > { %4744 = vmatprep.mubr.msk.bf16.mxu0 %vm5152_vm9, %v5151_v34 }
 0x364   : > { %v1891_v52 = vpop.f32.mrb[12].mxu0  ;;  %v1950_v53 = vpop.f32.mrb[12].mxu1 }
 0x365   : > { %v1951_v54 = vadd.f32 %v4439_v51, %v1950_v53  ;;  %v4718_v55 = vpop.f32.mrb[13].mxu0  ;;  %v4726_v56 = vpop.f32.mrb[13].mxu1  ;;  %v1892_v3 = vadd.f32 %v4435_v63, %v1891_v52 }
 0x366   : > { %v1894_v57 = vpop.f32.mrb[14].mxu0  ;;  %v1953_v58 = vpop.f32.mrb[14].mxu1 }
 0x367   : > { %v2018_v59 = vpack.c.bf16 %v1951_v54, %v1951_v54  ;;  %v1954_v60 = vadd.f32 %v4439_v51, %v1953_v58  ;;  %v4719_v61 = vpop.f32.mrb[15].mxu0  ;;  %v4727_v62 = vpop.f32.mrb[15].mxu1  ;;  %v1895_v6 = vadd.f32 %v4435_v63, %v1894_v57  ;;  %v2016_v10 = vpack.c.bf16 %v1892_v3, %v1892_v3  ;;  %v5042_v3 = vld [vmem:[%s5995_s15 + $0x18] sm:$0xff]  }
 0x368   : > { %v5040_v62 = vld [vmem:[%s5995_s15 + $0x10] sm:$0xff]  }
 0x369   : > { %v2025_v0 = vsel %vm2020_vm10, %v2018_v59, 0  ;;  %v2019_v1 = vpack.c.bf16 %v1954_v60, %v1954_v60  ;;  %v2017_v14 = vpack.c.bf16 %v1895_v6, %v1895_v6  ;;  %v5045_v6 = vld [vmem:[%s5352_s25 + $0x18] sm:$0xff]  }
 0x36a   : > { %4737 = vmatpush3.bf16.xpose.msra.mxu1 %v2025_v0 }
 0x36b   : > { %v2071_v4 = vsel %vm2020_vm10, %v2019_v1, 0  ;;  %4748 = vmatprep.subr.bf16.mxu1 %v5151_v34  ;;  %v5041_v1 = vld [vmem:[%s5342_s2 + $0x10] sm:$0xff]  }
 0x36c   : > { %v2009_v5 = vpop.f32.mrb[16].mxu0  ;;  %4743 = vmatpush3.bf16.xpose.msra.mxu0 %v2071_v4  ;;  %v5043_v4 = vld [vmem:[%s5342_s2 + $0x18] sm:$0xff]  }
 0x36d   : > { %v2010_v7 = vadd.f32 %v4443_v2, %v2009_v5  ;;  %v4734_v8 = vpop.f32.mrb[17].mxu0  ;;  %4754 = vmatprep.subr.bf16.mxu0 %v5151_v34  ;;  %v5044_v5 = vld [vmem:[%s5352_s25 + $0x10] sm:$0xff]  }
 0x36e   : > { %v2012_v9 = vpop.f32.mrb[18].mxu0 }
 0x36f   : > { %v2143_v11 = vpack.c.bf16 %v2010_v7, %v2010_v7  ;;  %v2013_v12 = vadd.f32 %v4443_v2, %v2012_v9  ;;  %v4735_v13 = vpop.f32.mrb[19].mxu0 }
 0x371   : > { %v2150_v15 = vsel %vm2148_vm11, %v2143_v11, 0  ;;  %v2144_v16 = vpack.c.bf16 %v2013_v12, %v2013_v12  ;;  %4739 = vmatmul.mubr.msk.bf16.vlgmr.msra.gmra.mrb[16].mxu1 %vm2020_vm10, %v2016_v10 }
 0x372   : > { %4749 = vmatpush3.bf16.msra.mxu1 %v2150_v15  ;;  %4750 = vmatprep.mubr.msk.bf16.mxu1 %vm5152_vm9, %v5151_v34 }
 0x373   : > { %v2196_v17 = vsel %vm2148_vm11, %v2144_v16, 0  ;;  %4745 = vmatmul.mubr.msk.bf16.vlgmr.msra.gmra.mrb[20].mxu0 %vm2020_vm10, %v2017_v14  ;;  %4760 = vmatprep.subr.bf16.mxu1 %v5151_v34 }
 0x374   : > { %4755 = vmatpush3.bf16.msra.mxu0 %v2196_v17  ;;  %4756 = vmatprep.mubr.msk.bf16.mxu0 %vm5152_vm9, %v5151_v34  ;;  %v4455_v17 = vld [vmem:[%s5347_s4 + $0x1] ss:$0 sm:$0xff] }
 0x375   : > { %4768 = vmatprep.subr.bf16.mxu0 %v5151_v34 }
 0x444   : > { %v2061_v21 = vpop.f32.mrb[16].mxu1 }
 0x445   : > { %v2113_v24 = vmul.f32 0.35355338, %v2061_v21  ;;  %v4740_v25 = vpop.f32.mrb[17].mxu1 }
 0x446   : > { %v2064_v26 = vpop.f32.mrb[18].mxu1  ;;  %v2107_v27 = vpop.f32.mrb[20].mxu0 }
 0x447   : > { %v2114_v28 = vmul.f32 0.35355338, %v2107_v27  ;;  %v4741_v29 = vpop.f32.mrb[19].mxu1  ;;  %v4746_v30 = vpop.f32.mrb[21].mxu0  ;;  %v2117_v32 = vsel %vm5576_vm12, %v2113_v24, -1e+30 }
 0x448   : > { %v2110_v23 = vpop.f32.mrb[22].mxu0  ;;  %v2119_v35 = vsel %vm2020_vm10, %v2117_v32, -inf  ;;  %v4451_v30 = vld [vmem:[%s5337_s27 + $0x1] ss:$0 sm:$0xff] }
 0x449   : > { %2120 = vmax.xlane.f32.xlu1 %v2119_v35  ;;  %v4747_v37 = vpop.f32.mrb[23].mxu0  ;;  %v2118_v39 = vsel %vm5576_vm12, %v2114_v28, -1e+30 }
 0x44a   : > { %v2122_v42 = vsel %vm2020_vm10, %v2118_v39, -inf }
 0x44b   : > { %2123 = vmax.xlane.f32.xlu0 %v2122_v42 }
 0x4d6   : > { %v2121_v44 = vpop.xlane.xlu1 %2120 }
 0x4d7   : > { %v2125_v46 = vsub.f32 %v2117_v32, %v2121_v44  ;;  %v4459_v32 = vld [vmem:[%s5357_s22 + $0x1] ss:$0 sm:$0xff] }
 0x4d8   : > { %v2124_v48 = vpop.xlane.xlu0 %2123 }
 0x4d9   : > { %v2127_v50 = vmul.f32 1.442695, %v2125_v46  ;;  %v2126_v51 = vsub.f32 %v2118_v39, %v2124_v48 }
 0x4db   : > { %5068 = vpow2.f32 %v2127_v50  ;;  %v2129_v52 = vmul.f32 1.442695, %v2126_v51 }
 0x4dd   : > { %5070 = vpow2.f32 %v2129_v52 }
 0x4e5   : > { %v5069_v53 = vpop.eup %5068 }
 0x4e6   : > { %v2131_v54 = vsel %vm2020_vm10, %v5069_v53, 0.0 }
 0x4e7   : > { %v5071_v55 = vpop.eup %5070  ;;  %2132 = vadd.xlane.f32.xlu1 %v2131_v54 }
 0x4e8   : > { %v2134_v56 = vsel %vm2020_vm10, %v5071_v55, 0.0 }
 0x4e9   : > { %2135 = vadd.xlane.f32.xlu0 %v2134_v56 }
 0x574   : > { %v2133_v57 = vpop.xlane.xlu1 %2132 }
 0x575   : > { %5072 = vrcp.f32 %v2133_v57 }
 0x576   : > { %v2136_v58 = vpop.xlane.xlu0 %2135 }
 0x577   : > { %5074 = vrcp.f32 %v2136_v58 }
 0x57f   : > { %v5073_v59 = vpop.eup %5072 }
 0x580   : > { %v2139_v60 = vmul.f32 %v5073_v59, %v5069_v53 }
 0x581   : > { %v5075_v61 = vpop.eup %5074 }
 0x582   : > { %v2140_v63 = vmul.f32 %v5075_v61, %v5071_v55  ;;  %v2141_v0 = vpack.c.bf16 %v2139_v60, %v2139_v60 }
 0x584   : > { %4751 = vmatmul.mubr.msk.bf16.vlgmr.msra.gmra.mrb[20].mxu1 %vm2020_vm10, %v2141_v0  ;;  %v2142_v2 = vpack.c.bf16 %v2140_v63, %v2140_v63 }
 0x585   : > { %4761 = vmatpush3.bf16.msra.mxu1 %v5040_v62  ;;  %4764 = vmatprep.mubr.msk.bf16.mxu1 %vm5152_vm9, %v5151_v34 }
 0x586   : > { %4757 = vmatmul.mubr.msk.bf16.vlgmr.msra.gmra.mrb[24].mxu0 %vm2020_vm10, %v2142_v2  ;;  %4762 = vmatprep.subr.bf16.mxu1 %v5151_v34 }
 0x587   : > { %4769 = vmatpush3.bf16.msra.mxu0 %v5041_v1  ;;  %4772 = vmatprep.mubr.msk.bf16.mxu0 %vm5152_vm9, %v5151_v34 }
 0x588   : > { %4770 = vmatprep.subr.bf16.mxu0 %v5151_v34 }
 0x589   : > { %4763 = vmatpush3.bf16.msra.mxu1 %v5042_v3 }
 0x58a   : > { %4776 = vmatprep.subr.bf16.mxu1 %v5151_v34 }
 0x58b   : > { %4771 = vmatpush3.bf16.msra.mxu0 %v5043_v4 }
 0x58c   : > { %4765 = vmatmul.mubr.msk.bf16.vlgmr.msra.gmra.mrb[24].mxu1 %vm1393_vm8, %v5526_v33  ;;  %4784 = vmatprep.subr.bf16.mxu0 %v5151_v34 }
 0x58d   : > { %4777 = vmatpush3.bf16.msra.mxu1 %v5044_v5  ;;  %4780 = vmatprep.mubr.msk.bf16.mxu1 %vm5152_vm9, %v5151_v34 }
 0x58e   : > { %4773 = vmatmul.mubr.msk.bf16.vlgmr.msra.gmra.mrb[28].mxu0 %vm1393_vm8, %v5526_v33  ;;  %4778 = vmatprep.subr.bf16.mxu1 %v5151_v34 }
 0x58f   : > { %4786 = vmatprep.mubr.msk.bf16.mxu0 %vm5152_vm9, %v5151_v34 }
 0x591   : > { %4779 = vmatpush3.bf16.msra.mxu1 %v5045_v6 }
 0x592   : > { %4790 = vmatprep.subr.bf16.mxu1 %v5151_v34 }
 0x594   : > { %4781 = vmatmul.mubr.msk.bf16.vlgmr.msra.gmra.mrb[28].mxu1 %vm1393_vm8, %v5526_v33 }
 0x595   : > { %4792 = vmatprep.mubr.msk.bf16.mxu1 %vm5152_vm9, %v5151_v34 }
 0x657   : > { %v5618_v7 = vpop.f32.mrb[20].mxu1 }
 0x658   : > { %v4752_v8 = vpop.f32.mrb[21].mxu1 }
 0x659   : > { %v2189_v9 = vpop.f32.mrb[22].mxu1  ;;  %v5620_v10 = vpop.f32.mrb[24].mxu0 }
 0x65a   : > { %v2238_v11 = vpack.c.bf16 %v5620_v10, %v5618_v7  ;;  %v4753_v12 = vpop.f32.mrb[23].mxu1  ;;  %v4758_v13 = vpop.f32.mrb[25].mxu0 }
 0x65b   : > { %v2235_v14 = vpop.f32.mrb[26].mxu0 }
 0x65c   : > { %v4759_v15 = vpop.f32.mrb[27].mxu0 }
 0x65f   : > { %v2291_v16 = vpop.f32.mrb[24].mxu1 }
 0x660   : > { %v4766_v18 = vpop.f32.mrb[25].mxu1  ;;  %v2292_v39 = vadd.f32 %v4451_v30, %v2291_v16 }
 0x661   : > { %v2294_v19 = vpop.f32.mrb[26].mxu1  ;;  %v2350_v20 = vpop.f32.mrb[28].mxu0 }
 0x662   : > { %v2351_v21 = vadd.f32 %v4455_v17, %v2350_v20  ;;  %v4767_v24 = vpop.f32.mrb[27].mxu1  ;;  %v4774_v25 = vpop.f32.mrb[29].mxu0  ;;  %v2295_v50 = vadd.f32 %v4451_v30, %v2294_v19  ;;  %v2416_v54 = vpack.c.bf16 %v2292_v39, %v2292_v39  ;;  %v1820_v30 = vld [vmem:[%s5367_s10] sm:$0xf] }
 0x663   : > { %v2353_v26 = vpop.f32.mrb[30].mxu0  ;;  %v2686_v39 = vsel %vm2148_vm11, %v1820_v30, 0 }
 0x664   : > { %v2418_v27 = vpack.c.bf16 %v2351_v21, %v2351_v21  ;;  %v2354_v28 = vadd.f32 %v4455_v17, %v2353_v26  ;;  %v4775_v29 = vpop.f32.mrb[31].mxu0  ;;  %v2417_v56 = vpack.c.bf16 %v2295_v50, %v2295_v50 }
 0x666   : > { %v2424_v23 = vsel %vm2020_vm10, %v2418_v27, 0  ;;  %v2419_v35 = vpack.c.bf16 %v2354_v28, %v2354_v28  ;;  %v1821_v27 = vld [vmem:[%s5367_s10 + $0x4] sm:$0xf] }
 0x667   : > { %v2409_v37 = vpop.f32.mrb[28].mxu1  ;;  %4785 = vmatpush3.bf16.xpose.msra.mxu0 %v2424_v23 }
 0x668   : > { %v2470_v42 = vsel %vm2020_vm10, %v2419_v35, 0  ;;  %v2410_v44 = vadd.f32 %v4459_v32, %v2409_v37  ;;  %v4782_v46 = vpop.f32.mrb[29].mxu1  ;;  %4796 = vmatprep.subr.bf16.mxu0 %v5151_v34  ;;  %v2639_v35 = vsel %vm2148_vm11, %v1821_v27, 0 }
 0x669   : > { %v2412_v48 = vpop.f32.mrb[30].mxu1  ;;  %4791 = vmatpush3.bf16.xpose.msra.mxu1 %v2470_v42  ;;  %v5046_v42 = vld [vmem:[%s5342_s2 + $0x20] sm:$0xff]  }
 0x66a   : > { %v2540_v51 = vpack.c.bf16 %v2410_v44, %v2410_v44  ;;  %v2413_v52 = vadd.f32 %v4459_v32, %v2412_v48  ;;  %v4783_v53 = vpop.f32.mrb[31].mxu1  ;;  %4802 = vmatprep.subr.bf16.mxu1 %v5151_v34  ;;  %v5047_v44 = vld [vmem:[%s5342_s2 + $0x28] sm:$0xff]   ;;  %v5048_v48 = vld [vmem:[%s5995_s15 + $0x20] sm:$0xff]  }
 0x66c   : > { %v2541_v55 = vpack.c.bf16 %v2413_v52, %v2413_v52  ;;  %v2546_v57 = vsel %vm2148_vm11, %v2540_v51, 0 }
 0x66e   : > { %4787 = vmatmul.mubr.msk.bf16.vlgmr.msra.gmra.mrb[32].mxu0 %vm2020_vm10, %v2416_v54  ;;  %v2592_v58 = vsel %vm2148_vm11, %v2541_v55, 0  ;;  %v5049_v55 = vld [vmem:[%s5995_s15 + $0x28] sm:$0xff]  }
 0x66f   : > { %4797 = vmatpush3.bf16.msra.mxu0 %v2546_v57  ;;  %4798 = vmatprep.mubr.msk.bf16.mxu0 %vm5152_vm9, %v5151_v34  ;;  %v5050_v57 = vld [vmem:[%s5352_s25 + $0x20] sm:$0xff]  }
 0x670   : > { %4793 = vmatmul.mubr.msk.bf16.vlgmr.msra.gmra.mrb[32].mxu1 %vm2020_vm10, %v2417_v56  ;;  %4808 = vmatprep.subr.bf16.mxu0 %v5151_v34 }
 0x671   : > { %4803 = vmatpush3.bf16.msra.mxu1 %v2592_v58  ;;  %4804 = vmatprep.mubr.msk.bf16.mxu1 %vm5152_vm9, %v5151_v34 }
 0x672   : > { %4814 = vmatprep.subr.bf16.mxu1 %v5151_v34 }
 0x741   : > { %v2460_v59 = vpop.f32.mrb[32].mxu0 }
 0x742   : > { %v2512_v60 = vmul.f32 0.35355338, %v2460_v59  ;;  %v4788_v61 = vpop.f32.mrb[33].mxu0 }
 0x743   : > { %v2463_v62 = vpop.f32.mrb[34].mxu0  ;;  %v2506_v63 = vpop.f32.mrb[32].mxu1  ;;  %v5051_v61 = vld [vmem:[%s5352_s25 + $0x28] sm:$0xff]  }
 0x744   : > { %v2513_v0 = vmul.f32 0.35355338, %v2506_v63  ;;  %v4789_v1 = vpop.f32.mrb[35].mxu0  ;;  %v4794_v2 = vpop.f32.mrb[33].mxu1  ;;  %v2514_v3 = vsel %vm5576_vm12, %v2512_v60, -1e+30 }
 0x745   : > { %v2509_v4 = vpop.f32.mrb[34].mxu1  ;;  %v2516_v5 = vsel %vm2020_vm10, %v2514_v3, -inf  ;;  %v4473_v62 = vld [vmem:[%s5347_s4 + $0x2] ss:$0 sm:$0xff] }
 0x746   : > { %v4795_v6 = vpop.f32.mrb[35].mxu1  ;;  %2517 = vmax.xlane.f32.xlu0 %v2516_v5  ;;  %v2515_v8 = vsel %vm5576_vm12, %v2513_v0, -1e+30 }
 0x747   : > { %v2519_v9 = vsel %vm2020_vm10, %v2515_v8, -inf }
 0x748   : > { %2520 = vmax.xlane.f32.xlu1 %v2519_v9 }
 0x7d3   : > { %v2518_v12 = vpop.xlane.xlu0 %2517 }
 0x7d4   : > { %v2522_v13 = vsub.f32 %v2514_v3, %v2518_v12 }
 0x7d5   : > { %v2521_v14 = vpop.xlane.xlu1 %2520 }
 0x7d6   : > { %v2524_v15 = vmul.f32 1.442695, %v2522_v13  ;;  %v2523_v16 = vsub.f32 %v2515_v8, %v2521_v14 }
 0x7d8   : > { %5076 = vpow2.f32 %v2524_v15  ;;  %v2526_v17 = vmul.f32 1.442695, %v2523_v16 }
 0x7da   : > { %5078 = vpow2.f32 %v2526_v17 }
 0x7e2   : > { %v5077_v18 = vpop.eup %5076 }
 0x7e3   : > { %v2528_v19 = vsel %vm2020_vm10, %v5077_v18, 0.0 }
 0x7e4   : > { %v5079_v20 = vpop.eup %5078  ;;  %2529 = vadd.xlane.f32.xlu0 %v2528_v19 }
 0x7e5   : > { %v2531_v21 = vsel %vm2020_vm10, %v5079_v20, 0.0 }
 0x7e6   : > { %2532 = vadd.xlane.f32.xlu1 %v2531_v21 }
 0x871   : > { %v2530_v24 = vpop.xlane.xlu0 %2529 }
 0x872   : > { %5080 = vrcp.f32 %v2530_v24 }
 0x873   : > { %v2533_v25 = vpop.xlane.xlu1 %2532 }
 0x874   : > { %5082 = vrcp.f32 %v2533_v25 }
 0x87c   : > { %v5081_v26 = vpop.eup %5080 }
 0x87d   : > { %v2536_v28 = vmul.f32 %v5081_v26, %v5077_v18  ;;  %v4469_v18 = vld [vmem:[%s5337_s27 + $0x2] ss:$0 sm:$0xff] }
 0x87e   : > { %v5083_v29 = vpop.eup %5082 }
 0x87f   : > { %v2537_v32 = vmul.f32 %v5083_v29, %v5079_v20  ;;  %v2538_v23 = vpack.c.bf16 %v2536_v28, %v2536_v28  ;;  %v4477_v29 = vld [vmem:[%s5357_s22 + $0x2] ss:$0 sm:$0xff] }
 0x881   : > { %4799 = vmatmul.mubr.msk.bf16.vlgmr.msra.gmra.mrb[36].mxu0 %vm2020_vm10, %v2538_v23  ;;  %v2539_v37 = vpack.c.bf16 %v2537_v32, %v2537_v32 }
 0x882   : > { %4809 = vmatpush3.bf16.msra.mxu0 %v2639_v35  ;;  %4810 = vmatprep.mubr.msk.bf16.mxu0 %vm5152_vm9, %v5151_v34 }
 0x883   : > { %4805 = vmatmul.mubr.msk.bf16.vlgmr.msra.gmra.mrb[36].mxu1 %vm2020_vm10, %v2539_v37  ;;  %4820 = vmatprep.subr.bf16.mxu0 %v5151_v34 }
 0x884   : > { %4815 = vmatpush3.bf16.msra.mxu1 %v2686_v39  ;;  %4816 = vmatprep.mubr.msk.bf16.mxu1 %vm5152_vm9, %v5151_v34 }
 0x885   : > { %4828 = vmatprep.subr.bf16.mxu1 %v5151_v34 }
 0x88b   : > { %4817 = vmatmul.mubr.msk.bf16.vlgmr.msra.gmra.mrb[40].mxu1 %vm2020_vm10, %v2238_v11 }
 0x88c   : > { %4829 = vmatpush3.bf16.msra.mxu1 %v5046_v42  ;;  %4832 = vmatprep.mubr.msk.bf16.mxu1 %vm5152_vm9, %v5151_v34 }
 0x88d   : > { %4830 = vmatprep.subr.bf16.mxu1 %v5151_v34 }
 0x890   : > { %4831 = vmatpush3.bf16.msra.mxu1 %v5047_v44 }
 0x891   : > { %4844 = vmatprep.subr.bf16.mxu1 %v5151_v34 }
 0x893   : > { %4833 = vmatmul.mubr.msk.bf16.vlgmr.msra.gmra.mrb[44].mxu1 %vm1393_vm8, %v5526_v33 }
 0x894   : > { %4846 = vmatprep.mubr.msk.bf16.mxu1 %vm5152_vm9, %v5151_v34 }
 0x954   : > { %v2582_v7 = vpop.f32.mrb[36].mxu0 }
 0x955   : > { %v4800_v10 = vpop.f32.mrb[37].mxu0 }
 0x956   : > { %v2585_v11 = vpop.f32.mrb[38].mxu0  ;;  %v2628_v46 = vpop.f32.mrb[36].mxu1 }
 0x957   : > { %v2634_v50 = vpack.c.bf16 %v2628_v46, %v2582_v7  ;;  %v4801_v51 = vpop.f32.mrb[39].mxu0  ;;  %v4806_v52 = vpop.f32.mrb[37].mxu1 }
 0x958   : > { %v2631_v53 = vpop.f32.mrb[38].mxu1 }
 0x959   : > { %v4807_v54 = vpop.f32.mrb[39].mxu1  ;;  %4811 = vmatmul.mubr.msk.bf16.vlgmr.msra.gmra.mrb[40].mxu0 %vm2020_vm10, %v2634_v50 }
 0x95a   : > { %4821 = vmatpush3.bf16.msra.mxu0 %v5048_v48  ;;  %4824 = vmatprep.mubr.msk.bf16.mxu0 %vm5152_vm9, %v5151_v34 }
 0x95b   : > { %4822 = vmatprep.subr.bf16.mxu0 %v5151_v34 }
 0x95e   : > { %4823 = vmatpush3.bf16.msra.mxu0 %v5049_v55  ;;  %v2722_v56 = vpop.f32.mrb[40].mxu1 }
 0x95f   : > { %v4818_v58 = vpop.f32.mrb[41].mxu1  ;;  %4836 = vmatprep.subr.bf16.mxu0 %v5151_v34 }
 0x960   : > { %v2725_v59 = vpop.f32.mrb[42].mxu1 }
 0x961   : > { %v4819_v60 = vpop.f32.mrb[43].mxu1  ;;  %4825 = vmatmul.mubr.msk.bf16.vlgmr.msra.gmra.mrb[44].mxu0 %vm1393_vm8, %v5526_v33 }
 0x962   : > { %4837 = vmatpush3.bf16.msra.mxu0 %v5050_v57  ;;  %4840 = vmatprep.mubr.msk.bf16.mxu0 %vm5152_vm9, %v5151_v34 }
 0x963   : > { %4838 = vmatprep.subr.bf16.mxu0 %v5151_v34 }
 0x966   : > { %4839 = vmatpush3.bf16.msra.mxu0 %v5051_v61  ;;  %v2840_v63 = vpop.f32.mrb[44].mxu1 }
 0x967   : > { %v2841_v0 = vadd.f32 %v4473_v62, %v2840_v63  ;;  %v4834_v1 = vpop.f32.mrb[45].mxu1  ;;  %4850 = vmatprep.subr.bf16.mxu0 %v5151_v34 }
 0x968   : > { %v2843_v2 = vpop.f32.mrb[46].mxu1 }
 0x969   : > { %v2908_v3 = vpack.c.bf16 %v2841_v0, %v2841_v0  ;;  %v2844_v4 = vadd.f32 %v4473_v62, %v2843_v2  ;;  %v4835_v5 = vpop.f32.mrb[47].mxu1  ;;  %4841 = vmatmul.mubr.msk.bf16.vlgmr.msra.gmra.mrb[48].mxu0 %vm1393_vm8, %v5526_v33 }
 0x96a   : > { %4852 = vmatprep.mubr.msk.bf16.mxu0 %vm5152_vm9, %v5151_v34 }
 0x96b   : > { %v2914_v6 = vsel %vm2020_vm10, %v2908_v3, 0  ;;  %v2909_v8 = vpack.c.bf16 %v2844_v4, %v2844_v4 }
 0x96c   : > { %4845 = vmatpush3.bf16.xpose.msra.mxu1 %v2914_v6 }
 0x96d   : > { %v2960_v9 = vsel %vm2020_vm10, %v2909_v8, 0  ;;  %4856 = vmatprep.subr.bf16.mxu1 %v5151_v34 }
 0x96f   : > { %4851 = vmatpush3.bf16.xpose.msra.mxu0 %v2960_v9 }
 0x970   : > { %4862 = vmatprep.subr.bf16.mxu0 %v5151_v34 }
 0xa2c   : > { %v2675_v12 = vpop.f32.mrb[40].mxu0 }
 0xa2d   : > { %v5699_v13 = vadd.f32 %v2722_v56, %v2675_v12  ;;  %v4812_v14 = vpop.f32.mrb[41].mxu0 }
 0xa2e   : > { %v2678_v15 = vpop.f32.mrb[42].mxu0  ;;  %v1822_v14 = vld [vmem:[%s5367_s10 + $0x8] sm:$0xf] }
 0xa2f   : > { %v5701_v16 = vadd.f32 %v2725_v59, %v2678_v15  ;;  %v4813_v17 = vpop.f32.mrb[43].mxu0 }
 0xa34   : > { %v2781_v19 = vpop.f32.mrb[44].mxu0 }
 0xa35   : > { %v2782_v20 = vadd.f32 %v4469_v18, %v2781_v19  ;;  %v4826_v21 = vpop.f32.mrb[45].mxu0 }
 0xa36   : > { %v2784_v24 = vpop.f32.mrb[46].mxu0  ;;  %v5052_v21 = vld [vmem:[%s5995_s15 + $0x30] sm:$0xff]  }
 0xa37   : > { %v2906_v25 = vpack.c.bf16 %v2782_v20, %v2782_v20  ;;  %v2785_v26 = vadd.f32 %v4469_v18, %v2784_v24  ;;  %v4827_v27 = vpop.f32.mrb[47].mxu0  ;;  %v3129_v20 = vsel %vm2148_vm11, %v1822_v14, 0 }
 0xa38   : > { %v5055_v27 = vld [vmem:[%s5352_s25 + $0x38] sm:$0xff]  }
 0xa39   : > { %v2907_v28 = vpack.c.bf16 %v2785_v26, %v2785_v26  ;;  %4847 = vmatmul.mubr.msk.bf16.vlgmr.msra.gmra.mrb[48].mxu1 %vm2020_vm10, %v2906_v25  ;;  %v5053_v25 = vld [vmem:[%s5995_s15 + $0x38] sm:$0xff]   ;;  %v5054_v26 = vld [vmem:[%s5352_s25 + $0x30] sm:$0xff]   ;;  %s5999_s25 = scalar_lea.vmem %s5929_s19, %s5313_s8 }
 0xa3a   : > { %4858 = vmatprep.mubr.msk.bf16.mxu1 %vm5152_vm9, %v5151_v34 }
 0xa3b   : > { %4853 = vmatmul.mubr.msk.bf16.vlgmr.msra.gmra.mrb[52].mxu0 %vm2020_vm10, %v2907_v28 }
 0xa3c   : > { %v2899_v30 = vpop.f32.mrb[48].mxu0  ;;  %4864 = vmatprep.mubr.msk.bf16.mxu0 %vm5152_vm9, %v5151_v34 }
 0xa3d   : > { %v2900_v32 = vadd.f32 %v4477_v29, %v2899_v30  ;;  %v4842_v23 = vpop.f32.mrb[49].mxu0 }
 0xa3e   : > { %v2902_v35 = vpop.f32.mrb[50].mxu0  ;;  %v5056_v23 = vld [vmem:[%s5342_s2 + $0x30] sm:$0xff]  }
 0xa3f   : > { %v3030_v37 = vpack.c.bf16 %v2900_v32, %v2900_v32  ;;  %v2903_v39 = vadd.f32 %v4477_v29, %v2902_v35  ;;  %v4843_v42 = vpop.f32.mrb[51].mxu0 }
 0xa41   : > { %v3036_v44 = vsel %vm2148_vm11, %v3030_v37, 0  ;;  %v3031_v7 = vpack.c.bf16 %v2903_v39, %v2903_v39 }
 0xa42   : > { %4857 = vmatpush3.bf16.msra.mxu1 %v3036_v44 }
 0xa43   : > { %v3082_v10 = vsel %vm2148_vm11, %v3031_v7, 0  ;;  %4868 = vmatprep.subr.bf16.mxu1 %v5151_v34  ;;  %v5057_v7 = vld [vmem:[%s5342_s2 + $0x38] sm:$0xff]  }
 0xa44   : > { %4863 = vmatpush3.bf16.msra.mxu0 %v3082_v10 }
 0xa45   : > { %4874 = vmatprep.subr.bf16.mxu0 %v5151_v34 }
 0xb0c   : > { %v2950_v11 = vpop.f32.mrb[48].mxu1 }
 0xb0d   : > { %v3002_v46 = vmul.f32 0.35355338, %v2950_v11  ;;  %v4848_v48 = vpop.f32.mrb[49].mxu1 }
 0xb0e   : > { %v2953_v50 = vpop.f32.mrb[50].mxu1  ;;  %v2996_v51 = vpop.f32.mrb[52].mxu0 }
 0xb0f   : > { %v3003_v52 = vmul.f32 0.35355338, %v2996_v51  ;;  %v4849_v53 = vpop.f32.mrb[51].mxu1  ;;  %v4854_v54 = vpop.f32.mrb[53].mxu0  ;;  %v3004_v55 = vsel %vm5576_vm12, %v3002_v46, -1e+30 }
 0xb10   : > { %v2999_v56 = vpop.f32.mrb[54].mxu0  ;;  %v3006_v57 = vsel %vm2020_vm10, %v3004_v55, -inf }
 0xb11   : > { %3007 = vmax.xlane.f32.xlu0 %v3006_v57  ;;  %v4855_v58 = vpop.f32.mrb[55].mxu0  ;;  %v3005_v59 = vsel %vm5576_vm12, %v3003_v52, -1e+30 }
 0xb12   : > { %v3009_v60 = vsel %vm2020_vm10, %v3005_v59, -inf }
 0xb13   : > { %3010 = vmax.xlane.f32.xlu1 %v3009_v60 }
 0xb9e   : > { %v3008_v61 = vpop.xlane.xlu0 %3007 }
 0xb9f   : > { %v3012_v62 = vsub.f32 %v3004_v55, %v3008_v61 }
 0xba0   : > { %v3011_v63 = vpop.xlane.xlu1 %3010 }
 0xba1   : > { %v3014_v0 = vmul.f32 1.442695, %v3012_v62  ;;  %v3013_v1 = vsub.f32 %v3005_v59, %v3011_v63  ;;  %v4494_v63 = vld [vmem:[%s5357_s22 + $0x3] ss:$0 sm:$0xff] }
 0xba3   : > { %5084 = vpow2.f32 %v3014_v0  ;;  %v3016_v2 = vmul.f32 1.442695, %v3013_v1 }
 0xba5   : > { %5086 = vpow2.f32 %v3016_v2 }
 0xbad   : > { %v5085_v3 = vpop.eup %5084 }
 0xbae   : > { %v3018_v4 = vsel %vm2020_vm10, %v5085_v3, 0.0 }
 0xbaf   : > { %v5087_v5 = vpop.eup %5086  ;;  %3019 = vadd.xlane.f32.xlu0 %v3018_v4  ;;  %v4486_v4 = vld [vmem:[%s5337_s27 + $0x3] ss:$0 sm:$0xff] }
 0xbb0   : > { %v3021_v6 = vsel %vm2020_vm10, %v5087_v5, 0.0 }
 0xbb1   : > { %3022 = vadd.xlane.f32.xlu1 %v3021_v6 }
 0xc3c   : > { %v3020_v8 = vpop.xlane.xlu0 %3019 }
 0xc3d   : > { %5088 = vrcp.f32 %v3020_v8 }
 0xc3e   : > { %v3023_v9 = vpop.xlane.xlu1 %3022 }
 0xc3f   : > { %5090 = vrcp.f32 %v3023_v9 }
 0xc47   : > { %v5089_v12 = vpop.eup %5088 }
 0xc48   : > { %v3026_v15 = vmul.f32 %v5089_v12, %v5085_v3 }
 0xc49   : > { %v5091_v17 = vpop.eup %5090 }
 0xc4a   : > { %v3027_v18 = vmul.f32 %v5091_v17, %v5087_v5  ;;  %v3028_v19 = vpack.c.bf16 %v3026_v15, %v3026_v15 }
 0xc4c   : > { %4859 = vmatmul.mubr.msk.bf16.vlgmr.msra.gmra.mrb[52].mxu1 %vm2020_vm10, %v3028_v19  ;;  %v3029_v24 = vpack.c.bf16 %v3027_v18, %v3027_v18 }
 0xc4d   : > { %4869 = vmatpush3.bf16.msra.mxu1 %v3129_v20  ;;  %4870 = vmatprep.mubr.msk.bf16.mxu1 %vm5152_vm9, %v5151_v34 }
 0xc4e   : > { %4865 = vmatmul.mubr.msk.bf16.vlgmr.msra.gmra.mrb[56].mxu0 %vm2020_vm10, %v3029_v24  ;;  %4882 = vmatprep.subr.bf16.mxu1 %v5151_v34 }
 0xc4f   : > { %4875 = vmatpush3.bf16.msra.mxu0 %v5052_v21  ;;  %4878 = vmatprep.mubr.msk.bf16.mxu0 %vm5152_vm9, %v5151_v34 }
 0xc50   : > { %4876 = vmatprep.subr.bf16.mxu0 %v5151_v34 }
 0xc53   : > { %4877 = vmatpush3.bf16.msra.mxu0 %v5053_v25 }
 0xc54   : > { %4890 = vmatprep.subr.bf16.mxu0 %v5151_v34 }
 0xc56   : > { %4879 = vmatmul.mubr.msk.bf16.vlgmr.msra.gmra.mrb[60].mxu0 %vm1393_vm8, %v5526_v33 }
 0xc57   : > { %4891 = vmatpush3.bf16.msra.mxu0 %v5054_v26  ;;  %4894 = vmatprep.mubr.msk.bf16.mxu0 %vm5152_vm9, %v5151_v34 }
 0xc58   : > { %4892 = vmatprep.subr.bf16.mxu0 %v5151_v34 }
 0xc5b   : > { %4893 = vmatpush3.bf16.msra.mxu0 %v5055_v27 }
 0xc5c   : > { %4904 = vmatprep.subr.bf16.mxu0 %v5151_v34 }
 0xc5e   : > { %4895 = vmatmul.mubr.msk.bf16.vlgmr.msra.gmra.mrb[64].mxu0 %vm1393_vm8, %v5526_v33 }
 0xc5f   : > { %4906 = vmatprep.mubr.msk.bf16.mxu0 %vm5152_vm9, %v5151_v34 }
 0xd1f   : > { %v3072_v28 = vpop.f32.mrb[52].mxu1 }
 0xd20   : > { %v4860_v29 = vpop.f32.mrb[53].mxu1 }
 0xd21   : > { %v3075_v30 = vpop.f32.mrb[54].mxu1  ;;  %v3118_v32 = vpop.f32.mrb[56].mxu0 }
 0xd22   : > { %v3124_v35 = vpack.c.bf16 %v3118_v32, %v3072_v28  ;;  %v4861_v37 = vpop.f32.mrb[55].mxu1  ;;  %v4866_v39 = vpop.f32.mrb[57].mxu0 }
 0xd23   : > { %v3121_v42 = vpop.f32.mrb[58].mxu0 }
 0xd24   : > { %v4867_v44 = vpop.f32.mrb[59].mxu0  ;;  %4871 = vmatmul.mubr.msk.bf16.vlgmr.msra.gmra.mrb[56].mxu1 %vm2020_vm10, %v3124_v35 }
 0xd25   : > { %4883 = vmatpush3.bf16.msra.mxu1 %v5056_v23  ;;  %4886 = vmatprep.mubr.msk.bf16.mxu1 %vm5152_vm9, %v5151_v34 }
 0xd26   : > { %4884 = vmatprep.subr.bf16.mxu1 %v5151_v34 }
 0xd29   : > { %v3226_v10 = vpop.f32.mrb[60].mxu0  ;;  %4885 = vmatpush3.bf16.msra.mxu1 %v5057_v7 }
 0xd2a   : > { %v4880_v11 = vpop.f32.mrb[61].mxu0  ;;  %4898 = vmatprep.subr.bf16.mxu1 %v5151_v34  ;;  %v3227_v8 = vadd.f32 %v4486_v4, %v3226_v10 }
 0xd2b   : > { %v3229_v46 = vpop.f32.mrb[62].mxu0 }
 0xd2c   : > { %v4881_v48 = vpop.f32.mrb[63].mxu0  ;;  %4887 = vmatmul.mubr.msk.bf16.vlgmr.msra.gmra.mrb[60].mxu1 %vm1393_vm8, %v5526_v33  ;;  %v4490_v33 = vld [vmem:[%s5347_s4 + $0x3] ss:$0 sm:$0xff]  ;;  %v3230_v12 = vadd.f32 %v4486_v4, %v3229_v46  ;;  %v3351_v15 = vpack.c.bf16 %v3227_v8, %v3227_v8 }
 0xd2d   : > { %4900 = vmatprep.mubr.msk.bf16.mxu1 %vm5152_vm9, %v5151_v34 }
 0xd2e   : > { %v3352_v18 = vpack.c.bf16 %v3230_v12, %v3230_v12  ;;  %v4503_v12 = vld [vmem:[%s5998_s28] ss:$0 sm:$0xff] }
 0xd31   : > { %v3344_v50 = vpop.f32.mrb[64].mxu0 }
 0xd32   : > { %v4896_v51 = vpop.f32.mrb[65].mxu0  ;;  %v3345_v5 = vadd.f32 %v4494_v63, %v3344_v50 }
 0xd33   : > { %v3347_v52 = vpop.f32.mrb[66].mxu0 }
 0xd34   : > { %v4897_v53 = vpop.f32.mrb[67].mxu0  ;;  %v3348_v9 = vadd.f32 %v4494_v63, %v3347_v52  ;;  %v3475_v14 = vpack.c.bf16 %v3345_v5, %v3345_v5 }
 0xd36   : > { %v3476_v17 = vpack.c.bf16 %v3348_v9, %v3348_v9  ;;  %v3481_v19 = vsel %vm2148_vm11, %v3475_v14, 0  ;;  %v4419_v9 = vld [vmem:[%s5332_s23 + $0x2] ss:$0 sm:$0xff] }
 0xd38   : > { %v3527_v20 = vsel %vm2148_vm11, %v3476_v17, 0 }
 0xdf7   : > { %v3165_v54 = vpop.f32.mrb[56].mxu1 }
 0xdf8   : > { %v5760_v55 = vadd.f32 %v3165_v54, %v5699_v13  ;;  %v4872_v56 = vpop.f32.mrb[57].mxu1 }
 0xdf9   : > { %v3168_v57 = vpop.f32.mrb[58].mxu1 }
 0xdfa   : > { %v5763_v58 = vadd.f32 %v3168_v57, %v5701_v16  ;;  %v4873_v59 = vpop.f32.mrb[59].mxu1  ;;  %v1823_v57 = vld [vmem:[%s5367_s10 + $0xc] sm:$0xf] }
 0xdff   : > { %v3285_v60 = vpop.f32.mrb[60].mxu1 }
 0xe00   : > { %v3286_v61 = vadd.f32 %v4490_v33, %v3285_v60  ;;  %v4888_v62 = vpop.f32.mrb[61].mxu1 }
 0xe01   : > { %v3288_v0 = vpop.f32.mrb[62].mxu1  ;;  %v3574_v62 = vsel %vm2148_vm11, %v1823_v57, 0 }
 0xe02   : > { %v3353_v1 = vpack.c.bf16 %v3286_v61, %v3286_v61  ;;  %v3289_v2 = vadd.f32 %v4490_v33, %v3288_v0  ;;  %v4889_v3 = vpop.f32.mrb[63].mxu1 }
 0xe04   : > { %v3359_v13 = vsel %vm2020_vm10, %v3353_v1, 0  ;;  %v3354_v6 = vpack.c.bf16 %v3289_v2, %v3289_v2 }
 0xe05   : > { %4899 = vmatpush3.bf16.xpose.msra.mxu1 %v3359_v13 }
 0xe06   : > { %v3405_v16 = vsel %vm2020_vm10, %v3354_v6, 0  ;;  %4910 = vmatprep.subr.bf16.mxu1 %v5151_v34 }
 0xe07   : > { %4905 = vmatpush3.bf16.xpose.msra.mxu0 %v3405_v16 }
 0xe08   : > { %4916 = vmatprep.subr.bf16.mxu0 %v5151_v34 }
 0xe0c   : > { %4901 = vmatmul.mubr.msk.bf16.vlgmr.msra.gmra.mrb[64].mxu1 %vm2020_vm10, %v3351_v15 }
 0xe0d   : > { %4911 = vmatpush3.bf16.msra.mxu1 %v3481_v19  ;;  %4912 = vmatprep.mubr.msk.bf16.mxu1 %vm5152_vm9, %v5151_v34 }
 0xe0e   : > { %4907 = vmatmul.mubr.msk.bf16.vlgmr.msra.gmra.mrb[68].mxu0 %vm2020_vm10, %v3352_v18  ;;  %4922 = vmatprep.subr.bf16.mxu1 %v5151_v34  ;;  %v1550_v18 = vadd.f32 %v4419_v9, %v5547_v38 }
 0xe0f   : > { %4917 = vmatpush3.bf16.msra.mxu0 %v3527_v20  ;;  %4918 = vmatprep.mubr.msk.bf16.mxu0 %vm5152_vm9, %v5151_v34 }
 0xe10   : > { %4928 = vmatprep.subr.bf16.mxu0 %v5151_v34 }
 0xedf   : > { %v3395_v21 = vpop.f32.mrb[64].mxu1 }
 0xee0   : > { %v3447_v24 = vmul.f32 0.35355338, %v3395_v21  ;;  %v4902_v25 = vpop.f32.mrb[65].mxu1 }
 0xee1   : > { %v3398_v26 = vpop.f32.mrb[66].mxu1  ;;  %v3441_v27 = vpop.f32.mrb[68].mxu0 }
 0xee2   : > { %v3448_v28 = vmul.f32 0.35355338, %v3441_v27  ;;  %v4903_v29 = vpop.f32.mrb[67].mxu1  ;;  %v4908_v30 = vpop.f32.mrb[69].mxu0  ;;  %v3449_v32 = vsel %vm5576_vm12, %v3447_v24, -1e+30  ;;  %v1553_v24 = vadd.f32 %v4419_v9, %v5549_v40 }
 0xee3   : > { %v3444_v23 = vpop.f32.mrb[70].mxu0  ;;  %v3451_v35 = vsel %vm2020_vm10, %v3449_v32, -inf }
 0xee4   : > { %3452 = vmax.xlane.f32.xlu0 %v3451_v35  ;;  %v4909_v37 = vpop.f32.mrb[71].mxu0  ;;  %v3450_v39 = vsel %vm5576_vm12, %v3448_v28, -1e+30  ;;  %v5112_v28 = vld [vmem:[#allocation2] sm:$0xff] }
 0xee5   : > { %v3454_v42 = vsel %vm2020_vm10, %v3450_v39, -inf }
 0xee6   : > { %3455 = vmax.xlane.f32.xlu1 %v3454_v42 }
 0xf71   : > { %v3453_v44 = vpop.xlane.xlu0 %3452 }
 0xf72   : > { %v3457_v7 = vsub.f32 %v3449_v32, %v3453_v44 }
 0xf73   : > { %v3456_v10 = vpop.xlane.xlu1 %3455 }
 0xf74   : > { %v3459_v11 = vmul.f32 1.442695, %v3457_v7  ;;  %v3458_v46 = vsub.f32 %v3450_v39, %v3456_v10 }
 0xf76   : > { %5092 = vpow2.f32 %v3459_v11  ;;  %v3461_v48 = vmul.f32 1.442695, %v3458_v46  ;;  %v5058_v11 = vld [vmem:[%s5372_s29] sm:$0xff]   ;;  %v5059_v46 = vld [vmem:[%s5372_s29 + $0x8] sm:$0xff]   ;;  %s6000_s29 = scalar_lea.vmem %s5931_s21, %s5313_s8 }
 0xf78   : > { %5094 = vpow2.f32 %v3461_v48 }
 0xf80   : > { %v5093_v50 = vpop.eup %5092 }
 0xf81   : > { %v3463_v51 = vsel %vm2020_vm10, %v5093_v50, 0.0 }
 0xf82   : > { %v5095_v52 = vpop.eup %5094  ;;  %3464 = vadd.xlane.f32.xlu0 %v3463_v51 }
 0xf83   : > { %v3466_v22 = vsel %vm2020_vm10, %v5095_v52, 0.0 }
 0xf84   : > { %3467 = vadd.xlane.f32.xlu1 %v3466_v22 }
0x100f   : > { %v3465_v53 = vpop.xlane.xlu0 %3464 }
0x1010   : > { %5096 = vrcp.f32 %v3465_v53 }
0x1011   : > { %v3468_v54 = vpop.xlane.xlu1 %3467 }
0x1012   : > { %5098 = vrcp.f32 %v3468_v54  ;;  %v4427_v54 = vld [vmem:[%s5332_s23 + $0x4] ss:$0 sm:$0xff] }
0x1013   : > { %v1671_v57 = vadd.f32 %v4427_v54, %v5557_v49 }
0x101a   : > { %v5097_v56 = vpop.eup %5096 }
0x101b   : > { %v3471_v59 = vmul.f32 %v5097_v56, %v5093_v50  ;;  %v1668_v56 = vadd.f32 %v4427_v54, %v5555_v47 }
0x101c   : > { %v5099_v33 = vpop.eup %5098 }
0x101d   : > { %v3472_v60 = vmul.f32 %v5099_v33, %v5095_v52  ;;  %v3473_v61 = vpack.c.bf16 %v3471_v59, %v3471_v59  ;;  %v4423_v33 = vld [vmem:[%s5332_s23 + $0x3] ss:$0 sm:$0xff] }
0x101f   : > { %4913 = vmatmul.mubr.msk.bf16.vlgmr.msra.gmra.mrb[68].mxu1 %vm2020_vm10, %v3473_v61  ;;  %v3474_v63 = vpack.c.bf16 %v3472_v60, %v3472_v60  ;;  %v3658_v60 = vadd.f32 1.0, %v1668_v56 }
0x1020   : > { %4923 = vmatpush3.bf16.msra.mxu1 %v3574_v62  ;;  %4924 = vmatprep.mubr.msk.bf16.mxu1 %vm5152_vm9, %v5151_v34 }
0x1021   : > { %4919 = vmatmul.mubr.msk.bf16.vlgmr.msra.gmra.mrb[72].mxu0 %vm2020_vm10, %v3474_v63  ;;  %4936 = vmatprep.subr.bf16.mxu1 %v5151_v34  ;;  %v1609_v63 = vadd.f32 %v4423_v33, %v5543_v31  ;;  %v5062_v31 = vld [vmem:[%s5382_s0 + $0x10] sm:$0xff]  }
0x1022   : > { %4932 = vmatprep.mubr.msk.bf16.mxu0 %vm5152_vm9, %v5151_v34  ;;  %4929 = vmatpush3.bf16.msra.mxu0 %v5058_v11 }
0x1023   : > { %4930 = vmatprep.subr.bf16.mxu0 %v5151_v34 }
0x1026   : > { %4931 = vmatpush3.bf16.msra.mxu0 %v5059_v46 }
0x10f2   : > { %v3517_v0 = vpop.f32.mrb[68].mxu1 }
0x10f3   : > { %v4914_v1 = vpop.f32.mrb[69].mxu1 }
0x10f4   : > { %v3520_v2 = vpop.f32.mrb[70].mxu1  ;;  %v3563_v3 = vpop.f32.mrb[72].mxu0 }
0x10f5   : > { %v3569_v4 = vpack.c.bf16 %v3563_v3, %v3517_v0  ;;  %v4915_v5 = vpop.f32.mrb[71].mxu1  ;;  %v4920_v13 = vpop.f32.mrb[73].mxu0  ;;  %v3659_v0 = vadd.f32 1.0, %v1671_v57  ;;  %v1612_v3 = vadd.f32 %v4423_v33, %v5545_v36  ;;  %v5063_v36 = vld [vmem:[%s5382_s0 + $0x18] sm:$0xff]  }
0x10f6   : > { %v3566_v6 = vpop.f32.mrb[74].mxu0  ;;  %v5060_v13 = vld [vmem:[%s5382_s0] sm:$0xff]  }
0x10f7   : > { %v4921_v8 = vpop.f32.mrb[75].mxu0  ;;  %4925 = vmatmul.mubr.msk.bf16.vlgmr.msra.gmra.mrb[72].mxu1 %vm2020_vm10, %v3569_v4  ;;  %v5061_v6 = vld [vmem:[%s5382_s0 + $0x8] sm:$0xff]  }
0x10f8   : > { %4944 = vmatprep.mubr.msk.bf16.mxu1 %vm5152_vm9, %v5151_v34  ;;  %4937 = vmatpush3.bf16.msra.mxu1 %v5060_v13  ;;  %v4504_v8 = vld [vmem:[%s5999_s25] ss:$0 sm:$0xff] }
0x10f9   : > { %4938 = vmatprep.subr.bf16.mxu1 %v5151_v34 }
0x10fc   : > { %4939 = vmatpush3.bf16.msra.mxu1 %v5061_v6 }
0x10fd   : > { %4940 = vmatprep.subr.bf16.mxu1 %v5151_v34 }
0x1100   : > { %4941 = vmatpush3.bf16.msra.mxu1 %v5062_v31 }
0x1101   : > { %4942 = vmatprep.subr.bf16.mxu1 %v5151_v34 }
0x1104   : > { %4943 = vmatpush3.bf16.msra.mxu1 %v5063_v36 }
0x11ca   : > { %v3610_v16 = vpop.f32.mrb[72].mxu1 }
0x11cb   : > { %v3617_v14 = vadd.f32 %v3610_v16, %v5760_v55  ;;  %v4926_v15 = vpop.f32.mrb[73].mxu1  ;;  %v5113_v55 = vld [vmem:[#allocation2 + $0x8] sm:$0xff] }
0x11cc   : > { %v3613_v17 = vpop.f32.mrb[74].mxu1 }
0x11cd   : > { %v3626_v19 = vadd.f32 %v4503_v12, %v3617_v14  ;;  %v3618_v20 = vadd.f32 %v3613_v17, %v5763_v58  ;;  %v4927_v21 = vpop.f32.mrb[75].mxu1 }
0x11cf   : > { %v3628_v25 = vmul.f32 %v3626_v19, %v1550_v18  ;;  %v3627_v26 = vadd.f32 %v4503_v12, %v3618_v20 }
0x11d1   : > { %v3629_v27 = vmul.f32 %v3627_v26, %v1553_v24  ;;  %v5812_v29 = vadd.f32 %v5112_v28, %v3628_v25 }
0x11d3   : > { %v3632_v30 = vsel %vm1393_vm8, %v5812_v29, 0.0  ;;  %v5816_v32 = vadd.f32 %v5113_v55, %v3629_v27 }
0x11d4   : > { %3633 = vadd.xlane.f32.xlu0 %v3632_v30 }
0x11d5   : > { %v3635_v38 = vsel %vm1393_vm8, %v5816_v32, 0.0 }
0x11d6   : > { %3636 = vadd.xlane.f32.xlu1 %v3635_v38 }
0x1261   : > { %v3634_v40 = vpop.xlane.xlu0 %3633 }
0x1262   : > { %v3638_v58 = vmul.f32 0.03125, %v3634_v40 }
0x1263   : > { %v3637_v23 = vpop.xlane.xlu1 %3636 }
0x1264   : > { %v3640_v35 = vsub.f32 %v5812_v29, %v3638_v58  ;;  %v3639_v37 = vmul.f32 0.03125, %v3637_v23 }
0x1266   : > { %v3641_v39 = vsub.f32 %v5816_v32, %v3639_v37  ;;  %v3642_v42 = vmul.f32 %v3640_v35, %v3640_v35 }
0x1268   : > { %v3644_v44 = vsel %vm1393_vm8, %v3642_v42, 0.0  ;;  %v3643_v7 = vmul.f32 %v3641_v39, %v3641_v39 }
0x1269   : > { %3645 = vadd.xlane.f32.xlu0 %v3644_v44 }
0x126a   : > { %v3647_v10 = vsel %vm1393_vm8, %v3643_v7, 0.0 }
0x126b   : > { %3648 = vadd.xlane.f32.xlu1 %v3647_v10 }
0x12f6   : > { %v3646_v48 = vpop.xlane.xlu0 %3645 }
0x12f7   : > { %v3650_v50 = vmul.f32 0.03125, %v3646_v48 }
0x12f8   : > { %v3649_v51 = vpop.xlane.xlu1 %3648 }
0x12f9   : > { %v3652_v52 = vadd.f32 1e-06, %v3650_v50  ;;  %v3651_v22 = vmul.f32 0.03125, %v3649_v51 }
0x12fb   : > { %5100 = vrsqrt.f32 %v3652_v52  ;;  %v3653_v53 = vadd.f32 1e-06, %v3651_v22 }
0x12fd   : > { %5102 = vrsqrt.f32 %v3653_v53 }
0x1305   : > { %v5101_v59 = vpop.eup %5100 }
0x1306   : > { %v3656_v61 = vmul.f32 %v5101_v59, %v3640_v35 }
0x1307   : > { %v5103_v62 = vpop.eup %5102 }
0x1308   : > { %v3660_v1 = vmul.f32 %v3658_v60, %v3656_v61  ;;  %v3657_v2 = vmul.f32 %v5103_v62, %v3641_v39  ;;  %v5153_v62 = vmov 1.0  }
0x130a   : > { %v3661_v4 = vmul.f32 %v3659_v0, %v3657_v2  ;;  %v3662_v47 = vadd.f32 %v3660_v1, %v1609_v63 }
0x130c   : > { %v3663_v49 = vadd.f32 %v3661_v4, %v1612_v3 }
0x130e   : > { %v3668_v5 = vpack.c.bf16 %v3663_v49, %v3662_v47 }
0x1310   : > { %4933 = vmatmul.mubr.msk.bf16.vlgmr.msra.gmra.mrb[76].mxu0 %vm1393_vm8, %v3668_v5 }
0x13e3   : > { %v3725_v9 = vpop.f32.mrb[76].mxu0 }
0x13e4   : > { %v3726_v16 = vadd.f32 %v4504_v8, %v3725_v9  ;;  %v4934_v12 = vpop.f32.mrb[77].mxu0  ;;  %v4508_v9 = vld [vmem:[%s6000_s29] ss:$0 sm:$0xff] }
0x13e5   : > { %v3728_v14 = vpop.f32.mrb[78].mxu0 }
0x13e6   : > { %v3734_v15 = vmul.f32 0.70710677, %v3726_v16  ;;  %v3729_v17 = vadd.f32 %v4504_v8, %v3728_v14  ;;  %v4935_v18 = vpop.f32.mrb[79].mxu0  ;;  %v3732_v49 = vmul.f32 0.5, %v3726_v16  ;;  %v4431_v8 = vld [vmem:[%s5332_s23 + $0x5] ss:$0 sm:$0xff] }
0x13e7   : > { %v1727_v14 = vadd.f32 %v4431_v8, %v5551_v43  ;;  %v1730_v16 = vadd.f32 %v4431_v8, %v5553_v45  ;;  %s6001_s23 = sld [smem:[#allocation4_spill]] }
0x13e8   : > { %v3740_v19 = vand.u32 2147483647, %v3734_v15  ;;  %v3735_v20 = vmul.f32 0.70710677, %v3729_v17  ;;  %vm3736_vm13 = vcmp.lt.f32.partialorder %v3734_v15, 0.0  ;;  %v3733_v5 = vmul.f32 0.5, %v3729_v17 }
0x13e9   : > { %v3738_v63 = vsel %vm3736_vm13, -1.0, %v5153_v62 }
0x13ea   : > { %v3742_v21 = vmul.f32 0.3275911, %v3740_v19  ;;  %v3741_v24 = vand.u32 2147483647, %v3735_v20  ;;  %v3768_v27 = vsub.f32 0.0, %v3740_v19  ;;  %vm3737_vm14 = vcmp.lt.f32.partialorder %v3735_v20, 0.0 }
0x13eb   : > { %v3739_v3 = vsel %vm3737_vm14, -1.0, %v5153_v62 }
0x13ec   : > { %v3744_v25 = vadd.f32 1.0, %v3742_v21  ;;  %v3743_v34 = vmul.f32 0.3275911, %v3741_v24  ;;  %v3769_v28 = vsub.f32 0.0, %v3741_v24  ;;  %v3770_v55 = vmul.f32 %v3768_v27, %v3740_v19 }
0x13ed   : > { %p4514_p6 = scmp.ne.s32.totalorder %s6001_s23, 1 }
0x13ee   : > { %5104 = vrcp.f32 %v3744_v25  ;;  %v3745_v26 = vadd.f32 1.0, %v3743_v34  ;;  %v3771_v23 = vmul.f32 %v3769_v28, %v3741_v24  ;;  %v3772_v35 = vmul.f32 1.442695, %v3770_v55  ;;  %s6002_s11 = sld [smem:[#allocation26_spill]] (!%p4514_p6)  ;;  %s6003_s1 = sld [smem:[#allocation28_spill]] (!%p4514_p6) }
0x13ef   : > { %vm5155_vm0 = vmmov (!%p4514_p6), 0   ;;  %s6004_s2 = sld [smem:[#allocation27_spill]] (!%p4514_p6)  ;;  %s6005_s29 = sld [smem:[#allocation29_spill]] (!%p4514_p6)  ;;  %vm4109_vm1 = vcmask (!%p4514_p6), 15360  }
0x13f0   : > { %5106 = vrcp.f32 %v3745_v26  ;;  %v3774_v7 = vmul.f32 1.442695, %v3771_v23  ;;  %s6006_s0 = sld [smem:[#allocation30_spill]] (!%p4514_p6) }
0x13f1   : > { %5108 = vpow2.f32 %v3772_v35 }
0x13f2   : > { %5110 = vpow2.f32 %v3774_v7 }
0x13f4   : > { %v5114_v45 = vld [vmem:[%s6002_s11 + $0x10] sm:$0xff] (!%p4514_p6)   ;;  %v5116_v27 = vld [vmem:[%s6002_s11 + $0x18] sm:$0xff] (!%p4514_p6)   ;;  %v5117_v28 = vld [vmem:[%s6002_s11 + $0x8] sm:$0xff] (!%p4514_p6)  }
0x13f5   : > { %v4523_v8 = vld [vmem:[%s6005_s29] ss:$0 sm:$0xff] (!%p4514_p6) }
0x13f8   : > { %v5105_v30 = vpop.eup %5104 }
0x13f9   : > { %v3750_v38 = vmul.f32 1.0614054, %v5105_v30 }
0x13fa   : > { %v5107_v40 = vpop.eup %5106 }
0x13fb   : > { %v3752_v58 = vadd.f32 -1.4531521, %v3750_v38  ;;  %v3751_v37 = vmul.f32 1.0614054, %v5107_v40  ;;  %v5109_v56 = vpop.eup %5108 }
0x13fc   : > { %v5111_v60 = vpop.eup %5110 }
0x13fd   : > { %v3754_v39 = vmul.f32 %v5105_v30, %v3752_v58  ;;  %v3753_v42 = vadd.f32 -1.4531521, %v3751_v37 }
0x13ff   : > { %v3756_v44 = vadd.f32 1.4214138, %v3754_v39  ;;  %v3755_v10 = vmul.f32 %v5107_v40, %v3753_v42 }
0x1401   : > { %v3758_v11 = vmul.f32 %v5105_v30, %v3756_v44  ;;  %v3757_v46 = vadd.f32 1.4214138, %v3755_v10  ;;  %v5118_v44 = vld [vmem:[%s6003_s1] sm:$0xff] (!%p4514_p6)  }
0x1403   : > { %v3760_v48 = vadd.f32 -0.28449672, %v3758_v11  ;;  %v3759_v50 = vmul.f32 %v5107_v40, %v3757_v46 }
0x1405   : > { %v3762_v51 = vmul.f32 %v5105_v30, %v3760_v48  ;;  %v3761_v52 = vadd.f32 -0.28449672, %v3759_v50 }
0x1407   : > { %v3764_v22 = vadd.f32 0.2548296, %v3762_v51  ;;  %v3763_v53 = vmul.f32 %v5107_v40, %v3761_v52 }
0x1409   : > { %v3766_v54 = vmul.f32 %v5105_v30, %v3764_v22  ;;  %v3765_v57 = vadd.f32 0.2548296, %v3763_v53 }
0x140b   : > { %v3776_v59 = vmul.f32 %v5109_v56, %v3766_v54  ;;  %v3767_v33 = vmul.f32 %v5107_v40, %v3765_v57 }
0x140d   : > { %v3778_v61 = vsub.f32 1.0, %v3776_v59  ;;  %v3777_v0 = vmul.f32 %v5111_v60, %v3767_v33  ;;  %v4519_v33 = vld [vmem:[%s6004_s2 + $0x1] ss:$0 sm:$0xff] (!%p4514_p6) }
0x140f   : > { %v3780_v1 = vmul.f32 %v3778_v61, %v3738_v63  ;;  %v3779_v2 = vsub.f32 1.0, %v3777_v0  ;;  %v4515_v61 = vld [vmem:[%s6004_s2] ss:$0 sm:$0xff] (!%p4514_p6) }
0x1411   : > { %v3782_v4 = vadd.f32 1.0, %v3780_v1  ;;  %v3781_v47 = vmul.f32 %v3779_v2, %v3739_v3 }
0x1413   : > { %v3783_v13 = vadd.f32 1.0, %v3781_v47  ;;  %v3784_v6 = vmul.f32 %v3782_v4, %v3732_v49 }
0x1415   : > { %v3785_v31 = vmul.f32 %v3783_v13, %v3733_v5 }
0x1417   : > { %v3794_v36 = vpack.c.bf16 %v3785_v31, %v3784_v6 }
0x1419   : > { %4945 = vmatmul.mubr.msk.bf16.vlgmr.msra.gmra.mrb[76].mxu1 %vm3826_vm15, %v3794_v36 }
0x14ec   : > { %v3864_v12 = vpop.f32.mrb[76].mxu1 }
0x14ed   : > { %v3865_v15 = vadd.f32 %v4508_v9, %v3864_v12  ;;  %v4946_v18 = vpop.f32.mrb[77].mxu1 }
0x14ee   : > { %v3867_v19 = vpop.f32.mrb[78].mxu1 }
0x14ef   : > { %v3871_v17 = vmul.f32 %v3865_v15, %v1727_v14  ;;  %v3868_v20 = vadd.f32 %v4508_v9, %v3867_v19  ;;  %v4947_v21 = vpop.f32.mrb[79].mxu1  ;;  %3880 = sbr.rel (%p4514_p6) target bundleno = 5899 (0x170b), region = 132 }
0x14f1   : > { %v3873_v24 = vadd.f32 %v3871_v17, %v5812_v29  ;;  %v3872_v25 = vmul.f32 %v3868_v20, %v1730_v16  ;;  %v5154_v29 = vmov (!%p4514_p6), 0.0  }
0x14f2   : > { %4956 = vmatprep.subr.bf16.mxu1 (!%p4514_p6), %v5154_v29  ;;  %4948 = vmatprep.subr.bf16.mxu0 (!%p4514_p6), %v5154_v29 }
0x14f3   : > { %3875 = vst.msk [vmem:[#allocation2] sm:$0xff] %vm1393_vm8, %v3873_v24  ;;  %v3874_v34 = vadd.f32 %v3872_v25, %v5816_v32  ;;  %v4009_v43 = vsel (!%p4514_p6), %vm1393_vm8, %v3873_v24, 0.0  ;;  %4957 = vmatpush3.bf16.msra.mxu1 (!%p4514_p6), %v5114_v45  ;;  %v5115_v32 = vld [vmem:[%s6002_s11] sm:$0xff] (!%p4514_p6)   ;;  %4960 = vmatprep.mubr.msk.bf16.mxu1 (!%p4514_p6), %vm5155_vm0, %v5154_v29 }
0x14f4   : > { %4010 = vadd.xlane.f32.xlu0 (!%p4514_p6), %v4009_v43  ;;  %4958 = vmatprep.subr.bf16.mxu1 (!%p4514_p6), %v5154_v29 }
0x14f5   : > { %3876 = vst.msk [vmem:[#allocation2 + $0x8] sm:$0xff] %vm1393_vm8, %v3874_v34  ;;  %v4012_v26 = vsel (!%p4514_p6), %vm1393_vm8, %v3874_v34, 0.0  ;;  %4949 = vmatpush3.bf16.msra.mxu0 (!%p4514_p6), %v5115_v32  ;;  %4952 = vmatprep.mubr.msk.bf16.mxu0 (!%p4514_p6), %vm5155_vm0, %v5154_v29 }
0x14f6   : > { %4950 = vmatprep.subr.bf16.mxu0 %v5154_v29 }
0x14f7   : > { %4959 = vmatpush3.bf16.msra.mxu1 %v5116_v27 }
0x14f8   : > { %4013 = vadd.xlane.f32.xlu0 %v4012_v26 }
0x14f9   : > { %4951 = vmatpush3.bf16.msra.mxu0 %v5117_v28 }
0x14fa   : > { %4961 = vmatmul.mubr.msk.bf16.vlgmr.msra.gmra.mrb[0].mxu1 %vm1393_vm8, %v5459_v41  ;;  %4964 = vmatprep.subr.bf16.mxu0 %v5154_v29 }
0x14fc   : > { %4953 = vmatmul.mubr.msk.bf16.vlgmr.msra.gmra.mrb[0].mxu0 %vm1393_vm8, %v5459_v41  ;;  %v5119_v41 = vld [vmem:[%s6003_s1 + $0x8] sm:$0xff]  }
0x14fd   : > { %4968 = vmatprep.mubr.msk.bf16.mxu0 %vm5155_vm0, %v5154_v29  ;;  %4965 = vmatpush3.bf16.msra.mxu0 %v5118_v44 }
0x14fe   : > { %4966 = vmatprep.subr.bf16.mxu0 %v5154_v29 }
0x1501   : > { %4967 = vmatpush3.bf16.msra.mxu0 %v5119_v41 }
0x1581   : > { %v4011_v30 = vpop.xlane.xlu0 %4010 }
0x1582   : > { %v4015_v55 = vmul.f32 0.03125, %v4011_v30 }
0x1584   : > { %v4017_v38 = vsub.f32 %v3873_v24, %v4015_v55 }
0x1585   : > { %v4014_v40 = vpop.xlane.xlu0 %4013 }
0x1586   : > { %v4016_v58 = vmul.f32 0.03125, %v4014_v40  ;;  %v4019_v23 = vmul.f32 %v4017_v38, %v4017_v38 }
0x1588   : > { %v4018_v35 = vsub.f32 %v3874_v34, %v4016_v58  ;;  %v4021_v37 = vsel %vm1393_vm8, %v4019_v23, 0.0 }
0x1589   : > { %4022 = vadd.xlane.f32.xlu1 %v4021_v37 }
0x158a   : > { %v4020_v39 = vmul.f32 %v4018_v35, %v4018_v35 }
0x158c   : > { %v4024_v42 = vsel %vm1393_vm8, %v4020_v39, 0.0 }
0x158d   : > { %4025 = vadd.xlane.f32.xlu1 %v4024_v42 }
0x15cd   : > { %v4002_v7 = vpop.f32.mrb[0].mxu1 }
0x15ce   : > { %v4962_v10 = vpop.f32.mrb[1].mxu1  ;;  %v4003_v60 = vadd.f32 %v4519_v33, %v4002_v7 }
0x15cf   : > { %v4005_v11 = vpop.f32.mrb[2].mxu1  ;;  %v3943_v46 = vpop.f32.mrb[0].mxu0 }
0x15d0   : > { %v4963_v48 = vpop.f32.mrb[3].mxu1  ;;  %v4954_v50 = vpop.f32.mrb[1].mxu0  ;;  %v4035_v62 = vadd.f32 1.0, %v4003_v60  ;;  %v4006_v1 = vadd.f32 %v4519_v33, %v4005_v11  ;;  %v3944_v2 = vadd.f32 %v4515_v61, %v3943_v46 }
0x15d1   : > { %v3946_v51 = vpop.f32.mrb[2].mxu0 }
0x15d2   : > { %v4955_v52 = vpop.f32.mrb[3].mxu0  ;;  %v4036_v49 = vadd.f32 1.0, %v4006_v1  ;;  %v3947_v6 = vadd.f32 %v4515_v61, %v3946_v51 }
0x1616   : > { %v4023_v22 = vpop.xlane.xlu1 %4022 }
0x1617   : > { %v4027_v53 = vmul.f32 0.03125, %v4023_v22 }
0x1619   : > { %v4029_v54 = vadd.f32 1e-06, %v4027_v53 }
0x161a   : > { %v4026_v56 = vpop.xlane.xlu1 %4025 }
0x161b   : > { %5120 = vrsqrt.f32 %v4029_v54  ;;  %v4028_v57 = vmul.f32 0.03125, %v4026_v56 }
0x161d   : > { %v4030_v59 = vadd.f32 1e-06, %v4028_v57 }
0x161f   : > { %5122 = vrsqrt.f32 %v4030_v59 }
0x1625   : > { %v5121_v63 = vpop.eup %5120 }
0x1626   : > { %v4033_v0 = vmul.f32 %v5121_v63, %v4017_v38 }
0x1628   : > { %v4037_v3 = vmul.f32 %v4035_v62, %v4033_v0 }
0x1629   : > { %v5123_v4 = vpop.eup %5122 }
0x162a   : > { %v4034_v47 = vmul.f32 %v5123_v4, %v4018_v35  ;;  %v4039_v5 = vadd.f32 %v4037_v3, %v3944_v2 }
0x162c   : > { %v4038_v13 = vmul.f32 %v4036_v49, %v4034_v47 }
0x162e   : > { %v4040_v31 = vadd.f32 %v4038_v13, %v3947_v6 }
0x1630   : > { %v4045_v36 = vpack.c.bf16 %v4040_v31, %v4039_v5 }
0x1632   : > { %4969 = vmatmul.mubr.msk.bf16.vlgmr.msra.gmra.mrb[4].mxu0 %vm1393_vm8, %v4045_v36 }
0x1705   : > { %v4102_v9 = vpop.f32.mrb[4].mxu0 }
0x1706   : > { %v4103_v12 = vadd.f32 %v4523_v8, %v4102_v9  ;;  %v4970_v14 = vpop.f32.mrb[5].mxu0 }
0x1707   : > { %v4105_v15 = vpop.f32.mrb[6].mxu0 }
0x1708   : > { %4110 = vst.msk [vmem:[%s6006_s0] sm:$0xff] %vm4109_vm1, %v4103_v12  ;;  %v4106_v18 = vadd.f32 %v4523_v8, %v4105_v15  ;;  %v4971_v19 = vpop.f32.mrb[7].mxu0 }
0x170a   : > { %4111 = vst.msk [vmem:[%s6006_s0 + $0x8] sm:$0xff] %vm4109_vm1, %v4106_v18 }
0x170b PF: > { %s6007_s7 = sld [smem:[#allocation6_spill]]  ;;  %s6008_s27 = sld [smem:[#allocation5_spill]] }
0x170c   : > { %s6009_s3 = sld [smem:[#allocation7_spill]] }
0x1711   : > { %s36_s7 = sadd.s32 1, %s6007_s7  }
0x1712   : > { %p33_p7 = scmp.ge.s32.totalorder %s36_s7, 4  }
0x1714   :  { %35 = sbr.rel (!%p33_p7) target bundleno = 23 (0x17), region = 213 }

</bundles_post_ra>
